<compile_context>
chip_gen: v6e
topology: v6e:2x2x1
jax: 0.10.0
libtpu: 0.0.40
codegen_flags: <defaults>
</compile_context>

<pallas_src>
import functools

import jax
import jax.numpy as jnp
from jax.experimental import pallas as pl
from jax.experimental.pallas import tpu as pltpu


def _round_up(x, m):
    return ((x + m - 1) // m) * m


# ------------------------------ Pallas kernel ------------------------------ #
def _conv_taps_kernel(xs_hbm, w_ref, b_ref, o_ref, slab_ref, sem_ref,
                      *, shifts, tm, slab_rows):
    """Fused 3x3-conv tile:  out[p,:] = relu(b + sum_t slab[p+shift_t,:] @ W_t).

    xs_hbm  : [N, rows, Cs]      bf16, HBM resident (manual slab DMA)
    w_ref   : [T, Cs, Cout_pad]  bf16, resident VMEM (constant block)
    b_ref   : [1, Cout_pad]      f32,  resident VMEM (constant block)
    o_ref   : [tm, Cout_pad]     bf16, auto-pipelined output tile
    slab_ref: [slab_rows, Cs]    bf16 VMEM scratch (tile rows + halo)
    """
    n = pl.program_id(0)          # image index
    i = pl.program_id(1)          # output-row tile index
    r0 = pl.multiple_of(i * tm, 8)

    # Bring this tile's input rows (plus halo) into VMEM.
    # TODO(synk): single-buffered; a 2-deep prefetch of the next tile would
    # hide this DMA but needs per-core priming logic under megacore sharding.
    cp = pltpu.make_async_copy(xs_hbm.at[n, pl.ds(r0, slab_rows)],
                               slab_ref, sem_ref.at[0])
    cp.start()
    cp.wait()

    acc = jnp.dot(slab_ref[pl.ds(shifts[0], tm), :], w_ref[0],
                  preferred_element_type=jnp.float32)
    for t in range(1, len(shifts)):
        acc = acc + jnp.dot(slab_ref[pl.ds(shifts[t], tm), :], w_ref[t],
                            preferred_element_type=jnp.float32)

    o_ref[...] = jnp.maximum(acc + b_ref[...], 0.0).astype(o_ref.dtype)


# ------------------------- conv3x3 + bias + ReLU --------------------------- #
def conv3x3_relu_pallas(x, w, b, stride, cout_pad, *, tm_max=512):
    """3x3 conv (padding=1) + bias + ReLU.

    x : [N, H, W, Cp] bf16 NHWC, channel-padded input (pad channels are zero)
    w : [3, 3, cin, cout] f32 ;  b : [cout] f32
    Returns [N, Hout, Wout, cout_pad] bf16 (channels zero-padded to cout_pad).
    """
    N, H, W, Cp = x.shape
    cin, cout = w.shape[2], w.shape[3]
    assert cin <= Cp

    if stride == 1:
        Hout, Wout = H, W
        halo = 2
        Hs, Ws = H + 2, W + 2
        xs = jnp.pad(x, ((0, 0), (1, 1), (1, 1), (0, 0)))
        Cs = Cp
        shifts = tuple(dh * Ws + dw for dh in range(3) for dw in range(3))
        wt = jnp.zeros((9, Cs, cout_pad), jnp.float32)
        wt = wt.at[:, :cin, :cout].set(w.reshape(9, cin, cout))
    elif stride == 2:
        # Space-to-depth (factor 2) turns the strided 3x3 conv into 4 shifted
        # unit-stride taps over a [Hout+1, Wout+1, 4*Cp] image (same bytes).
        Hout, Wout = (H + 1) // 2, (W + 1) // 2
        halo = 1
        Hs, Ws = Hout + 1, Wout + 1
        xp = jnp.pad(x, ((0, 0), (1, 2 * Hs - H - 1), (1, 2 * Ws - W - 1), (0, 0)))
        xs = xp.reshape(N, Hs, 2, Ws, 2, Cp).transpose(0, 1, 3, 2, 4, 5)
        xs = xs.reshape(N, Hs, Ws, 4 * Cp)
        Cs = 4 * Cp
        shifts = tuple(dr * Ws + dc for dr in range(2) for dc in range(2))
        wt = jnp.zeros((4, Cs, cout_pad), jnp.float32)
        for dh in range(3):
            for dw in range(3):
                dr, pr, dc, pc = dh // 2, dh % 2, dw // 2, dw % 2
                t, g = dr * 2 + dc, pr * 2 + pc
                wt = wt.at[t, g * Cp:g * Cp + cin, :cout].set(w[dh, dw])
    else:
        raise ValueError("stride must be 1 or 2")

    # Flatten spatial dims.  Output is computed on the (Hout, Ws) grid; the
    # `halo` garbage columns per row are sliced off afterwards.  Every tap is
    # then a contiguous shifted slice of the flat input -> clean MXU matmuls.
    Lo = Hout * Ws                       # flat output rows per image
    max_shift = halo * Ws + halo
    tm = min(tm_max, _round_up(Lo, 8))   # big, 8-aligned row tiles
    n_tiles = pl.cdiv(Lo, tm)
    lo_pad = n_tiles * tm
    msp = _round_up(max_shift, 8)
    slab_rows = tm + msp
    rows_needed = lo_pad + msp

    xs_flat = xs.reshape(N, Hs * Ws, Cs)
    xs_flat = jnp.pad(xs_flat, ((0, 0), (0, rows_needed - Hs * Ws), (0, 0)))
    xs_flat = xs_flat.astype(jnp.bfloat16)
    wt = wt.astype(jnp.bfloat16)
    b_pad = jnp.zeros((1, cout_pad), jnp.float32).at[0, :cout].set(
        b.astype(jnp.float32))

    kernel = functools.partial(_conv_taps_kernel, shifts=shifts, tm=tm,
                               slab_rows=slab_rows)
    n_taps = wt.shape[0]

    o_flat = pl.pallas_call(
        kernel,
        out_shape=jax.ShapeDtypeStruct((N, lo_pad, cout_pad), jnp.bfloat16),
        grid=(N, n_tiles),
        in_specs=[
            pl.BlockSpec(memory_space=pl.ANY),                         # HBM input
            pl.BlockSpec((n_taps, Cs, cout_pad), lambda n, i: (0, 0, 0)),
            pl.BlockSpec((1, cout_pad), lambda n, i: (0, 0)),
        ],
        out_specs=pl.BlockSpec((None, tm, cout_pad), lambda n, i: (n, i, 0)),
        scratch_shapes=[
            pltpu.VMEM((slab_rows, Cs), jnp.bfloat16),
            pltpu.SemaphoreType.DMA((1,)),
        ],
        compiler_params=pltpu.CompilerParams(
            dimension_semantics=("parallel", "parallel"),
            vmem_limit_bytes=32 * 1024 * 1024),
    )(xs_flat, wt, b_pad)

    out = o_flat[:, :Lo, :].reshape(N, Hout, Ws, cout_pad)[:, :, :Wout, :]
    return out


# ----------------------- synthetic backbone parameters --------------------- #
def init_backbone_params(key, in_ch=4, base=8, dtype=jnp.float32):
    """Deterministic ResNet-ish parameter set (stem, layer1..layer4)."""
    specs = [
        ("stem",   in_ch,    base,     2),
        ("layer1", base,     base,     1),
        ("layer2", base,     base * 2, 2),
        ("layer3", base * 2, base * 4, 2),
        ("layer4", base * 4, base * 8, 2),
    ]
    params = {}
    for name, cin, cout, stride in specs:
        key, kw, kb = jax.random.split(key, 3)
        scale = 1.0 / jnp.sqrt(9.0 * cin)
        params[name] = {
            "w": jax.random.normal(kw, (3, 3, cin, cout), dtype) * scale,
            "b": jax.random.normal(kb, (cout,), dtype) * 0.01,
            "stride": stride,
        }
    return params


# ------------------------------- BackboneBase ------------------------------ #
class BackboneBase:
    """JAX/Pallas equivalent of the PyTorch BackboneBase forward.

    return_interm_layers=True -> returns [layer2_out, layer3_out, layer4_out]
    (each NCHW, f32), matching IntermediateLayerGetter({'layer2':'0',
    'layer3':'1', 'layer4':'2'}).
    # TODO(synk): requires_grad_ / freezing logic is training-only; no-op here.
    """

    LAYER_ORDER = ["stem", "layer1", "layer2", "layer3", "layer4"]

    def __init__(self, params, return_interm_layers=True):
        self.params = params
        self.return_layers = (["layer2", "layer3", "layer4"]
                              if return_interm_layers else ["layer4"])

    def __call__(self, x_nchw):
        in_ch = x_nchw.shape[1]
        # Pad input channels so the stem's space-to-depth is lane-dense (4*32=128).
        cin_phys = _round_up(in_ch, 32)
        x = jnp.transpose(x_nchw, (0, 2, 3, 1))                 # NCHW -> NHWC once
        x = jnp.pad(x, ((0, 0), (0, 0), (0, 0), (0, cin_phys - in_ch)))
        x = x.astype(jnp.bfloat16)

        outs = []
        for name in self.LAYER_ORDER:
            p = self.params[name]
            cout_true = p["w"].shape[-1]
            cout_pad = _round_up(cout_true, 128)
            x = conv3x3_relu_pallas(x, p["w"], p["b"], p["stride"], cout_pad)
            if name in self.return_layers:
                outs.append(jnp.transpose(
                    x[..., :cout_true].astype(jnp.float32), (0, 3, 1, 2)))
        return outs
        # TODO(synk): at these toy sizes all five layers fit in VMEM and could
        # be fused into one pallas_call to drop the inter-layer HBM round-trips.


# --------------------------------- reference -------------------------------- #
def _ref_forward(params, x_nchw, return_layers):
    """Mirrors the kernel's numerics (bf16 activations/weights, f32 accum)."""
    x = jnp.transpose(x_nchw, (0, 2, 3, 1)).astype(jnp.bfloat16)
    outs = []
    for name in BackboneBase.LAYER_ORDER:
        p = params[name]
        s = p["stride"]
        y = jax.lax.conv_general_dilated(
            x, p["w"].astype(jnp.bfloat16), window_strides=(s, s),
            padding=((1, 1), (1, 1)),
            dimension_numbers=("NHWC", "HWIO", "NHWC"),
            preferred_element_type=jnp.float32)
        x = jnp.maximum(y + p["b"].astype(jnp.float32), 0.0).astype(jnp.bfloat16)
        if name in return_layers:
            outs.append(jnp.transpose(x.astype(jnp.float32), (0, 3, 1, 2)))
    return outs


# ----------------------------------- main ----------------------------------- #
if __name__ == "__main__":
    key = jax.random.PRNGKey(0)
    kx, kp = jax.random.split(key)

    x = jax.random.normal(kx, (2, 4, 16, 16), jnp.float32)      # NCHW input
    params = init_backbone_params(kp, in_ch=4, base=8)

    model = BackboneBase(params, return_interm_layers=True)
    outs = jax.jit(model.__call__)(x)
    outs = jax.block_until_ready(outs)

    refs = _ref_forward(params, x, model.return_layers)
    assert len(outs) == 3
    for o, r in zip(outs, refs):
        assert o.shape == r.shape, (o.shape, r.shape)
        err = float(jnp.max(jnp.abs(o - r)))
        assert jnp.allclose(o, r, atol=2e-2, rtol=2e-2), err

    print("KERNEL_OK")
</pallas_src>

<mosaic_0001>
module attributes {stable_mosaic.version = 11 : i64} {
  func.func @_conv_taps_kernel(%arg0: i32, %arg1: i32, %arg2: memref<2x88x128xbf16, #tpu.memory_space<any>>, %arg3: memref<4x128x128xbf16, #tpu.memory_space<vmem>>, %arg4: memref<1x128xf32, #tpu.memory_space<vmem>>, %arg5: memref<1x72x128xbf16, #tpu.memory_space<vmem>>, %arg6: memref<88x128xbf16, #tpu.memory_space<vmem>>, %arg7: memref<1x!tpu.dma_semaphore, #tpu.memory_space<semaphore_mem>>) attributes {dimension_semantics = [#tpu.dimension_semantics<parallel>, #tpu.dimension_semantics<parallel>], iteration_bounds = array<i64: 2, 1>, scalar_prefetch = 0 : i64, scratch_operands = 2 : i64, tpu.core_type = #tpu.core_type<tc>, window_params = [{}, {pipeline_mode = #tpu.pipeline_mode<synchronous>, transform_indices = @transform_1, window_bounds = array<i64: 4, 128, 128>}, {pipeline_mode = #tpu.pipeline_mode<synchronous>, transform_indices = @transform_2, window_bounds = array<i64: 1, 128>}, {transform_indices = @transform_3, window_bounds = array<i64: 1, 72, 128>}]} {
    %c72_i32 = arith.constant 72 : i32
    %0 = arith.muli %arg1, %c72_i32 : i32
    %1 = tpu.assume_multiple %0, 8 : i32
    %c0_i32 = arith.constant 0 : i32
    %c0_i32_0 = arith.constant 0 : i32
    %2 = tpu.memref_slice %arg2[%arg0, %1, %c0_i32_0] : memref<2x88x128xbf16, #tpu.memory_space<any>> -> memref<1x88x128xbf16, #tpu.memory_space<any>>
    %3 = tpu.memref_squeeze %2 : memref<1x88x128xbf16, #tpu.memory_space<any>> -> memref<88x128xbf16, #tpu.memory_space<any>>
    %4 = tpu.memref_slice %arg7[%c0_i32] : memref<1x!tpu.dma_semaphore, #tpu.memory_space<semaphore_mem>> -> memref<1x!tpu.dma_semaphore, #tpu.memory_space<semaphore_mem>>
    %5 = tpu.memref_squeeze %4 : memref<1x!tpu.dma_semaphore, #tpu.memory_space<semaphore_mem>> -> memref<!tpu.dma_semaphore, #tpu.memory_space<semaphore_mem>>
    tpu.enqueue_dma source(%3 : memref<88x128xbf16, #tpu.memory_space<any>>) target(%arg6 : memref<88x128xbf16, #tpu.memory_space<vmem>>) target_semaphore(%5 : memref<!tpu.dma_semaphore, #tpu.memory_space<semaphore_mem>>)
    %c0_i32_1 = arith.constant 0 : i32
    %c0_i32_2 = arith.constant 0 : i32
    %6 = tpu.memref_slice %arg2[%arg0, %1, %c0_i32_2] : memref<2x88x128xbf16, #tpu.memory_space<any>> -> memref<1x88x128xbf16, #tpu.memory_space<any>>
    %7 = tpu.memref_squeeze %6 : memref<1x88x128xbf16, #tpu.memory_space<any>> -> memref<88x128xbf16, #tpu.memory_space<any>>
    %8 = tpu.memref_slice %arg7[%c0_i32_1] : memref<1x!tpu.dma_semaphore, #tpu.memory_space<semaphore_mem>> -> memref<1x!tpu.dma_semaphore, #tpu.memory_space<semaphore_mem>>
    %9 = tpu.memref_squeeze %8 : memref<1x!tpu.dma_semaphore, #tpu.memory_space<semaphore_mem>> -> memref<!tpu.dma_semaphore, #tpu.memory_space<semaphore_mem>>
    tpu.wait_dma2 semaphore(%9 : memref<!tpu.dma_semaphore, #tpu.memory_space<semaphore_mem>>) src(%7 : memref<88x128xbf16, #tpu.memory_space<any>>) dst(%arg6 : memref<88x128xbf16, #tpu.memory_space<vmem>>)
    %c0 = arith.constant 0 : index
    %c0_3 = arith.constant 0 : index
    %10 = vector.load %arg6[%c0, %c0_3] : memref<88x128xbf16, #tpu.memory_space<vmem>>, vector<72x128xbf16>
    %c0_4 = arith.constant 0 : index
    %c0_5 = arith.constant 0 : index
    %c0_6 = arith.constant 0 : index
    %11 = vector.load %arg3[%c0_4, %c0_5, %c0_6] : memref<4x128x128xbf16, #tpu.memory_space<vmem>>, vector<1x128x128xbf16>
    %12 = vector.shape_cast %11 : vector<1x128x128xbf16> to vector<128x128xbf16>
    %cst = arith.constant dense<0.000000e+00> : vector<72x128xf32>
    %13 = tpu.matmul %10, %12, %cst {dimension_numbers = #tpu.dot_dimension_numbers<[1], [0], [0], [1], [0, 0, 1, 1], [], []>} : vector<72x128xbf16>, vector<128x128xbf16>, vector<72x128xf32> -> vector<72x128xf32>
    %c1 = arith.constant 1 : index
    %c0_7 = arith.constant 0 : index
    %14 = vector.load %arg6[%c1, %c0_7] : memref<88x128xbf16, #tpu.memory_space<vmem>>, vector<72x128xbf16>
    %c1_8 = arith.constant 1 : index
    %c0_9 = arith.constant 0 : index
    %c0_10 = arith.constant 0 : index
    %15 = vector.load %arg3[%c1_8, %c0_9, %c0_10] : memref<4x128x128xbf16, #tpu.memory_space<vmem>>, vector<1x128x128xbf16>
    %16 = vector.shape_cast %15 : vector<1x128x128xbf16> to vector<128x128xbf16>
    %cst_11 = arith.constant dense<0.000000e+00> : vector<72x128xf32>
    %17 = tpu.matmul %14, %16, %cst_11 {dimension_numbers = #tpu.dot_dimension_numbers<[1], [0], [0], [1], [0, 0, 1, 1], [], []>} : vector<72x128xbf16>, vector<128x128xbf16>, vector<72x128xf32> -> vector<72x128xf32>
    %18 = arith.addf %13, %17 : vector<72x128xf32>
    %c9 = arith.constant 9 : index
    %c0_12 = arith.constant 0 : index
    %19 = vector.load %arg6[%c9, %c0_12] : memref<88x128xbf16, #tpu.memory_space<vmem>>, vector<72x128xbf16>
    %c2 = arith.constant 2 : index
    %c0_13 = arith.constant 0 : index
    %c0_14 = arith.constant 0 : index
    %20 = vector.load %arg3[%c2, %c0_13, %c0_14] : memref<4x128x128xbf16, #tpu.memory_space<vmem>>, vector<1x128x128xbf16>
    %21 = vector.shape_cast %20 : vector<1x128x128xbf16> to vector<128x128xbf16>
    %cst_15 = arith.constant dense<0.000000e+00> : vector<72x128xf32>
    %22 = tpu.matmul %19, %21, %cst_15 {dimension_numbers = #tpu.dot_dimension_numbers<[1], [0], [0], [1], [0, 0, 1, 1], [], []>} : vector<72x128xbf16>, vector<128x128xbf16>, vector<72x128xf32> -> vector<72x128xf32>
    %23 = arith.addf %18, %22 : vector<72x128xf32>
    %c10 = arith.constant 10 : index
    %c0_16 = arith.constant 0 : index
    %24 = vector.load %arg6[%c10, %c0_16] : memref<88x128xbf16, #tpu.memory_space<vmem>>, vector<72x128xbf16>
    %c3 = arith.constant 3 : index
    %c0_17 = arith.constant 0 : index
    %c0_18 = arith.constant 0 : index
    %25 = vector.load %arg3[%c3, %c0_17, %c0_18] : memref<4x128x128xbf16, #tpu.memory_space<vmem>>, vector<1x128x128xbf16>
    %26 = vector.shape_cast %25 : vector<1x128x128xbf16> to vector<128x128xbf16>
    %cst_19 = arith.constant dense<0.000000e+00> : vector<72x128xf32>
    %27 = tpu.matmul %24, %26, %cst_19 {dimension_numbers = #tpu.dot_dimension_numbers<[1], [0], [0], [1], [0, 0, 1, 1], [], []>} : vector<72x128xbf16>, vector<128x128xbf16>, vector<72x128xf32> -> vector<72x128xf32>
    %28 = arith.addf %23, %27 : vector<72x128xf32>
    %c0_20 = arith.constant 0 : index
    %c0_21 = arith.constant 0 : index
    %29 = vector.load %arg4[%c0_20, %c0_21] : memref<1x128xf32, #tpu.memory_space<vmem>>, vector<1x128xf32>
    %30 = vector.broadcast %29 : vector<1x128xf32> to vector<72x128xf32>
    %31 = arith.addf %28, %30 : vector<72x128xf32>
    %cst_22 = arith.constant 0.000000e+00 : f32
    %32 = vector.broadcast %cst_22 : f32 to vector<72x128xf32>
    %33 = arith.maximumf %31, %32 : vector<72x128xf32>
    %34 = arith.truncf %33 : vector<72x128xf32> to vector<72x128xbf16>
    %c0_23 = arith.constant 0 : index
    %c0_24 = arith.constant 0 : index
    %c0_25 = arith.constant 0 : index
    %35 = vector.load %arg5[%c0_23, %c0_24, %c0_25] : memref<1x72x128xbf16, #tpu.memory_space<vmem>>, vector<1x72x128xbf16>
    %36 = vector.shape_cast %35 : vector<1x72x128xbf16> to vector<72x128xbf16>
    %37 = vector.shape_cast %34 : vector<72x128xbf16> to vector<1x72x128xbf16>
    tpu.vector_store %arg5[%c0_23, %c0_24, %c0_25], %37 {strides = array<i32>} : memref<1x72x128xbf16, #tpu.memory_space<vmem>>, vector<1x72x128xbf16>,
    return
  }
  func.func @transform_1(%arg0: i32, %arg1: i32) -> (i32, i32, i32) {
    %c0_i32 = arith.constant 0 : i32
    %c0_i32_0 = arith.constant 0 : i32
    %c0_i32_1 = arith.constant 0 : i32
    %c0_i32_2 = arith.constant 0 : i32
    return %c0_i32, %c0_i32_0, %c0_i32_1 : i32, i32, i32
  }
  func.func @transform_2(%arg0: i32, %arg1: i32) -> (i32, i32) {
    %c0_i32 = arith.constant 0 : i32
    %c0_i32_0 = arith.constant 0 : i32
    %c0_i32_1 = arith.constant 0 : i32
    return %c0_i32, %c0_i32_0 : i32, i32
  }
  func.func @transform_3(%arg0: i32, %arg1: i32) -> (i32, i32, i32) {
    %c0_i32 = arith.constant 0 : i32
    %c0_i32_0 = arith.constant 0 : i32
    return %arg0, %arg1, %c0_i32 : i32, i32, i32
  }
}

module attributes {stable_mosaic.version = 11 : i64} {
  func.func @_conv_taps_kernel(%arg0: i32, %arg1: i32, %arg2: memref<2x104x128xbf16, #tpu.memory_space<any>>, %arg3: memref<9x128x128xbf16, #tpu.memory_space<vmem>>, %arg4: memref<1x128xf32, #tpu.memory_space<vmem>>, %arg5: memref<1x80x128xbf16, #tpu.memory_space<vmem>>, %arg6: memref<104x128xbf16, #tpu.memory_space<vmem>>, %arg7: memref<1x!tpu.dma_semaphore, #tpu.memory_space<semaphore_mem>>) attributes {dimension_semantics = [#tpu.dimension_semantics<parallel>, #tpu.dimension_semantics<parallel>], iteration_bounds = array<i64: 2, 1>, scalar_prefetch = 0 : i64, scratch_operands = 2 : i64, tpu.core_type = #tpu.core_type<tc>, window_params = [{}, {pipeline_mode = #tpu.pipeline_mode<synchronous>, transform_indices = @transform_1, window_bounds = array<i64: 9, 128, 128>}, {pipeline_mode = #tpu.pipeline_mode<synchronous>, transform_indices = @transform_2, window_bounds = array<i64: 1, 128>}, {transform_indices = @transform_3, window_bounds = array<i64: 1, 80, 128>}]} {
    %c80_i32 = arith.constant 80 : i32
    %0 = arith.muli %arg1, %c80_i32 : i32
    %1 = tpu.assume_multiple %0, 8 : i32
    %c0_i32 = arith.constant 0 : i32
    %c0_i32_0 = arith.constant 0 : i32
    %2 = tpu.memref_slice %arg2[%arg0, %1, %c0_i32_0] : memref<2x104x128xbf16, #tpu.memory_space<any>> -> memref<1x104x128xbf16, #tpu.memory_space<any>>
    %3 = tpu.memref_squeeze %2 : memref<1x104x128xbf16, #tpu.memory_space<any>> -> memref<104x128xbf16, #tpu.memory_space<any>>
    %4 = tpu.memref_slice %arg7[%c0_i32] : memref<1x!tpu.dma_semaphore, #tpu.memory_space<semaphore_mem>> -> memref<1x!tpu.dma_semaphore, #tpu.memory_space<semaphore_mem>>
    %5 = tpu.memref_squeeze %4 : memref<1x!tpu.dma_semaphore, #tpu.memory_space<semaphore_mem>> -> memref<!tpu.dma_semaphore, #tpu.memory_space<semaphore_mem>>
    tpu.enqueue_dma source(%3 : memref<104x128xbf16, #tpu.memory_space<any>>) target(%arg6 : memref<104x128xbf16, #tpu.memory_space<vmem>>) target_semaphore(%5 : memref<!tpu.dma_semaphore, #tpu.memory_space<semaphore_mem>>)
    %c0_i32_1 = arith.constant 0 : i32
    %c0_i32_2 = arith.constant 0 : i32
    %6 = tpu.memref_slice %arg2[%arg0, %1, %c0_i32_2] : memref<2x104x128xbf16, #tpu.memory_space<any>> -> memref<1x104x128xbf16, #tpu.memory_space<any>>
    %7 = tpu.memref_squeeze %6 : memref<1x104x128xbf16, #tpu.memory_space<any>> -> memref<104x128xbf16, #tpu.memory_space<any>>
    %8 = tpu.memref_slice %arg7[%c0_i32_1] : memref<1x!tpu.dma_semaphore, #tpu.memory_space<semaphore_mem>> -> memref<1x!tpu.dma_semaphore, #tpu.memory_space<semaphore_mem>>
    %9 = tpu.memref_squeeze %8 : memref<1x!tpu.dma_semaphore, #tpu.memory_space<semaphore_mem>> -> memref<!tpu.dma_semaphore, #tpu.memory_space<semaphore_mem>>
    tpu.wait_dma2 semaphore(%9 : memref<!tpu.dma_semaphore, #tpu.memory_space<semaphore_mem>>) src(%7 : memref<104x128xbf16, #tpu.memory_space<any>>) dst(%arg6 : memref<104x128xbf16, #tpu.memory_space<vmem>>)
    %c0 = arith.constant 0 : index
    %c0_3 = arith.constant 0 : index
    %10 = vector.load %arg6[%c0, %c0_3] : memref<104x128xbf16, #tpu.memory_space<vmem>>, vector<80x128xbf16>
    %c0_4 = arith.constant 0 : index
    %c0_5 = arith.constant 0 : index
    %c0_6 = arith.constant 0 : index
    %11 = vector.load %arg3[%c0_4, %c0_5, %c0_6] : memref<9x128x128xbf16, #tpu.memory_space<vmem>>, vector<1x128x128xbf16>
    %12 = vector.shape_cast %11 : vector<1x128x128xbf16> to vector<128x128xbf16>
    %cst = arith.constant dense<0.000000e+00> : vector<80x128xf32>
    %13 = tpu.matmul %10, %12, %cst {dimension_numbers = #tpu.dot_dimension_numbers<[1], [0], [0], [1], [0, 0, 1, 1], [], []>} : vector<80x128xbf16>, vector<128x128xbf16>, vector<80x128xf32> -> vector<80x128xf32>
    %c1 = arith.constant 1 : index
    %c0_7 = arith.constant 0 : index
    %14 = vector.load %arg6[%c1, %c0_7] : memref<104x128xbf16, #tpu.memory_space<vmem>>, vector<80x128xbf16>
    %c1_8 = arith.constant 1 : index
    %c0_9 = arith.constant 0 : index
    %c0_10 = arith.constant 0 : index
    %15 = vector.load %arg3[%c1_8, %c0_9, %c0_10] : memref<9x128x128xbf16, #tpu.memory_space<vmem>>, vector<1x128x128xbf16>
    %16 = vector.shape_cast %15 : vector<1x128x128xbf16> to vector<128x128xbf16>
    %cst_11 = arith.constant dense<0.000000e+00> : vector<80x128xf32>
    %17 = tpu.matmul %14, %16, %cst_11 {dimension_numbers = #tpu.dot_dimension_numbers<[1], [0], [0], [1], [0, 0, 1, 1], [], []>} : vector<80x128xbf16>, vector<128x128xbf16>, vector<80x128xf32> -> vector<80x128xf32>
    %18 = arith.addf %13, %17 : vector<80x128xf32>
    %c2 = arith.constant 2 : index
    %c0_12 = arith.constant 0 : index
    %19 = vector.load %arg6[%c2, %c0_12] : memref<104x128xbf16, #tpu.memory_space<vmem>>, vector<80x128xbf16>
    %c2_13 = arith.constant 2 : index
    %c0_14 = arith.constant 0 : index
    %c0_15 = arith.constant 0 : index
    %20 = vector.load %arg3[%c2_13, %c0_14, %c0_15] : memref<9x128x128xbf16, #tpu.memory_space<vmem>>, vector<1x128x128xbf16>
    %21 = vector.shape_cast %20 : vector<1x128x128xbf16> to vector<128x128xbf16>
    %cst_16 = arith.constant dense<0.000000e+00> : vector<80x128xf32>
    %22 = tpu.matmul %19, %21, %cst_16 {dimension_numbers = #tpu.dot_dimension_numbers<[1], [0], [0], [1], [0, 0, 1, 1], [], []>} : vector<80x128xbf16>, vector<128x128xbf16>, vector<80x128xf32> -> vector<80x128xf32>
    %23 = arith.addf %18, %22 : vector<80x128xf32>
    %c10 = arith.constant 10 : index
    %c0_17 = arith.constant 0 : index
    %24 = vector.load %arg6[%c10, %c0_17] : memref<104x128xbf16, #tpu.memory_space<vmem>>, vector<80x128xbf16>
    %c3 = arith.constant 3 : index
    %c0_18 = arith.constant 0 : index
    %c0_19 = arith.constant 0 : index
    %25 = vector.load %arg3[%c3, %c0_18, %c0_19] : memref<9x128x128xbf16, #tpu.memory_space<vmem>>, vector<1x128x128xbf16>
    %26 = vector.shape_cast %25 : vector<1x128x128xbf16> to vector<128x128xbf16>
    %cst_20 = arith.constant dense<0.000000e+00> : vector<80x128xf32>
    %27 = tpu.matmul %24, %26, %cst_20 {dimension_numbers = #tpu.dot_dimension_numbers<[1], [0], [0], [1], [0, 0, 1, 1], [], []>} : vector<80x128xbf16>, vector<128x128xbf16>, vector<80x128xf32> -> vector<80x128xf32>
    %28 = arith.addf %23, %27 : vector<80x128xf32>
    %c11 = arith.constant 11 : index
    %c0_21 = arith.constant 0 : index
    %29 = vector.load %arg6[%c11, %c0_21] : memref<104x128xbf16, #tpu.memory_space<vmem>>, vector<80x128xbf16>
    %c4 = arith.constant 4 : index
    %c0_22 = arith.constant 0 : index
    %c0_23 = arith.constant 0 : index
    %30 = vector.load %arg3[%c4, %c0_22, %c0_23] : memref<9x128x128xbf16, #tpu.memory_space<vmem>>, vector<1x128x128xbf16>
    %31 = vector.shape_cast %30 : vector<1x128x128xbf16> to vector<128x128xbf16>
    %cst_24 = arith.constant dense<0.000000e+00> : vector<80x128xf32>
    %32 = tpu.matmul %29, %31, %cst_24 {dimension_numbers = #tpu.dot_dimension_numbers<[1], [0], [0], [1], [0, 0, 1, 1], [], []>} : vector<80x128xbf16>, vector<128x128xbf16>, vector<80x128xf32> -> vector<80x128xf32>
    %33 = arith.addf %28, %32 : vector<80x128xf32>
    %c12 = arith.constant 12 : index
    %c0_25 = arith.constant 0 : index
    %34 = vector.load %arg6[%c12, %c0_25] : memref<104x128xbf16, #tpu.memory_space<vmem>>, vector<80x128xbf16>
    %c5 = arith.constant 5 : index
    %c0_26 = arith.constant 0 : index
    %c0_27 = arith.constant 0 : index
    %35 = vector.load %arg3[%c5, %c0_26, %c0_27] : memref<9x128x128xbf16, #tpu.memory_space<vmem>>, vector<1x128x128xbf16>
    %36 = vector.shape_cast %35 : vector<1x128x128xbf16> to vector<128x128xbf16>
    %cst_28 = arith.constant dense<0.000000e+00> : vector<80x128xf32>
    %37 = tpu.matmul %34, %36, %cst_28 {dimension_numbers = #tpu.dot_dimension_numbers<[1], [0], [0], [1], [0, 0, 1, 1], [], []>} : vector<80x128xbf16>, vector<128x128xbf16>, vector<80x128xf32> -> vector<80x128xf32>
    %38 = arith.addf %33, %37 : vector<80x128xf32>
    %c20 = arith.constant 20 : index
    %c0_29 = arith.constant 0 : index
    %39 = vector.load %arg6[%c20, %c0_29] : memref<104x128xbf16, #tpu.memory_space<vmem>>, vector<80x128xbf16>
    %c6 = arith.constant 6 : index
    %c0_30 = arith.constant 0 : index
    %c0_31 = arith.constant 0 : index
    %40 = vector.load %arg3[%c6, %c0_30, %c0_31] : memref<9x128x128xbf16, #tpu.memory_space<vmem>>, vector<1x128x128xbf16>
    %41 = vector.shape_cast %40 : vector<1x128x128xbf16> to vector<128x128xbf16>
    %cst_32 = arith.constant dense<0.000000e+00> : vector<80x128xf32>
    %42 = tpu.matmul %39, %41, %cst_32 {dimension_numbers = #tpu.dot_dimension_numbers<[1], [0], [0], [1], [0, 0, 1, 1], [], []>} : vector<80x128xbf16>, vector<128x128xbf16>, vector<80x128xf32> -> vector<80x128xf32>
    %43 = arith.addf %38, %42 : vector<80x128xf32>
    %c21 = arith.constant 21 : index
    %c0_33 = arith.constant 0 : index
    %44 = vector.load %arg6[%c21, %c0_33] : memref<104x128xbf16, #tpu.memory_space<vmem>>, vector<80x128xbf16>
    %c7 = arith.constant 7 : index
    %c0_34 = arith.constant 0 : index
    %c0_35 = arith.constant 0 : index
    %45 = vector.load %arg3[%c7, %c0_34, %c0_35] : memref<9x128x128xbf16, #tpu.memory_space<vmem>>, vector<1x128x128xbf16>
    %46 = vector.shape_cast %45 : vector<1x128x128xbf16> to vector<128x128xbf16>
    %cst_36 = arith.constant dense<0.000000e+00> : vector<80x128xf32>
    %47 = tpu.matmul %44, %46, %cst_36 {dimension_numbers = #tpu.dot_dimension_numbers<[1], [0], [0], [1], [0, 0, 1, 1], [], []>} : vector<80x128xbf16>, vector<128x128xbf16>, vector<80x128xf32> -> vector<80x128xf32>
    %48 = arith.addf %43, %47 : vector<80x128xf32>
    %c22 = arith.constant 22 : index
    %c0_37 = arith.constant 0 : index
    %49 = vector.load %arg6[%c22, %c0_37] : memref<104x128xbf16, #tpu.memory_space<vmem>>, vector<80x128xbf16>
    %c8 = arith.constant 8 : index
    %c0_38 = arith.constant 0 : index
    %c0_39 = arith.constant 0 : index
    %50 = vector.load %arg3[%c8, %c0_38, %c0_39] : memref<9x128x128xbf16, #tpu.memory_space<vmem>>, vector<1x128x128xbf16>
    %51 = vector.shape_cast %50 : vector<1x128x128xbf16> to vector<128x128xbf16>
    %cst_40 = arith.constant dense<0.000000e+00> : vector<80x128xf32>
    %52 = tpu.matmul %49, %51, %cst_40 {dimension_numbers = #tpu.dot_dimension_numbers<[1], [0], [0], [1], [0, 0, 1, 1], [], []>} : vector<80x128xbf16>, vector<128x128xbf16>, vector<80x128xf32> -> vector<80x128xf32>
    %53 = arith.addf %48, %52 : vector<80x128xf32>
    %c0_41 = arith.constant 0 : index
    %c0_42 = arith.constant 0 : index
    %54 = vector.load %arg4[%c0_41, %c0_42] : memref<1x128xf32, #tpu.memory_space<vmem>>, vector<1x128xf32>
    %55 = vector.broadcast %54 : vector<1x128xf32> to vector<80x128xf32>
    %56 = arith.addf %53, %55 : vector<80x128xf32>
    %cst_43 = arith.constant 0.000000e+00 : f32
    %57 = vector.broadcast %cst_43 : f32 to vector<80x128xf32>
    %58 = arith.maximumf %56, %57 : vector<80x128xf32>
    %59 = arith.truncf %58 : vector<80x128xf32> to vector<80x128xbf16>
    %c0_44 = arith.constant 0 : index
    %c0_45 = arith.constant 0 : index
    %c0_46 = arith.constant 0 : index
    %60 = vector.load %arg5[%c0_44, %c0_45, %c0_46] : memref<1x80x128xbf16, #tpu.memory_space<vmem>>, vector<1x80x128xbf16>
    %61 = vector.shape_cast %60 : vector<1x80x128xbf16> to vector<80x128xbf16>
    %62 = vector.shape_cast %59 : vector<80x128xbf16> to vector<1x80x128xbf16>
    tpu.vector_store %arg5[%c0_44, %c0_45, %c0_46], %62 {strides = array<i32>} : memref<1x80x128xbf16, #tpu.memory_space<vmem>>, vector<1x80x128xbf16>,
    return
  }
  func.func @transform_1(%arg0: i32, %arg1: i32) -> (i32, i32, i32) {
    %c0_i32 = arith.constant 0 : i32
    %c0_i32_0 = arith.constant 0 : i32
    %c0_i32_1 = arith.constant 0 : i32
    %c0_i32_2 = arith.constant 0 : i32
    return %c0_i32, %c0_i32_0, %c0_i32_1 : i32, i32, i32
  }
  func.func @transform_2(%arg0: i32, %arg1: i32) -> (i32, i32) {
    %c0_i32 = arith.constant 0 : i32
    %c0_i32_0 = arith.constant 0 : i32
    %c0_i32_1 = arith.constant 0 : i32
    return %c0_i32, %c0_i32_0 : i32, i32
  }
  func.func @transform_3(%arg0: i32, %arg1: i32) -> (i32, i32, i32) {
    %c0_i32 = arith.constant 0 : i32
    %c0_i32_0 = arith.constant 0 : i32
    return %arg0, %arg1, %c0_i32 : i32, i32, i32
  }
}

module attributes {stable_mosaic.version = 11 : i64} {
  func.func @_conv_taps_kernel(%arg0: i32, %arg1: i32, %arg2: memref<2x32x512xbf16, #tpu.memory_space<any>>, %arg3: memref<4x512x128xbf16, #tpu.memory_space<vmem>>, %arg4: memref<1x128xf32, #tpu.memory_space<vmem>>, %arg5: memref<1x24x128xbf16, #tpu.memory_space<vmem>>, %arg6: memref<32x512xbf16, #tpu.memory_space<vmem>>, %arg7: memref<1x!tpu.dma_semaphore, #tpu.memory_space<semaphore_mem>>) attributes {dimension_semantics = [#tpu.dimension_semantics<parallel>, #tpu.dimension_semantics<parallel>], iteration_bounds = array<i64: 2, 1>, scalar_prefetch = 0 : i64, scratch_operands = 2 : i64, tpu.core_type = #tpu.core_type<tc>, window_params = [{}, {pipeline_mode = #tpu.pipeline_mode<synchronous>, transform_indices = @transform_1, window_bounds = array<i64: 4, 512, 128>}, {pipeline_mode = #tpu.pipeline_mode<synchronous>, transform_indices = @transform_2, window_bounds = array<i64: 1, 128>}, {transform_indices = @transform_3, window_bounds = array<i64: 1, 24, 128>}]} {
    %c24_i32 = arith.constant 24 : i32
    %0 = arith.muli %arg1, %c24_i32 : i32
    %1 = tpu.assume_multiple %0, 8 : i32
    %c0_i32 = arith.constant 0 : i32
    %c0_i32_0 = arith.constant 0 : i32
    %2 = tpu.memref_slice %arg2[%arg0, %1, %c0_i32_0] : memref<2x32x512xbf16, #tpu.memory_space<any>> -> memref<1x32x512xbf16, #tpu.memory_space<any>>
    %3 = tpu.memref_squeeze %2 : memref<1x32x512xbf16, #tpu.memory_space<any>> -> memref<32x512xbf16, #tpu.memory_space<any>>
    %4 = tpu.memref_slice %arg7[%c0_i32] : memref<1x!tpu.dma_semaphore, #tpu.memory_space<semaphore_mem>> -> memref<1x!tpu.dma_semaphore, #tpu.memory_space<semaphore_mem>>
    %5 = tpu.memref_squeeze %4 : memref<1x!tpu.dma_semaphore, #tpu.memory_space<semaphore_mem>> -> memref<!tpu.dma_semaphore, #tpu.memory_space<semaphore_mem>>
    tpu.enqueue_dma source(%3 : memref<32x512xbf16, #tpu.memory_space<any>>) target(%arg6 : memref<32x512xbf16, #tpu.memory_space<vmem>>) target_semaphore(%5 : memref<!tpu.dma_semaphore, #tpu.memory_space<semaphore_mem>>)
    %c0_i32_1 = arith.constant 0 : i32
    %c0_i32_2 = arith.constant 0 : i32
    %6 = tpu.memref_slice %arg2[%arg0, %1, %c0_i32_2] : memref<2x32x512xbf16, #tpu.memory_space<any>> -> memref<1x32x512xbf16, #tpu.memory_space<any>>
    %7 = tpu.memref_squeeze %6 : memref<1x32x512xbf16, #tpu.memory_space<any>> -> memref<32x512xbf16, #tpu.memory_space<any>>
    %8 = tpu.memref_slice %arg7[%c0_i32_1] : memref<1x!tpu.dma_semaphore, #tpu.memory_space<semaphore_mem>> -> memref<1x!tpu.dma_semaphore, #tpu.memory_space<semaphore_mem>>
    %9 = tpu.memref_squeeze %8 : memref<1x!tpu.dma_semaphore, #tpu.memory_space<semaphore_mem>> -> memref<!tpu.dma_semaphore, #tpu.memory_space<semaphore_mem>>
    tpu.wait_dma2 semaphore(%9 : memref<!tpu.dma_semaphore, #tpu.memory_space<semaphore_mem>>) src(%7 : memref<32x512xbf16, #tpu.memory_space<any>>) dst(%arg6 : memref<32x512xbf16, #tpu.memory_space<vmem>>)
    %c0 = arith.constant 0 : index
    %c0_3 = arith.constant 0 : index
    %10 = vector.load %arg6[%c0, %c0_3] : memref<32x512xbf16, #tpu.memory_space<vmem>>, vector<24x512xbf16>
    %c0_4 = arith.constant 0 : index
    %c0_5 = arith.constant 0 : index
    %c0_6 = arith.constant 0 : index
    %11 = vector.load %arg3[%c0_4, %c0_5, %c0_6] : memref<4x512x128xbf16, #tpu.memory_space<vmem>>, vector<1x512x128xbf16>
    %12 = vector.shape_cast %11 : vector<1x512x128xbf16> to vector<512x128xbf16>
    %cst = arith.constant dense<0.000000e+00> : vector<24x128xf32>
    %13 = tpu.matmul %10, %12, %cst {dimension_numbers = #tpu.dot_dimension_numbers<[1], [0], [0], [1], [0, 0, 1, 1], [], []>} : vector<24x512xbf16>, vector<512x128xbf16>, vector<24x128xf32> -> vector<24x128xf32>
    %c1 = arith.constant 1 : index
    %c0_7 = arith.constant 0 : index
    %14 = vector.load %arg6[%c1, %c0_7] : memref<32x512xbf16, #tpu.memory_space<vmem>>, vector<24x512xbf16>
    %c1_8 = arith.constant 1 : index
    %c0_9 = arith.constant 0 : index
    %c0_10 = arith.constant 0 : index
    %15 = vector.load %arg3[%c1_8, %c0_9, %c0_10] : memref<4x512x128xbf16, #tpu.memory_space<vmem>>, vector<1x512x128xbf16>
    %16 = vector.shape_cast %15 : vector<1x512x128xbf16> to vector<512x128xbf16>
    %cst_11 = arith.constant dense<0.000000e+00> : vector<24x128xf32>
    %17 = tpu.matmul %14, %16, %cst_11 {dimension_numbers = #tpu.dot_dimension_numbers<[1], [0], [0], [1], [0, 0, 1, 1], [], []>} : vector<24x512xbf16>, vector<512x128xbf16>, vector<24x128xf32> -> vector<24x128xf32>
    %18 = arith.addf %13, %17 : vector<24x128xf32>
    %c5 = arith.constant 5 : index
    %c0_12 = arith.constant 0 : index
    %19 = vector.load %arg6[%c5, %c0_12] : memref<32x512xbf16, #tpu.memory_space<vmem>>, vector<24x512xbf16>
    %c2 = arith.constant 2 : index
    %c0_13 = arith.constant 0 : index
    %c0_14 = arith.constant 0 : index
    %20 = vector.load %arg3[%c2, %c0_13, %c0_14] : memref<4x512x128xbf16, #tpu.memory_space<vmem>>, vector<1x512x128xbf16>
    %21 = vector.shape_cast %20 : vector<1x512x128xbf16> to vector<512x128xbf16>
    %cst_15 = arith.constant dense<0.000000e+00> : vector<24x128xf32>
    %22 = tpu.matmul %19, %21, %cst_15 {dimension_numbers = #tpu.dot_dimension_numbers<[1], [0], [0], [1], [0, 0, 1, 1], [], []>} : vector<24x512xbf16>, vector<512x128xbf16>, vector<24x128xf32> -> vector<24x128xf32>
    %23 = arith.addf %18, %22 : vector<24x128xf32>
    %c6 = arith.constant 6 : index
    %c0_16 = arith.constant 0 : index
    %24 = vector.load %arg6[%c6, %c0_16] : memref<32x512xbf16, #tpu.memory_space<vmem>>, vector<24x512xbf16>
    %c3 = arith.constant 3 : index
    %c0_17 = arith.constant 0 : index
    %c0_18 = arith.constant 0 : index
    %25 = vector.load %arg3[%c3, %c0_17, %c0_18] : memref<4x512x128xbf16, #tpu.memory_space<vmem>>, vector<1x512x128xbf16>
    %26 = vector.shape_cast %25 : vector<1x512x128xbf16> to vector<512x128xbf16>
    %cst_19 = arith.constant dense<0.000000e+00> : vector<24x128xf32>
    %27 = tpu.matmul %24, %26, %cst_19 {dimension_numbers = #tpu.dot_dimension_numbers<[1], [0], [0], [1], [0, 0, 1, 1], [], []>} : vector<24x512xbf16>, vector<512x128xbf16>, vector<24x128xf32> -> vector<24x128xf32>
    %28 = arith.addf %23, %27 : vector<24x128xf32>
    %c0_20 = arith.constant 0 : index
    %c0_21 = arith.constant 0 : index
    %29 = vector.load %arg4[%c0_20, %c0_21] : memref<1x128xf32, #tpu.memory_space<vmem>>, vector<1x128xf32>
    %30 = vector.broadcast %29 : vector<1x128xf32> to vector<24x128xf32>
    %31 = arith.addf %28, %30 : vector<24x128xf32>
    %cst_22 = arith.constant 0.000000e+00 : f32
    %32 = vector.broadcast %cst_22 : f32 to vector<24x128xf32>
    %33 = arith.maximumf %31, %32 : vector<24x128xf32>
    %34 = arith.truncf %33 : vector<24x128xf32> to vector<24x128xbf16>
    %c0_23 = arith.constant 0 : index
    %c0_24 = arith.constant 0 : index
    %c0_25 = arith.constant 0 : index
    %35 = vector.load %arg5[%c0_23, %c0_24, %c0_25] : memref<1x24x128xbf16, #tpu.memory_space<vmem>>, vector<1x24x128xbf16>
    %36 = vector.shape_cast %35 : vector<1x24x128xbf16> to vector<24x128xbf16>
    %37 = vector.shape_cast %34 : vector<24x128xbf16> to vector<1x24x128xbf16>
    tpu.vector_store %arg5[%c0_23, %c0_24, %c0_25], %37 {strides = array<i32>} : memref<1x24x128xbf16, #tpu.memory_space<vmem>>, vector<1x24x128xbf16>,
    return
  }
  func.func @transform_1(%arg0: i32, %arg1: i32) -> (i32, i32, i32) {
    %c0_i32 = arith.constant 0 : i32
    %c0_i32_0 = arith.constant 0 : i32
    %c0_i32_1 = arith.constant 0 : i32
    %c0_i32_2 = arith.constant 0 : i32
    return %c0_i32, %c0_i32_0, %c0_i32_1 : i32, i32, i32
  }
  func.func @transform_2(%arg0: i32, %arg1: i32) -> (i32, i32) {
    %c0_i32 = arith.constant 0 : i32
    %c0_i32_0 = arith.constant 0 : i32
    %c0_i32_1 = arith.constant 0 : i32
    return %c0_i32, %c0_i32_0 : i32, i32
  }
  func.func @transform_3(%arg0: i32, %arg1: i32) -> (i32, i32, i32) {
    %c0_i32 = arith.constant 0 : i32
    %c0_i32_0 = arith.constant 0 : i32
    return %arg0, %arg1, %c0_i32 : i32, i32, i32
  }
}

module attributes {stable_mosaic.version = 11 : i64} {
  func.func @_conv_taps_kernel(%arg0: i32, %arg1: i32, %arg2: memref<2x16x512xbf16, #tpu.memory_space<any>>, %arg3: memref<4x512x128xbf16, #tpu.memory_space<vmem>>, %arg4: memref<1x128xf32, #tpu.memory_space<vmem>>, %arg5: memref<1x8x128xbf16, #tpu.memory_space<vmem>>, %arg6: memref<16x512xbf16, #tpu.memory_space<vmem>>, %arg7: memref<1x!tpu.dma_semaphore, #tpu.memory_space<semaphore_mem>>) attributes {dimension_semantics = [#tpu.dimension_semantics<parallel>, #tpu.dimension_semantics<parallel>], iteration_bounds = array<i64: 2, 1>, scalar_prefetch = 0 : i64, scratch_operands = 2 : i64, tpu.core_type = #tpu.core_type<tc>, window_params = [{}, {pipeline_mode = #tpu.pipeline_mode<synchronous>, transform_indices = @transform_1, window_bounds = array<i64: 4, 512, 128>}, {pipeline_mode = #tpu.pipeline_mode<synchronous>, transform_indices = @transform_2, window_bounds = array<i64: 1, 128>}, {transform_indices = @transform_3, window_bounds = array<i64: 1, 8, 128>}]} {
    %c8_i32 = arith.constant 8 : i32
    %0 = arith.muli %arg1, %c8_i32 : i32
    %1 = tpu.assume_multiple %0, 8 : i32
    %c0_i32 = arith.constant 0 : i32
    %c0_i32_0 = arith.constant 0 : i32
    %2 = tpu.memref_slice %arg2[%arg0, %1, %c0_i32_0] : memref<2x16x512xbf16, #tpu.memory_space<any>> -> memref<1x16x512xbf16, #tpu.memory_space<any>>
    %3 = tpu.memref_squeeze %2 : memref<1x16x512xbf16, #tpu.memory_space<any>> -> memref<16x512xbf16, #tpu.memory_space<any>>
    %4 = tpu.memref_slice %arg7[%c0_i32] : memref<1x!tpu.dma_semaphore, #tpu.memory_space<semaphore_mem>> -> memref<1x!tpu.dma_semaphore, #tpu.memory_space<semaphore_mem>>
    %5 = tpu.memref_squeeze %4 : memref<1x!tpu.dma_semaphore, #tpu.memory_space<semaphore_mem>> -> memref<!tpu.dma_semaphore, #tpu.memory_space<semaphore_mem>>
    tpu.enqueue_dma source(%3 : memref<16x512xbf16, #tpu.memory_space<any>>) target(%arg6 : memref<16x512xbf16, #tpu.memory_space<vmem>>) target_semaphore(%5 : memref<!tpu.dma_semaphore, #tpu.memory_space<semaphore_mem>>)
    %c0_i32_1 = arith.constant 0 : i32
    %c0_i32_2 = arith.constant 0 : i32
    %6 = tpu.memref_slice %arg2[%arg0, %1, %c0_i32_2] : memref<2x16x512xbf16, #tpu.memory_space<any>> -> memref<1x16x512xbf16, #tpu.memory_space<any>>
    %7 = tpu.memref_squeeze %6 : memref<1x16x512xbf16, #tpu.memory_space<any>> -> memref<16x512xbf16, #tpu.memory_space<any>>
    %8 = tpu.memref_slice %arg7[%c0_i32_1] : memref<1x!tpu.dma_semaphore, #tpu.memory_space<semaphore_mem>> -> memref<1x!tpu.dma_semaphore, #tpu.memory_space<semaphore_mem>>
    %9 = tpu.memref_squeeze %8 : memref<1x!tpu.dma_semaphore, #tpu.memory_space<semaphore_mem>> -> memref<!tpu.dma_semaphore, #tpu.memory_space<semaphore_mem>>
    tpu.wait_dma2 semaphore(%9 : memref<!tpu.dma_semaphore, #tpu.memory_space<semaphore_mem>>) src(%7 : memref<16x512xbf16, #tpu.memory_space<any>>) dst(%arg6 : memref<16x512xbf16, #tpu.memory_space<vmem>>)
    %c0 = arith.constant 0 : index
    %c0_3 = arith.constant 0 : index
    %10 = vector.load %arg6[%c0, %c0_3] : memref<16x512xbf16, #tpu.memory_space<vmem>>, vector<8x512xbf16>
    %c0_4 = arith.constant 0 : index
    %c0_5 = arith.constant 0 : index
    %c0_6 = arith.constant 0 : index
    %11 = vector.load %arg3[%c0_4, %c0_5, %c0_6] : memref<4x512x128xbf16, #tpu.memory_space<vmem>>, vector<1x512x128xbf16>
    %12 = vector.shape_cast %11 : vector<1x512x128xbf16> to vector<512x128xbf16>
    %cst = arith.constant dense<0.000000e+00> : vector<8x128xf32>
    %13 = tpu.matmul %10, %12, %cst {dimension_numbers = #tpu.dot_dimension_numbers<[1], [0], [0], [1], [0, 0, 1, 1], [], []>} : vector<8x512xbf16>, vector<512x128xbf16>, vector<8x128xf32> -> vector<8x128xf32>
    %c1 = arith.constant 1 : index
    %c0_7 = arith.constant 0 : index
    %14 = vector.load %arg6[%c1, %c0_7] : memref<16x512xbf16, #tpu.memory_space<vmem>>, vector<8x512xbf16>
    %c1_8 = arith.constant 1 : index
    %c0_9 = arith.constant 0 : index
    %c0_10 = arith.constant 0 : index
    %15 = vector.load %arg3[%c1_8, %c0_9, %c0_10] : memref<4x512x128xbf16, #tpu.memory_space<vmem>>, vector<1x512x128xbf16>
    %16 = vector.shape_cast %15 : vector<1x512x128xbf16> to vector<512x128xbf16>
    %cst_11 = arith.constant dense<0.000000e+00> : vector<8x128xf32>
    %17 = tpu.matmul %14, %16, %cst_11 {dimension_numbers = #tpu.dot_dimension_numbers<[1], [0], [0], [1], [0, 0, 1, 1], [], []>} : vector<8x512xbf16>, vector<512x128xbf16>, vector<8x128xf32> -> vector<8x128xf32>
    %18 = arith.addf %13, %17 : vector<8x128xf32>
    %c3 = arith.constant 3 : index
    %c0_12 = arith.constant 0 : index
    %19 = vector.load %arg6[%c3, %c0_12] : memref<16x512xbf16, #tpu.memory_space<vmem>>, vector<8x512xbf16>
    %c2 = arith.constant 2 : index
    %c0_13 = arith.constant 0 : index
    %c0_14 = arith.constant 0 : index
    %20 = vector.load %arg3[%c2, %c0_13, %c0_14] : memref<4x512x128xbf16, #tpu.memory_space<vmem>>, vector<1x512x128xbf16>
    %21 = vector.shape_cast %20 : vector<1x512x128xbf16> to vector<512x128xbf16>
    %cst_15 = arith.constant dense<0.000000e+00> : vector<8x128xf32>
    %22 = tpu.matmul %19, %21, %cst_15 {dimension_numbers = #tpu.dot_dimension_numbers<[1], [0], [0], [1], [0, 0, 1, 1], [], []>} : vector<8x512xbf16>, vector<512x128xbf16>, vector<8x128xf32> -> vector<8x128xf32>
    %23 = arith.addf %18, %22 : vector<8x128xf32>
    %c4 = arith.constant 4 : index
    %c0_16 = arith.constant 0 : index
    %24 = vector.load %arg6[%c4, %c0_16] : memref<16x512xbf16, #tpu.memory_space<vmem>>, vector<8x512xbf16>
    %c3_17 = arith.constant 3 : index
    %c0_18 = arith.constant 0 : index
    %c0_19 = arith.constant 0 : index
    %25 = vector.load %arg3[%c3_17, %c0_18, %c0_19] : memref<4x512x128xbf16, #tpu.memory_space<vmem>>, vector<1x512x128xbf16>
    %26 = vector.shape_cast %25 : vector<1x512x128xbf16> to vector<512x128xbf16>
    %cst_20 = arith.constant dense<0.000000e+00> : vector<8x128xf32>
    %27 = tpu.matmul %24, %26, %cst_20 {dimension_numbers = #tpu.dot_dimension_numbers<[1], [0], [0], [1], [0, 0, 1, 1], [], []>} : vector<8x512xbf16>, vector<512x128xbf16>, vector<8x128xf32> -> vector<8x128xf32>
    %28 = arith.addf %23, %27 : vector<8x128xf32>
    %c0_21 = arith.constant 0 : index
    %c0_22 = arith.constant 0 : index
    %29 = vector.load %arg4[%c0_21, %c0_22] : memref<1x128xf32, #tpu.memory_space<vmem>>, vector<1x128xf32>
    %30 = vector.broadcast %29 : vector<1x128xf32> to vector<8x128xf32>
    %31 = arith.addf %28, %30 : vector<8x128xf32>
    %cst_23 = arith.constant 0.000000e+00 : f32
    %32 = vector.broadcast %cst_23 : f32 to vector<8x128xf32>
    %33 = arith.maximumf %31, %32 : vector<8x128xf32>
    %34 = arith.truncf %33 : vector<8x128xf32> to vector<8x128xbf16>
    %c0_24 = arith.constant 0 : index
    %c0_25 = arith.constant 0 : index
    %c0_26 = arith.constant 0 : index
    %35 = vector.load %arg5[%c0_24, %c0_25, %c0_26] : memref<1x8x128xbf16, #tpu.memory_space<vmem>>, vector<1x8x128xbf16>
    %36 = vector.shape_cast %35 : vector<1x8x128xbf16> to vector<8x128xbf16>
    %37 = vector.shape_cast %34 : vector<8x128xbf16> to vector<1x8x128xbf16>
    tpu.vector_store %arg5[%c0_24, %c0_25, %c0_26], %37 {strides = array<i32>} : memref<1x8x128xbf16, #tpu.memory_space<vmem>>, vector<1x8x128xbf16>,
    return
  }
  func.func @transform_1(%arg0: i32, %arg1: i32) -> (i32, i32, i32) {
    %c0_i32 = arith.constant 0 : i32
    %c0_i32_0 = arith.constant 0 : i32
    %c0_i32_1 = arith.constant 0 : i32
    %c0_i32_2 = arith.constant 0 : i32
    return %c0_i32, %c0_i32_0, %c0_i32_1 : i32, i32, i32
  }
  func.func @transform_2(%arg0: i32, %arg1: i32) -> (i32, i32) {
    %c0_i32 = arith.constant 0 : i32
    %c0_i32_0 = arith.constant 0 : i32
    %c0_i32_1 = arith.constant 0 : i32
    return %c0_i32, %c0_i32_0 : i32, i32
  }
  func.func @transform_3(%arg0: i32, %arg1: i32) -> (i32, i32, i32) {
    %c0_i32 = arith.constant 0 : i32
    %c0_i32_0 = arith.constant 0 : i32
    return %arg0, %arg1, %c0_i32 : i32, i32, i32
  }
}

module attributes {stable_mosaic.version = 11 : i64} {
  func.func @_conv_taps_kernel(%arg0: i32, %arg1: i32, %arg2: memref<2x16x512xbf16, #tpu.memory_space<any>>, %arg3: memref<4x512x128xbf16, #tpu.memory_space<vmem>>, %arg4: memref<1x128xf32, #tpu.memory_space<vmem>>, %arg5: memref<1x8x128xbf16, #tpu.memory_space<vmem>>, %arg6: memref<16x512xbf16, #tpu.memory_space<vmem>>, %arg7: memref<1x!tpu.dma_semaphore, #tpu.memory_space<semaphore_mem>>) attributes {dimension_semantics = [#tpu.dimension_semantics<parallel>, #tpu.dimension_semantics<parallel>], iteration_bounds = array<i64: 2, 1>, scalar_prefetch = 0 : i64, scratch_operands = 2 : i64, tpu.core_type = #tpu.core_type<tc>, window_params = [{}, {pipeline_mode = #tpu.pipeline_mode<synchronous>, transform_indices = @transform_1, window_bounds = array<i64: 4, 512, 128>}, {pipeline_mode = #tpu.pipeline_mode<synchronous>, transform_indices = @transform_2, window_bounds = array<i64: 1, 128>}, {transform_indices = @transform_3, window_bounds = array<i64: 1, 8, 128>}]} {
    %c8_i32 = arith.constant 8 : i32
    %0 = arith.muli %arg1, %c8_i32 : i32
    %1 = tpu.assume_multiple %0, 8 : i32
    %c0_i32 = arith.constant 0 : i32
    %c0_i32_0 = arith.constant 0 : i32
    %2 = tpu.memref_slice %arg2[%arg0, %1, %c0_i32_0] : memref<2x16x512xbf16, #tpu.memory_space<any>> -> memref<1x16x512xbf16, #tpu.memory_space<any>>
    %3 = tpu.memref_squeeze %2 : memref<1x16x512xbf16, #tpu.memory_space<any>> -> memref<16x512xbf16, #tpu.memory_space<any>>
    %4 = tpu.memref_slice %arg7[%c0_i32] : memref<1x!tpu.dma_semaphore, #tpu.memory_space<semaphore_mem>> -> memref<1x!tpu.dma_semaphore, #tpu.memory_space<semaphore_mem>>
    %5 = tpu.memref_squeeze %4 : memref<1x!tpu.dma_semaphore, #tpu.memory_space<semaphore_mem>> -> memref<!tpu.dma_semaphore, #tpu.memory_space<semaphore_mem>>
    tpu.enqueue_dma source(%3 : memref<16x512xbf16, #tpu.memory_space<any>>) target(%arg6 : memref<16x512xbf16, #tpu.memory_space<vmem>>) target_semaphore(%5 : memref<!tpu.dma_semaphore, #tpu.memory_space<semaphore_mem>>)
    %c0_i32_1 = arith.constant 0 : i32
    %c0_i32_2 = arith.constant 0 : i32
    %6 = tpu.memref_slice %arg2[%arg0, %1, %c0_i32_2] : memref<2x16x512xbf16, #tpu.memory_space<any>> -> memref<1x16x512xbf16, #tpu.memory_space<any>>
    %7 = tpu.memref_squeeze %6 : memref<1x16x512xbf16, #tpu.memory_space<any>> -> memref<16x512xbf16, #tpu.memory_space<any>>
    %8 = tpu.memref_slice %arg7[%c0_i32_1] : memref<1x!tpu.dma_semaphore, #tpu.memory_space<semaphore_mem>> -> memref<1x!tpu.dma_semaphore, #tpu.memory_space<semaphore_mem>>
    %9 = tpu.memref_squeeze %8 : memref<1x!tpu.dma_semaphore, #tpu.memory_space<semaphore_mem>> -> memref<!tpu.dma_semaphore, #tpu.memory_space<semaphore_mem>>
    tpu.wait_dma2 semaphore(%9 : memref<!tpu.dma_semaphore, #tpu.memory_space<semaphore_mem>>) src(%7 : memref<16x512xbf16, #tpu.memory_space<any>>) dst(%arg6 : memref<16x512xbf16, #tpu.memory_space<vmem>>)
    %c0 = arith.constant 0 : index
    %c0_3 = arith.constant 0 : index
    %10 = vector.load %arg6[%c0, %c0_3] : memref<16x512xbf16, #tpu.memory_space<vmem>>, vector<8x512xbf16>
    %c0_4 = arith.constant 0 : index
    %c0_5 = arith.constant 0 : index
    %c0_6 = arith.constant 0 : index
    %11 = vector.load %arg3[%c0_4, %c0_5, %c0_6] : memref<4x512x128xbf16, #tpu.memory_space<vmem>>, vector<1x512x128xbf16>
    %12 = vector.shape_cast %11 : vector<1x512x128xbf16> to vector<512x128xbf16>
    %cst = arith.constant dense<0.000000e+00> : vector<8x128xf32>
    %13 = tpu.matmul %10, %12, %cst {dimension_numbers = #tpu.dot_dimension_numbers<[1], [0], [0], [1], [0, 0, 1, 1], [], []>} : vector<8x512xbf16>, vector<512x128xbf16>, vector<8x128xf32> -> vector<8x128xf32>
    %c1 = arith.constant 1 : index
    %c0_7 = arith.constant 0 : index
    %14 = vector.load %arg6[%c1, %c0_7] : memref<16x512xbf16, #tpu.memory_space<vmem>>, vector<8x512xbf16>
    %c1_8 = arith.constant 1 : index
    %c0_9 = arith.constant 0 : index
    %c0_10 = arith.constant 0 : index
    %15 = vector.load %arg3[%c1_8, %c0_9, %c0_10] : memref<4x512x128xbf16, #tpu.memory_space<vmem>>, vector<1x512x128xbf16>
    %16 = vector.shape_cast %15 : vector<1x512x128xbf16> to vector<512x128xbf16>
    %cst_11 = arith.constant dense<0.000000e+00> : vector<8x128xf32>
    %17 = tpu.matmul %14, %16, %cst_11 {dimension_numbers = #tpu.dot_dimension_numbers<[1], [0], [0], [1], [0, 0, 1, 1], [], []>} : vector<8x512xbf16>, vector<512x128xbf16>, vector<8x128xf32> -> vector<8x128xf32>
    %18 = arith.addf %13, %17 : vector<8x128xf32>
    %c2 = arith.constant 2 : index
    %c0_12 = arith.constant 0 : index
    %19 = vector.load %arg6[%c2, %c0_12] : memref<16x512xbf16, #tpu.memory_space<vmem>>, vector<8x512xbf16>
    %c2_13 = arith.constant 2 : index
    %c0_14 = arith.constant 0 : index
    %c0_15 = arith.constant 0 : index
    %20 = vector.load %arg3[%c2_13, %c0_14, %c0_15] : memref<4x512x128xbf16, #tpu.memory_space<vmem>>, vector<1x512x128xbf16>
    %21 = vector.shape_cast %20 : vector<1x512x128xbf16> to vector<512x128xbf16>
    %cst_16 = arith.constant dense<0.000000e+00> : vector<8x128xf32>
    %22 = tpu.matmul %19, %21, %cst_16 {dimension_numbers = #tpu.dot_dimension_numbers<[1], [0], [0], [1], [0, 0, 1, 1], [], []>} : vector<8x512xbf16>, vector<512x128xbf16>, vector<8x128xf32> -> vector<8x128xf32>
    %23 = arith.addf %18, %22 : vector<8x128xf32>
    %c3 = arith.constant 3 : index
    %c0_17 = arith.constant 0 : index
    %24 = vector.load %arg6[%c3, %c0_17] : memref<16x512xbf16, #tpu.memory_space<vmem>>, vector<8x512xbf16>
    %c3_18 = arith.constant 3 : index
    %c0_19 = arith.constant 0 : index
    %c0_20 = arith.constant 0 : index
    %25 = vector.load %arg3[%c3_18, %c0_19, %c0_20] : memref<4x512x128xbf16, #tpu.memory_space<vmem>>, vector<1x512x128xbf16>
    %26 = vector.shape_cast %25 : vector<1x512x128xbf16> to vector<512x128xbf16>
    %cst_21 = arith.constant dense<0.000000e+00> : vector<8x128xf32>
    %27 = tpu.matmul %24, %26, %cst_21 {dimension_numbers = #tpu.dot_dimension_numbers<[1], [0], [0], [1], [0, 0, 1, 1], [], []>} : vector<8x512xbf16>, vector<512x128xbf16>, vector<8x128xf32> -> vector<8x128xf32>
    %28 = arith.addf %23, %27 : vector<8x128xf32>
    %c0_22 = arith.constant 0 : index
    %c0_23 = arith.constant 0 : index
    %29 = vector.load %arg4[%c0_22, %c0_23] : memref<1x128xf32, #tpu.memory_space<vmem>>, vector<1x128xf32>
    %30 = vector.broadcast %29 : vector<1x128xf32> to vector<8x128xf32>
    %31 = arith.addf %28, %30 : vector<8x128xf32>
    %cst_24 = arith.constant 0.000000e+00 : f32
    %32 = vector.broadcast %cst_24 : f32 to vector<8x128xf32>
    %33 = arith.maximumf %31, %32 : vector<8x128xf32>
    %34 = arith.truncf %33 : vector<8x128xf32> to vector<8x128xbf16>
    %c0_25 = arith.constant 0 : index
    %c0_26 = arith.constant 0 : index
    %c0_27 = arith.constant 0 : index
    %35 = vector.load %arg5[%c0_25, %c0_26, %c0_27] : memref<1x8x128xbf16, #tpu.memory_space<vmem>>, vector<1x8x128xbf16>
    %36 = vector.shape_cast %35 : vector<1x8x128xbf16> to vector<8x128xbf16>
    %37 = vector.shape_cast %34 : vector<8x128xbf16> to vector<1x8x128xbf16>
    tpu.vector_store %arg5[%c0_25, %c0_26, %c0_27], %37 {strides = array<i32>} : memref<1x8x128xbf16, #tpu.memory_space<vmem>>, vector<1x8x128xbf16>,
    return
  }
  func.func @transform_1(%arg0: i32, %arg1: i32) -> (i32, i32, i32) {
    %c0_i32 = arith.constant 0 : i32
    %c0_i32_0 = arith.constant 0 : i32
    %c0_i32_1 = arith.constant 0 : i32
    %c0_i32_2 = arith.constant 0 : i32
    return %c0_i32, %c0_i32_0, %c0_i32_1 : i32, i32, i32
  }
  func.func @transform_2(%arg0: i32, %arg1: i32) -> (i32, i32) {
    %c0_i32 = arith.constant 0 : i32
    %c0_i32_0 = arith.constant 0 : i32
    %c0_i32_1 = arith.constant 0 : i32
    return %c0_i32, %c0_i32_0 : i32, i32
  }
  func.func @transform_3(%arg0: i32, %arg1: i32) -> (i32, i32, i32) {
    %c0_i32 = arith.constant 0 : i32
    %c0_i32_0 = arith.constant 0 : i32
    return %arg0, %arg1, %c0_i32 : i32, i32, i32
  }
}

</mosaic_0001>

<bundles_post_ra>
// kernel: a_call__.5
= control target key start
LH: loop header
LB: loop body
LE: loop exit
PB: predicated region body
PF: predicated region fallthrough
CT: control target
= control target key end

     0   :  { %s1597_s12 = smov 0   ;;  %s1599_s13 = smov 0   ;;  %s1859_s0 = inlined_call_operand.vmem [shape: bf16[2,88,128], index: 0, kind: input, shape index: {}]   ;;  %s1860_s1 = inlined_call_operand.vmem [shape: bf16[4,128,128], index: 1, kind: input, shape index: {}]   ;;  %s1861_s2 = inlined_call_operand.vmem [shape: f32[1,128], index: 2, kind: input, shape index: {}]   ;;  %s1862_s3 = inlined_call_operand.vmem [shape: bf16[2,72,128], index: 3, kind: output, shape index: {}]  }
   0x1   :  { %s1601_s14 = smov 0  }
   0x2 LB: > { %s25_s15 = sadd.s32 1, %s1569_s13  ;;  %p1140_p0 = scmp.ge.s32.totalorder %s1573_s14, 1  ;;  %s1573_s14 = sphi %s1601_s14, %s13_s14   ;;  %s1569_s13 = sphi %s1599_s13, %s1864_s13   ;;  %s1565_s12 = sphi %s1597_s12, %s1863_s12  }
   0x3   : > { %p27_p1 = scmp.ge.s32.totalorder %s25_s15, 2  ;;  %p117_p2 = scmp.lt.s32.totalorder %s1573_s14, 3 }
   0x5   : > { %s1866_s15 = smov (%p27_p1, %s25_s15), 0  ;;  %p118_p3 = pnand %p1140_p0, %p117_p2 }
   0x6   : > { %p139_p4 = scmp.lt.s32.totalorder (!%p118_p3), %s1565_s12, 1  ;;  %s1249_s16 = smul.u32 (!%p118_p3), 44, %s1565_s12 }
   0x7   : > { %121 = sbr.rel (%p118_p3) target bundleno = 328 (0x148), region = 28 }
   0x8   : > { %s155_s19 = scalar_lea.vmem (!%p118_p3), %s1859_s0, %s1249_s16 }
   0xc   : > { %s1868_s12 = smov (!%p139_p4, %s1565_s12), 1  ;;  %v194_v0 = vld [vmem:[%s155_s19] sm:$0xff]  ;;  %v196_v1 = vld [vmem:[%s155_s19 + $0x8] sm:$0xff]  ;;  %v198_v2 = vld [vmem:[%s155_s19 + $0x10] sm:$0xff] }
   0xd   : > { %s1478_s20 = smul.u32 36, %s1868_s12  ;;  %195 = vst [vmem:[#allocation2] sm:$0xff] %v194_v0  ;;  %197 = vst [vmem:[#allocation2 + $0x8] sm:$0xff] %v196_v1  ;;  %v200_v3 = vld [vmem:[%s155_s19 + $0x18] sm:$0xff]  ;;  %v202_v4 = vld [vmem:[%s155_s19 + $0x20] sm:$0xff] }
   0xe   : > { %199 = vst [vmem:[#allocation2 + $0x10] sm:$0xff] %v198_v2  ;;  %v1143_v5 = vld [vmem:[%s155_s19 + $0x28] sm:$0xf]  ;;  %201 = vst [vmem:[#allocation2 + $0x18] sm:$0xff] %v200_v3 }
   0xf   : > { %s1621_s23 = scalar_lea.vmem %s1862_s3, %s1478_s20  ;;  %203 = vst [vmem:[#allocation2 + $0x20] sm:$0xff] %v202_v4  ;;  %215 = vst [vmem:[#allocation2 + $0x28] sm:$0xf] %v1143_v5 }
  0x10   : > { %219 = vsyncadd [#allocation3], 704 }
  0x11   : > { %1561 = dma.done.wait [#allocation3], 704 }
  0x12   : > { %1562 = vsyncadd [#allocation3], 4294966592  ;;  %v1575_v6 = vmov 0.0   ;;  %vm1576_vm0 = vmmov 0   ;;  %v1505_v7 = vld [vmem:[%s1860_s1 + $0x78] sm:$0xff]   ;;  %v1507_v9 = vld [vmem:[%s1860_s1 + $0x70] sm:$0xff]  }
  0x13   : > { %1334 = vmatprep.subr.bf16.mxu0 %v1575_v6  ;;  %1370 = vmatprep.subr.bf16.mxu1 %v1575_v6  ;;  %v1506_v8 = vld [vmem:[%s1860_s1 + $0x38] sm:$0xff]   ;;  %v1508_v10 = vld [vmem:[%s1860_s1 + $0x30] sm:$0xff]   ;;  %v1509_v11 = vld [vmem:[%s1860_s1 + $0x68] sm:$0xff]   ;;  %vm292_vm1 = vsmask.f32 7424  ;;  %vm829_vm2 = vcmask 1046528  }
  0x14   : > { %1350 = vmatprep.mubr.msk.bf16.mxu0 %vm1576_vm0, %v1575_v6  ;;  %1386 = vmatprep.mubr.msk.bf16.mxu1 %vm1576_vm0, %v1575_v6  ;;  %v1510_v12 = vld [vmem:[%s1860_s1 + $0x28] sm:$0xff]   ;;  %v1511_v13 = vld [vmem:[%s1860_s1 + $0x60] sm:$0xff]   ;;  %v1513_v15 = vld [vmem:[%s1860_s1 + $0x58] sm:$0xff]  }
  0x15   : > { %1335 = vmatpush3.bf16.msra.mxu0 %v1505_v7  ;;  %1371 = vmatpush3.bf16.msra.mxu1 %v1506_v8  ;;  %v1512_v14 = vld [vmem:[%s1860_s1 + $0x20] sm:$0xff]   ;;  %v1514_v16 = vld [vmem:[%s1860_s1 + $0x18] sm:$0xff]   ;;  %v1515_v17 = vld [vmem:[%s1860_s1 + $0x50] sm:$0xff]  }
  0x16   : > { %1336 = vmatprep.subr.bf16.mxu0 %v1575_v6  ;;  %1372 = vmatprep.subr.bf16.mxu1 %v1575_v6  ;;  %v1521_v18 = vld [vmem:[#allocation2] sm:$0xff]   ;;  %v1522_v19 = vld [vmem:[#allocation2 + $0x8] sm:$0xff]   ;;  %v1516_v20 = vld [vmem:[%s1860_s1 + $0x10] sm:$0xff]  }
  0x17   : > { %v296_v21 = vshll.u32 %v1521_v18, 16  ;;  %v1517_v22 = vld [vmem:[%s1860_s1 + $0x48] sm:$0xff]   ;;  %v294_v23 = vshrl.u32 %v1521_v18, 16  ;;  %v301_v25 = vshll.u32 %v1522_v19, 16  ;;  %v1519_v27 = vld [vmem:[%s1860_s1 + $0x40] sm:$0xff]   ;;  %v1526_v30 = vld [vmem:[#allocation2 + $0x10] sm:$0xff]  }
  0x18   : > { %v1518_v26 = vld [vmem:[%s1860_s1 + $0x8] sm:$0xff]   ;;  %v1520_v31 = vld [vmem:[%s1860_s1] sm:$0xff]   ;;  %v1523_v33 = vld [vmem:[%s1860_s1 + $0xb8] sm:$0xff]   ;;  %v305_v34 = vshrl.u32 %v1522_v19, 16  ;;  %v309_v35 = vshll.u32 %v1526_v30, 16  ;;  %v313_v45 = vshrl.u32 %v1526_v30, 16 }
  0x19   : > { %1337 = vmatpush3.bf16.msra.mxu0 %v1507_v9  ;;  %1373 = vmatpush3.bf16.msra.mxu1 %v1508_v10  ;;  %v298_v24 = vrot.slane %v296_v21, 1  ;;  %v303_v29 = vrot.slane %v301_v25, 1  ;;  %v1524_v36 = vld [vmem:[%s1860_s1 + $0xf8] sm:$0xff]   ;;  %v1525_v37 = vld [vmem:[%s1860_s1 + $0xb0] sm:$0xff]   ;;  %v1528_v42 = vld [vmem:[%s1860_s1 + $0xa8] sm:$0xff]  }
  0x1a   : > { %1338 = vmatprep.subr.bf16.mxu0 %v1575_v6  ;;  %1374 = vmatprep.subr.bf16.mxu1 %v1575_v6  ;;  %v311_v39 = vrot.slane %v309_v35, 1  ;;  %v1703_v40 = vld [vmem:[#allocation2 + $0x18] sm:$0xff]   ;;  %v1527_v41 = vld [vmem:[%s1860_s1 + $0xf0] sm:$0xff]   ;;  %v1529_v43 = vld [vmem:[%s1860_s1 + $0xe8] sm:$0xff]  }
  0x1b   : > { %v299_v28 = vor.u32 %v298_v24, %v294_v23  ;;  %v307_v38 = vor.u32 %v305_v34, %v303_v29  ;;  %v317_v46 = vshll.u32 %v1703_v40, 16  ;;  %v1722_v47 = vld [vmem:[#allocation2 + $0x20] sm:$0xf]  ;;  %v249_v48 = vld [vmem:[#allocation2 + $0x24] sm:$0x1]  ;;  %v1533_v55 = vld [vmem:[%s1860_s1 + $0x98] sm:$0xff]  }
  0x1c   : > { %v315_v49 = vor.u32 %v313_v45, %v311_v39  ;;  %v1531_v51 = vld [vmem:[%s1860_s1 + $0xa0] sm:$0xff]   ;;  %v1164_v52 = vcombine.low %v1722_v47, %v249_v48  ;;  %v321_v56 = vshrl.u32 %v1703_v40, 16  ;;  %v1534_v58 = vld [vmem:[%s1860_s1 + $0xd8] sm:$0xff]   ;;  %v1536_v61 = vld [vmem:[%s1860_s1 + $0x90] sm:$0xff]  }
  0x1d   : > { %1339 = vmatpush3.bf16.msra.mxu0 %v1509_v11  ;;  %1375 = vmatpush3.bf16.msra.mxu1 %v1510_v12  ;;  %v304_v32 = vsel %vm292_vm1, %v299_v28, %v303_v29  ;;  %v312_v44 = vsel %vm292_vm1, %v307_v38, %v311_v39  ;;  %v319_v50 = vrot.slane %v317_v46, 1  ;;  %v1532_v53 = vld [vmem:[%s1860_s1 + $0xe0] sm:$0xff]   ;;  %v584_v63 = vld [vmem:[#allocation2 + $0x8] sm:$0xf]  ;;  %v1537_v0 = vld [vmem:[%s1860_s1 + $0xd0] sm:$0xff]  }
  0x1e   : > { %1340 = vmatprep.subr.bf16.mxu0 %v1575_v6  ;;  %1376 = vmatprep.subr.bf16.mxu1 %v1575_v6  ;;  %v325_v57 = vshll.u32 %v1164_v52, 16  ;;  %v583_v62 = vld [vmem:[#allocation2 + $0x4] sm:$0xf]  ;;  %v1538_v3 = vld [vmem:[%s1860_s1 + $0x88] sm:$0xff]   ;;  %v329_v5 = vshrl.u32 %v1164_v52, 16  ;;  %v1547_v29 = vld [vmem:[#allocation2 + $0x1c] sm:$0xff]  }
  0x1f   : > { %v320_v54 = vsel %vm292_vm1, %v315_v49, %v319_v50  ;;  %v323_v59 = vor.u32 %v321_v56, %v319_v50  ;;  %v1198_v2 = vcombine.low %v583_v62, %v584_v63  ;;  %v1540_v4 = vld [vmem:[%s1860_s1 + $0xc8] sm:$0xff]   ;;  %v1541_v9 = vld [vmem:[%s1860_s1 + $0x80] sm:$0xff]   ;;  %v835_v38 = vrot.slane %v1547_v29, 1 }
  0x20   : > { %v327_v60 = vrot.slane %v325_v57, 1  ;;  %v1544_v7 = vld [vmem:[#allocation2 + $0xc] sm:$0xff]   ;;  %v1542_v10 = vld [vmem:[%s1860_s1 + $0xc0] sm:$0xff]  }
  0x21   : > { %1341 = vmatpush3.bf16.msra.mxu0 %v1511_v13  ;;  %1377 = vmatpush3.bf16.msra.mxu1 %v1512_v14  ;;  %v638_v8 = vshll.u32 %v1198_v2, 16  ;;  %v808_v11 = vld [vmem:[#allocation2 + $0x4] sm:$0xe]  ;;  %v1173_v13 = vcombine.low %v1722_v47, %v1722_v47  ;;  %v636_v14 = vshrl.u32 %v1198_v2, 16  ;;  %v647_v24 = vshrl.u32 %v1544_v7, 16 }
  0x22   : > { %1342 = vmatprep.subr.bf16.mxu0 %v1575_v6  ;;  %1378 = vmatprep.subr.bf16.mxu1 %v1575_v6  ;;  %v328_v1 = vsel %vm292_vm1, %v323_v59, %v327_v60  ;;  %v331_v12 = vor.u32 %v329_v5, %v327_v60 }
  0x25   : > { %1343 = vmatpush3.bf16.msra.mxu0 %v1513_v15  ;;  %1379 = vmatpush3.bf16.msra.mxu1 %v1514_v16  ;;  %v640_v15 = vrot.slane %v638_v8, 1  ;;  %v643_v16 = vshll.u32 %v1544_v7, 16 }
  0x26   : > { %1344 = vmatprep.subr.bf16.mxu0 %v1575_v6  ;;  %1380 = vmatprep.subr.bf16.mxu1 %v1575_v6 }
  0x29   : > { %1345 = vmatpush3.bf16.msra.mxu0 %v1515_v17  ;;  %1381 = vmatpush3.bf16.msra.mxu1 %v1516_v20  ;;  %v1227_v17 = vcombine.low %v808_v11, %v584_v63  ;;  %v1546_v20 = vld [vmem:[#allocation2 + $0x14] sm:$0xff]  }
  0x2a   : > { %1346 = vmatprep.subr.bf16.mxu0 %v1575_v6  ;;  %1382 = vmatprep.subr.bf16.mxu1 %v1575_v6  ;;  %v651_v25 = vshll.u32 %v1546_v20, 16 }
  0x2b   : > { %v830_v21 = vrot.slane %v1227_v17, 1 }
  0x2c   : > { %v653_v28 = vrot.slane %v651_v25, 1 }
  0x2d   : > { %1347 = vmatpush3.bf16.msra.mxu0 %v1517_v22  ;;  %1383 = vmatpush3.bf16.msra.mxu1 %v1518_v26  ;;  %v831_v22 = vrot.slane %v1544_v7, 1 }
  0x2e   : > { %1348 = vmatprep.subr.bf16.mxu0 %v1575_v6  ;;  %1384 = vmatprep.subr.bf16.mxu1 %v1575_v6 }
  0x2f   : > { %v832_v26 = vsel %vm829_vm2, %v830_v21, %v831_v22 }
  0x31   : > { %1349 = vmatpush3.bf16.msra.mxu0 %v1519_v27  ;;  %1385 = vmatpush3.bf16.msra.mxu1 %v1520_v31 }
  0x32   : > { %1406 = vmatprep.subr.bf16.mxu0 %v1575_v6  ;;  %1442 = vmatprep.subr.bf16.mxu1 %v1575_v6 }
  0x34   : > { %1351 = vmatmul.mubr.bf16.vlgmr.msra.gmra.mxu0 %v304_v32  ;;  %1387 = vmatmul.mubr.bf16.vlgmr.msra.gmra.mxu1 %v1521_v18  ;;  %v641_v18 = vor.u32 %v640_v15, %v636_v14  ;;  %v655_v32 = vshrl.u32 %v1546_v20, 16 }
  0x35   : > { %1407 = vmatpush3.bf16.msra.mxu0 %v1523_v33  ;;  %1443 = vmatpush3.bf16.msra.mxu1 %v1524_v36  ;;  %v659_v33 = vshll.u32 %v1547_v29, 16 }
  0x36   : > { %1408 = vmatprep.subr.bf16.mxu0 %v1575_v6  ;;  %1354 = vmatprep.mubr.msk.bf16.mxu0 %vm1576_vm0, %v1575_v6  ;;  %v657_v35 = vor.u32 %v655_v32, %v653_v28 }
  0x37   : > { %1390 = vmatprep.mubr.msk.bf16.mxu1 %vm1576_vm0, %v1575_v6  ;;  %1444 = vmatprep.subr.bf16.mxu1 %v1575_v6  ;;  %v661_v36 = vrot.slane %v659_v33, 1 }
  0x39   : > { %1409 = vmatpush3.bf16.msra.mxu0 %v1525_v37  ;;  %1445 = vmatpush3.bf16.msra.mxu1 %v1527_v41  ;;  %v1548_v37 = vld [vmem:[#allocation2 + $0x24] sm:$0x1f]   ;;  %v662_v39 = vsel %vm292_vm1, %v657_v35, %v661_v36 }
  0x3a   : > { %1410 = vmatprep.subr.bf16.mxu0 %v1575_v6  ;;  %1446 = vmatprep.subr.bf16.mxu1 %v1575_v6  ;;  %v667_v41 = vshll.u32 %v1548_v37, 16  ;;  %v837_v45 = vrot.slane %v1548_v37, 1  ;;  %v671_v48 = vshrl.u32 %v1548_v37, 16 }
  0x3c   : > { %1355 = vmatmul.mubr.bf16.gmra.mxu0 %v312_v44  ;;  %1391 = vmatmul.mubr.bf16.gmra.mxu1 %v1522_v19  ;;  %v645_v19 = vrot.slane %v643_v16, 1  ;;  %v669_v44 = vrot.slane %v667_v41, 1  ;;  %v838_v47 = vsel %vm829_vm2, %v835_v38, %v837_v45 }
  0x3d   : > { %1411 = vmatpush3.bf16.msra.mxu0 %v1528_v42  ;;  %1447 = vmatpush3.bf16.msra.mxu1 %v1529_v43 }
  0x3e   : > { %1358 = vmatprep.mubr.msk.bf16.mxu0 %vm1576_vm0, %v1575_v6  ;;  %1394 = vmatprep.mubr.msk.bf16.mxu1 %vm1576_vm0, %v1575_v6  ;;  %v646_v23 = vsel %vm292_vm1, %v641_v18, %v645_v19  ;;  %v649_v27 = vor.u32 %v647_v24, %v645_v19  ;;  %v673_v49 = vor.u32 %v671_v48, %v669_v44 }
  0x3f   : > { %1412 = vmatprep.subr.bf16.mxu0 %v1575_v6  ;;  %1448 = vmatprep.subr.bf16.mxu1 %v1575_v6 }
  0x40   : > { %v654_v31 = vsel %vm292_vm1, %v649_v27, %v653_v28 }
  0x41   : > { %1413 = vmatpush3.bf16.msra.mxu0 %v1531_v51  ;;  %1449 = vmatpush3.bf16.msra.mxu1 %v1532_v53 }
  0x42   : > { %1414 = vmatprep.subr.bf16.mxu0 %v1575_v6  ;;  %1450 = vmatprep.subr.bf16.mxu1 %v1575_v6 }
  0x44   : > { %1359 = vmatmul.mubr.bf16.gmra.mxu0 %v320_v54  ;;  %1395 = vmatmul.mubr.bf16.gmra.mxu1 %v1526_v30  ;;  %v833_v30 = vrot.slane %v1546_v20, 1 }
  0x45   : > { %1415 = vmatpush3.bf16.msra.mxu0 %v1533_v55  ;;  %1362 = vmatprep.mubr.msk.bf16.mxu0 %vm1576_vm0, %v1575_v6 }
  0x46   : > { %1398 = vmatprep.mubr.msk.bf16.mxu1 %vm1576_vm0, %v1575_v6  ;;  %1451 = vmatpush3.bf16.msra.mxu1 %v1534_v58  ;;  %v834_v34 = vsel %vm829_vm2, %v831_v22, %v833_v30  ;;  %v836_v42 = vsel %vm829_vm2, %v833_v30, %v835_v38 }
  0x47   : > { %1416 = vmatprep.subr.bf16.mxu0 %v1575_v6  ;;  %1452 = vmatprep.subr.bf16.mxu1 %v1575_v6 }
  0x49   : > { %1417 = vmatpush3.bf16.msra.mxu0 %v1536_v61 }
  0x4a   : > { %1418 = vmatprep.subr.bf16.mxu0 %v1575_v6  ;;  %1453 = vmatpush3.bf16.msra.mxu1 %v1537_v0 }
  0x4b   : > { %1454 = vmatprep.subr.bf16.mxu1 %v1575_v6 }
  0x4c   : > { %1363 = vmatmul.mubr.bf16.gmra.mxu0 %v328_v1  ;;  %1399 = vmatmul.mubr.bf16.gmra.mxu1 %v1703_v40  ;;  %v663_v40 = vshrl.u32 %v1547_v29, 16 }
  0x4d   : > { %1366 = vmatprep.mubr.msk.bf16.mxu0 %vm1576_vm0, %v1575_v6  ;;  %1402 = vmatprep.mubr.msk.bf16.mxu1 %vm1576_vm0, %v1575_v6 }
  0x4e   : > { %1419 = vmatpush3.bf16.msra.mxu0 %v1538_v3  ;;  %1455 = vmatpush3.bf16.msra.mxu1 %v1540_v4  ;;  %v665_v43 = vor.u32 %v663_v40, %v661_v36 }
  0x4f   : > { %1420 = vmatprep.subr.bf16.mxu0 %v1575_v6  ;;  %1456 = vmatprep.subr.bf16.mxu1 %v1575_v6 }
  0x50   : > { %v670_v46 = vsel %vm292_vm1, %v665_v43, %v669_v44 }
  0x52   : > { %1421 = vmatpush3.bf16.msra.mxu0 %v1541_v9  ;;  %1457 = vmatpush3.bf16.msra.mxu1 %v1542_v10 }
  0x54   : > { %1367 = vmatmul.mubr.bf16.gmra.mxu0 %v331_v12  ;;  %1403 = vmatmul.mubr.bf16.gmra.mxu1 %v1173_v13 }
  0x55   : > { %1422 = vmatprep.mubr.msk.bf16.mxu0 %vm1576_vm0, %v1575_v6  ;;  %1458 = vmatprep.mubr.msk.bf16.mxu1 %vm1576_vm0, %v1575_v6 }
  0x5c   : > { %1423 = vmatmul.mubr.bf16.vlgmr.msra.gmra.mxu0 %v646_v23  ;;  %1459 = vmatmul.mubr.bf16.vlgmr.msra.gmra.mxu1 %v832_v26 }
  0x5d   : > { %1426 = vmatprep.mubr.msk.bf16.mxu0 %vm1576_vm0, %v1575_v6  ;;  %1462 = vmatprep.mubr.msk.bf16.mxu1 %vm1576_vm0, %v1575_v6 }
  0x64   : > { %1427 = vmatmul.mubr.bf16.gmra.mxu0 %v654_v31  ;;  %1463 = vmatmul.mubr.bf16.gmra.mxu1 %v834_v34  ;;  %v1828_v34 = vld [vmem:[%s1861_s2] ss:$0 sm:$0xff] }
  0x65   : > { %1430 = vmatprep.mubr.msk.bf16.mxu0 %vm1576_vm0, %v1575_v6  ;;  %1466 = vmatprep.mubr.msk.bf16.mxu1 %vm1576_vm0, %v1575_v6 }
  0x6c   : > { %1431 = vmatmul.mubr.bf16.gmra.mxu0 %v662_v39  ;;  %1467 = vmatmul.mubr.bf16.gmra.mxu1 %v836_v42 }
  0x6d   : > { %1434 = vmatprep.mubr.msk.bf16.mxu0 %vm1576_vm0, %v1575_v6  ;;  %1470 = vmatprep.mubr.msk.bf16.mxu1 %vm1576_vm0, %v1575_v6 }
  0x74   : > { %1435 = vmatmul.mubr.bf16.gmra.mxu0 %v670_v46  ;;  %1471 = vmatmul.mubr.bf16.gmra.mxu1 %v838_v47 }
  0x75   : > { %1438 = vmatprep.mubr.msk.bf16.mxu0 %vm1576_vm0, %v1575_v6  ;;  %1474 = vmatprep.mubr.msk.bf16.mxu1 %vm1576_vm0, %v1575_v6 }
  0x7c   : > { %1439 = vmatmul.mubr.bf16.gmra.mxu0 %v673_v49  ;;  %1475 = vmatmul.mubr.bf16.gmra.mxu1 %v837_v45 }
  0xf4   : > { %v419_v50 = vpop.f32.mrf.mxu0  ;;  %v545_v51 = vpop.f32.mrf.mxu1 }
  0xf5   : > { %v546_v25 = vadd.f32 %v545_v51, %v419_v50 }
  0xf6   : > { %v1352_v52 = vpop.f32.mrf.mxu0  ;;  %v1388_v53 = vpop.f32.mrf.mxu1 }
  0xf8   : > { %v422_v54 = vpop.f32.mrf.mxu0  ;;  %v548_v55 = vpop.f32.mrf.mxu1 }
  0xf9   : > { %v549_v31 = vadd.f32 %v548_v55, %v422_v54 }
  0xfa   : > { %v1353_v56 = vpop.f32.mrf.mxu0  ;;  %v1389_v57 = vpop.f32.mrf.mxu1 }
  0xfc   : > { %v427_v58 = vpop.f32.mrf.mxu0  ;;  %v553_v59 = vpop.f32.mrf.mxu1 }
  0xfd   : > { %v554_v39 = vadd.f32 %v553_v59, %v427_v58 }
  0xfe   : > { %v1356_v60 = vpop.f32.mrf.mxu0  ;;  %v1392_v61 = vpop.f32.mrf.mxu1 }
 0x100   : > { %v430_v62 = vpop.f32.mrf.mxu0  ;;  %v556_v63 = vpop.f32.mrf.mxu1 }
 0x101   : > { %v557_v48 = vadd.f32 %v556_v63, %v430_v62 }
 0x102   : > { %v1357_v0 = vpop.f32.mrf.mxu0  ;;  %v1393_v1 = vpop.f32.mrf.mxu1 }
 0x104   : > { %v435_v6 = vpop.f32.mrf.mxu0  ;;  %v561_v2 = vpop.f32.mrf.mxu1 }
 0x105   : > { %v562_v58 = vadd.f32 %v561_v2, %v435_v6 }
 0x106   : > { %v1360_v3 = vpop.f32.mrf.mxu0  ;;  %v1396_v4 = vpop.f32.mrf.mxu1 }
 0x108   : > { %v438_v5 = vpop.f32.mrf.mxu0  ;;  %v564_v7 = vpop.f32.mrf.mxu1 }
 0x109   : > { %v565_v4 = vadd.f32 %v564_v7, %v438_v5 }
 0x10a   : > { %v1361_v8 = vpop.f32.mrf.mxu0  ;;  %v1397_v9 = vpop.f32.mrf.mxu1 }
 0x10c   : > { %v1813_v10 = vpop.f32.mrf.mxu0  ;;  %v1815_v11 = vpop.f32.mrf.mxu1 }
 0x10e   : > { %v1364_v12 = vpop.f32.mrf.mxu0  ;;  %v1400_v13 = vpop.f32.mrf.mxu1 }
 0x110   : > { %v1817_v14 = vpop.f32.mrf.mxu0  ;;  %v1819_v15 = vpop.f32.mrf.mxu1 }
 0x112   : > { %v1365_v16 = vpop.f32.mrf.mxu0  ;;  %v1401_v17 = vpop.f32.mrf.mxu1 }
 0x114   : > { %v1821_v18 = vpop.f32.mrf.mxu0  ;;  %v1823_v19 = vpop.f32.mrf.mxu1 }
 0x116   : > { %v1368_v20 = vpop.f32.mrf.mxu0  ;;  %v1404_v21 = vpop.f32.mrf.mxu1 }
 0x117   : > { %v570_v21 = vadd.f32 %v1815_v11, %v1813_v10 }
 0x118   : > { %v454_v22 = vpop.f32.mrf.mxu0  ;;  %v580_v23 = vpop.f32.mrf.mxu1 }
 0x11a   : > { %v1369_v24 = vpop.f32.mrf.mxu0  ;;  %v1405_v26 = vpop.f32.mrf.mxu1 }
 0x11c   : > { %v761_v27 = vpop.f32.mrf.mxu0  ;;  %v926_v29 = vpop.f32.mrf.mxu1 }
 0x11d   : > { %v799_v28 = vadd.f32 %v761_v27, %v546_v25 }
 0x11e   : > { %v1424_v30 = vpop.f32.mrf.mxu0  ;;  %v1460_v33 = vpop.f32.mrf.mxu1 }
 0x11f   : > { %v964_v32 = vadd.f32 %v926_v29, %v799_v28  ;;  %v573_v28 = vadd.f32 %v1819_v15, %v1817_v14 }
 0x120   : > { %v764_v35 = vpop.f32.mrf.mxu0  ;;  %v929_v37 = vpop.f32.mrf.mxu1 }
 0x121   : > { %v800_v36 = vadd.f32 %v764_v35, %v549_v31  ;;  %v980_v40 = vadd.f32 %v1828_v34, %v964_v32 }
 0x122   : > { %v1425_v38 = vpop.f32.mrf.mxu0  ;;  %v1461_v42 = vpop.f32.mrf.mxu1 }
 0x123   : > { %v965_v41 = vadd.f32 %v929_v37, %v800_v36  ;;  %v989_v49 = vmax.f32 %v980_v40, 0.0  ;;  %v578_v37 = vadd.f32 %v1823_v19, %v1821_v18 }
 0x124   : > { %v769_v43 = vpop.f32.mrf.mxu0  ;;  %v934_v46 = vpop.f32.mrf.mxu1 }
 0x125   : > { %v981_v44 = vadd.f32 %v1828_v34, %v965_v41  ;;  %v801_v45 = vadd.f32 %v769_v43, %v554_v39 }
 0x126   : > { %v1428_v47 = vpop.f32.mrf.mxu0  ;;  %v1464_v52 = vpop.f32.mrf.mxu1 }
 0x127   : > { %v990_v50 = vmax.f32 %v981_v44, 0.0  ;;  %v966_v51 = vadd.f32 %v934_v46, %v801_v45 }
 0x128   : > { %v772_v53 = vpop.f32.mrf.mxu0  ;;  %v937_v56 = vpop.f32.mrf.mxu1 }
 0x129   : > { %v1262_v54 = vpack.c.bf16 %v990_v50, %v989_v49  ;;  %v802_v55 = vadd.f32 %v772_v53, %v557_v48  ;;  %v982_v59 = vadd.f32 %v1828_v34, %v966_v51 }
 0x12a   : > { %v1429_v57 = vpop.f32.mrf.mxu0  ;;  %v1465_v61 = vpop.f32.mrf.mxu1 }
 0x12b   : > { %1263 = vst [vmem:[%s1621_s23] sm:$0xff] %v1262_v54   ;;  %v967_v60 = vadd.f32 %v937_v56, %v802_v55  ;;  %v991_v8 = vmax.f32 %v982_v59, 0.0 }
 0x12c   : > { %v777_v0 = vpop.f32.mrf.mxu0  ;;  %v942_v63 = vpop.f32.mrf.mxu1 }
 0x12d   : > { %v983_v1 = vadd.f32 %v1828_v34, %v967_v60  ;;  %v803_v62 = vadd.f32 %v777_v0, %v562_v58 }
 0x12e   : > { %v1432_v3 = vpop.f32.mrf.mxu0  ;;  %v1468_v13 = vpop.f32.mrf.mxu1 }
 0x12f   : > { %v992_v9 = vmax.f32 %v983_v1, 0.0  ;;  %v968_v12 = vadd.f32 %v942_v63, %v803_v62 }
 0x130   : > { %v780_v16 = vpop.f32.mrf.mxu0  ;;  %v945_v2 = vpop.f32.mrf.mxu1 }
 0x131   : > { %v1267_v17 = vpack.c.bf16 %v992_v9, %v991_v8  ;;  %v804_v6 = vadd.f32 %v780_v16, %v565_v4  ;;  %v984_v22 = vadd.f32 %v1828_v34, %v968_v12 }
 0x132   : > { %v1433_v20 = vpop.f32.mrf.mxu0  ;;  %v1469_v24 = vpop.f32.mrf.mxu1 }
 0x133   : > { %1279 = vst [vmem:[%s1621_s23 + $0x8] sm:$0xff] %v1267_v17   ;;  %v969_v23 = vadd.f32 %v945_v2, %v804_v6  ;;  %v993_v29 = vmax.f32 %v984_v22, 0.0 }
 0x134   : > { %v785_v25 = vpop.f32.mrf.mxu0  ;;  %v950_v26 = vpop.f32.mrf.mxu1 }
 0x135   : > { %v985_v5 = vadd.f32 %v1828_v34, %v969_v23  ;;  %v805_v7 = vadd.f32 %v785_v25, %v570_v21 }
 0x136   : > { %v1436_v27 = vpop.f32.mrf.mxu0  ;;  %v1472_v32 = vpop.f32.mrf.mxu1 }
 0x137   : > { %v994_v30 = vmax.f32 %v985_v5, 0.0  ;;  %v970_v31 = vadd.f32 %v950_v26, %v805_v7 }
 0x138   : > { %v788_v10 = vpop.f32.mrf.mxu0  ;;  %v953_v35 = vpop.f32.mrf.mxu1 }
 0x139   : > { %v1272_v11 = vpack.c.bf16 %v994_v30, %v993_v29  ;;  %v806_v33 = vadd.f32 %v788_v10, %v573_v28  ;;  %v986_v38 = vadd.f32 %v1828_v34, %v970_v31 }
 0x13a   : > { %v1437_v36 = vpop.f32.mrf.mxu0  ;;  %v1473_v40 = vpop.f32.mrf.mxu1 }
 0x13b   : > { %1280 = vst [vmem:[%s1621_s23 + $0x10] sm:$0xff] %v1272_v11   ;;  %v971_v39 = vadd.f32 %v953_v35, %v806_v33  ;;  %v995_v44 = vmax.f32 %v986_v38, 0.0 }
 0x13c   : > { %v793_v41 = vpop.f32.mrf.mxu0  ;;  %v958_v42 = vpop.f32.mrf.mxu1 }
 0x13d   : > { %v987_v14 = vadd.f32 %v1828_v34, %v971_v39  ;;  %v807_v15 = vadd.f32 %v793_v41, %v578_v37 }
 0x13e   : > { %v1440_v43 = vpop.f32.mrf.mxu0  ;;  %v1476_v47 = vpop.f32.mrf.mxu1 }
 0x13f   : > { %v996_v45 = vmax.f32 %v987_v14, 0.0  ;;  %v972_v46 = vadd.f32 %v958_v42, %v807_v15 }
 0x140   : > { %v796_v48 = vpop.f32.mrf.mxu0  ;;  %v961_v19 = vpop.f32.mrf.mxu1 }
 0x141   : > { %v1277_v49 = vpack.c.bf16 %v996_v45, %v995_v44  ;;  %v988_v18 = vadd.f32 %v1828_v34, %v972_v46 }
 0x142   : > { %v1441_v50 = vpop.f32.mrf.mxu0  ;;  %v1477_v52 = vpop.f32.mrf.mxu1 }
 0x143   : > { %1281 = vst [vmem:[%s1621_s23 + $0x18] sm:$0xff] %v1277_v49   ;;  %v997_v51 = vmax.f32 %v988_v18, 0.0 }
 0x145   : > { %v1258_v53 = vpack.c.bf16 %v997_v51, %v997_v51 }
 0x147   : > { %1043 = vst [vmem:[%s1621_s23 + $0x20] sm:$0xf] %v1258_v53 }
 0x148 PF: > { %s13_s14 = sadd.s32 1, %s1573_s14   ;;  %s1863_s12 = smov %s1569_s13 }
 0x149   : > { %p10_p5 = scmp.ge.s32.totalorder %s13_s14, 4   ;;  %s1864_s13 = smov %s1866_s15 }
 0x14b   :  { %12 = sbr.rel (!%p10_p5) target bundleno = 2 (0x2), region = 110 }
 0x150   :  { %1074 = vsyncmov [#allocation3] }
 0x153   :  { %s1075_s20 = vpop.sfrf %1074 }
 0x154   :  { %p1248_p6 = scmp.ne.s32.totalorder %s1075_s20, 0 }
 0x156   :  { %1079 = shalt.err (%p1248_p6)  }

// kernel: a_call__.6
= control target key start
LH: loop header
LB: loop body
LE: loop exit
PB: predicated region body
PF: predicated region fallthrough
CT: control target
= control target key end

     0   :  { %s3011_s12 = smov 0   ;;  %s3013_s13 = smov 0   ;;  %s3641_s0 = inlined_call_operand.vmem [shape: bf16[2,104,128], index: 0, kind: input, shape index: {}]   ;;  %s3642_s1 = inlined_call_operand.vmem [shape: bf16[9,128,128], index: 1, kind: input, shape index: {}]   ;;  %s3643_s2 = inlined_call_operand.vmem [shape: f32[1,128], index: 2, kind: input, shape index: {}]   ;;  %s3644_s3 = inlined_call_operand.vmem [shape: bf16[2,80,128], index: 3, kind: output, shape index: {}]  }
   0x1   :  { %s3015_s14 = smov 0  }
   0x2 LB: > { %s25_s15 = sadd.s32 1, %s2983_s13  ;;  %p2103_p0 = scmp.ge.s32.totalorder %s2987_s14, 1  ;;  %s2987_s14 = sphi %s3015_s14, %s13_s14   ;;  %s2983_s13 = sphi %s3013_s13, %s3646_s13   ;;  %s2979_s12 = sphi %s3011_s12, %s3645_s12  }
   0x3   : > { %p27_p1 = scmp.ge.s32.totalorder %s25_s15, 2  ;;  %p117_p2 = scmp.lt.s32.totalorder %s2987_s14, 3 }
   0x5   : > { %s3648_s15 = smov (%p27_p1, %s25_s15), 0  ;;  %p118_p3 = pnand %p2103_p0, %p117_p2 }
   0x6   : > { %p139_p4 = scmp.lt.s32.totalorder (!%p118_p3), %s2979_s12, 1  ;;  %s2344_s16 = smul.u32 (!%p118_p3), 52, %s2979_s12 }
   0x7   : > { %121 = sbr.rel (%p118_p3) target bundleno = 435 (0x1b3), region = 28 }
   0x8   : > { %s155_s19 = scalar_lea.vmem (!%p118_p3), %s3641_s0, %s2344_s16 }
   0xc   : > { %s3650_s12 = smov (!%p139_p4, %s2979_s12), 1  ;;  %v194_v0 = vld [vmem:[%s155_s19] sm:$0xff]  ;;  %v196_v1 = vld [vmem:[%s155_s19 + $0x8] sm:$0xff]  ;;  %v198_v2 = vld [vmem:[%s155_s19 + $0x10] sm:$0xff] }
   0xd   : > { %s2841_s20 = smul.u32 40, %s3650_s12  ;;  %195 = vst [vmem:[#allocation2] sm:$0xff] %v194_v0  ;;  %197 = vst [vmem:[#allocation2 + $0x8] sm:$0xff] %v196_v1  ;;  %v200_v3 = vld [vmem:[%s155_s19 + $0x18] sm:$0xff]  ;;  %v202_v4 = vld [vmem:[%s155_s19 + $0x20] sm:$0xff] }
   0xe   : > { %199 = vst [vmem:[#allocation2 + $0x10] sm:$0xff] %v198_v2  ;;  %v204_v5 = vld [vmem:[%s155_s19 + $0x28] sm:$0xff]  ;;  %201 = vst [vmem:[#allocation2 + $0x18] sm:$0xff] %v200_v3  ;;  %v2106_v6 = vld [vmem:[%s155_s19 + $0x30] sm:$0xf] }
   0xf   : > { %s3035_s23 = scalar_lea.vmem %s3644_s3, %s2841_s20  ;;  %203 = vst [vmem:[#allocation2 + $0x20] sm:$0xff] %v202_v4  ;;  %205 = vst [vmem:[#allocation2 + $0x28] sm:$0xff] %v204_v5 }
  0x10   : > { %217 = vst [vmem:[#allocation2 + $0x30] sm:$0xf] %v2106_v6 }
  0x11   : > { %221 = vsyncadd [#allocation3], 832 }
  0x12   : > { %2975 = dma.done.wait [#allocation3], 832 }
  0x13   : > { %2976 = vsyncadd [#allocation3], 4294966464  ;;  %v2989_v7 = vmov 0.0   ;;  %vm2990_vm0 = vmmov 0   ;;  %v2868_v8 = vld [vmem:[%s3642_s1 + $0x78] sm:$0xff]   ;;  %v2870_v10 = vld [vmem:[%s3642_s1 + $0x70] sm:$0xff]  }
  0x14   : > { %2501 = vmatprep.subr.bf16.mxu0 %v2989_v7  ;;  %2537 = vmatprep.subr.bf16.mxu1 %v2989_v7  ;;  %v2869_v9 = vld [vmem:[%s3642_s1 + $0x38] sm:$0xff]   ;;  %v2871_v11 = vld [vmem:[%s3642_s1 + $0x30] sm:$0xff]   ;;  %v2872_v12 = vld [vmem:[%s3642_s1 + $0x68] sm:$0xff]   ;;  %vm298_vm1 = vsmask.f32 7424  ;;  %vm616_vm2 = vcmask 1046528  }
  0x15   : > { %2517 = vmatprep.mubr.msk.bf16.mxu0 %vm2990_vm0, %v2989_v7  ;;  %2553 = vmatprep.mubr.msk.bf16.mxu1 %vm2990_vm0, %v2989_v7  ;;  %v2873_v13 = vld [vmem:[%s3642_s1 + $0x28] sm:$0xff]   ;;  %v2874_v14 = vld [vmem:[%s3642_s1 + $0x60] sm:$0xff]   ;;  %v2876_v16 = vld [vmem:[%s3642_s1 + $0x58] sm:$0xff]   ;;  %vm988_vm3 = vsmask.f32 6400  ;;  %vm1199_vm4 = vcmask 1045504  }
  0x16   : > { %2502 = vmatpush3.bf16.msra.mxu0 %v2868_v8  ;;  %2538 = vmatpush3.bf16.msra.mxu1 %v2869_v9  ;;  %v2875_v15 = vld [vmem:[%s3642_s1 + $0x20] sm:$0xff]   ;;  %v2877_v17 = vld [vmem:[%s3642_s1 + $0x18] sm:$0xff]   ;;  %v2878_v20 = vld [vmem:[%s3642_s1 + $0x50] sm:$0xff]   ;;  %vm1571_vm5 = vsmask.f32 5376  ;;  %vm1782_vm6 = vcmask 1044480  }
  0x17   : > { %2503 = vmatprep.subr.bf16.mxu0 %v2989_v7  ;;  %2539 = vmatprep.subr.bf16.mxu1 %v2989_v7  ;;  %v226_v18 = vld [vmem:[#allocation2] sm:$0xf]  ;;  %v3081_v19 = vld [vmem:[#allocation2 + $0x4] sm:$0xf]  ;;  %v3087_v22 = vld [vmem:[#allocation2 + $0x8] sm:$0xff]  }
  0x18   : > { %v2123_v21 = vcombine.low %v226_v18, %v3081_v19  ;;  %v2879_v23 = vld [vmem:[%s3642_s1 + $0x10] sm:$0xff]   ;;  %v2880_v25 = vld [vmem:[%s3642_s1 + $0x48] sm:$0xff]   ;;  %v307_v28 = vshll.u32 %v3087_v22, 16  ;;  %v2882_v30 = vld [vmem:[%s3642_s1 + $0x40] sm:$0xff]   ;;  %v311_v37 = vshrl.u32 %v3087_v22, 16 }
  0x19   : > { %v2881_v29 = vld [vmem:[%s3642_s1 + $0x8] sm:$0xff]   ;;  %v3106_v33 = vld [vmem:[#allocation2 + $0x10] sm:$0xff]   ;;  %v2883_v34 = vld [vmem:[%s3642_s1] sm:$0xff]  }
  0x1a   : > { %2504 = vmatpush3.bf16.msra.mxu0 %v2870_v10  ;;  %2540 = vmatpush3.bf16.msra.mxu1 %v2871_v11  ;;  %v302_v24 = vshll.u32 %v2123_v21, 16  ;;  %v300_v26 = vshrl.u32 %v2123_v21, 16  ;;  %v309_v32 = vrot.slane %v307_v28, 1  ;;  %v2886_v35 = vld [vmem:[%s3642_s1 + $0xb8] sm:$0xff]   ;;  %v315_v38 = vshll.u32 %v3106_v33, 16  ;;  %v2887_v41 = vld [vmem:[%s3642_s1 + $0xb0] sm:$0xff]  }
  0x1b   : > { %2505 = vmatprep.subr.bf16.mxu0 %v2989_v7  ;;  %2541 = vmatprep.subr.bf16.mxu1 %v2989_v7  ;;  %v2889_v39 = vld [vmem:[%s3642_s1 + $0xf8] sm:$0xff]   ;;  %v2891_v44 = vld [vmem:[%s3642_s1 + $0xf0] sm:$0xff]   ;;  %v2890_v47 = vld [vmem:[%s3642_s1 + $0xa8] sm:$0xff]   ;;  %v319_v48 = vshrl.u32 %v3106_v33, 16  ;;  %v620_v28 = vrot.slane %v3106_v33, 1 }
  0x1c   : > { %v304_v27 = vrot.slane %v302_v24, 1  ;;  %v3124_v40 = vld [vmem:[#allocation2 + $0x18] sm:$0xff]   ;;  %v313_v42 = vor.u32 %v311_v37, %v309_v32  ;;  %v317_v43 = vrot.slane %v315_v38, 1  ;;  %v2894_v49 = vld [vmem:[%s3642_s1 + $0xe8] sm:$0xff]   ;;  %v2893_v51 = vld [vmem:[%s3642_s1 + $0xa0] sm:$0xff]  }
  0x1d   : > { %v323_v45 = vshll.u32 %v3124_v40, 16  ;;  %v3152_v52 = vld [vmem:[#allocation2 + $0x20] sm:$0xff]   ;;  %v2895_v55 = vld [vmem:[%s3642_s1 + $0x98] sm:$0xff]   ;;  %v327_v57 = vshrl.u32 %v3124_v40, 16  ;;  %v2899_v63 = vld [vmem:[%s3642_s1 + $0x90] sm:$0xff]  }
  0x1e   : > { %2506 = vmatpush3.bf16.msra.mxu0 %v2872_v12  ;;  %2542 = vmatpush3.bf16.msra.mxu1 %v2873_v13  ;;  %v305_v31 = vor.u32 %v304_v27, %v300_v26  ;;  %v318_v46 = vsel %vm298_vm1, %v313_v42, %v317_v43  ;;  %v321_v53 = vor.u32 %v319_v48, %v317_v43  ;;  %v2896_v54 = vld [vmem:[%s3642_s1 + $0xe0] sm:$0xff]   ;;  %v331_v58 = vshll.u32 %v3152_v52, 16  ;;  %v2898_v59 = vld [vmem:[%s3642_s1 + $0xd8] sm:$0xff]   ;;  %v3174_v60 = vld [vmem:[#allocation2 + $0x28] ss:$0 sps:$4 sm:$0x11]  }
  0x1f   : > { %2507 = vmatprep.subr.bf16.mxu0 %v2989_v7  ;;  %2543 = vmatprep.subr.bf16.mxu1 %v2989_v7  ;;  %v325_v50 = vrot.slane %v323_v45, 1  ;;  %v2900_v0 = vld [vmem:[%s3642_s1 + $0xd0] sm:$0xff]   ;;  %v335_v2 = vshrl.u32 %v3152_v52, 16  ;;  %v339_v3 = vshll.u32 %v3174_v60, 16  ;;  %v2901_v4 = vld [vmem:[%s3642_s1 + $0x88] sm:$0xff]   ;;  %v2904_v6 = vld [vmem:[%s3642_s1 + $0x80] sm:$0xff]  }
  0x20   : > { %v310_v36 = vsel %vm298_vm1, %v305_v31, %v309_v32  ;;  %v333_v62 = vrot.slane %v331_v58, 1  ;;  %v2903_v5 = vld [vmem:[%s3642_s1 + $0xc8] sm:$0xff]   ;;  %v595_v8 = vld [vmem:[#allocation2] sm:$0xe]  ;;  %v764_v12 = vld [vmem:[#allocation2 + $0x4] sm:$0xe] }
  0x21   : > { %v326_v56 = vsel %vm298_vm1, %v321_v53, %v325_v50  ;;  %v329_v61 = vor.u32 %v327_v57, %v325_v50  ;;  %v341_v10 = vrot.slane %v339_v3, 1  ;;  %v2905_v11 = vld [vmem:[%s3642_s1 + $0xc0] sm:$0xff]   ;;  %v3213_v13 = vld [vmem:[#allocation2 + $0x8] sm:$0xf]  ;;  %v2910_v27 = vld [vmem:[%s3642_s1 + $0x130] sm:$0xff]   ;;  %v624_v45 = vrot.slane %v3152_v52, 1 }
  0x22   : > { %2508 = vmatpush3.bf16.msra.mxu0 %v2874_v14  ;;  %2544 = vmatpush3.bf16.msra.mxu1 %v2875_v15  ;;  %v337_v9 = vor.u32 %v335_v2, %v333_v62  ;;  %v2161_v15 = vcombine.low %v595_v8, %v3081_v19  ;;  %v618_v19 = vrot.slane %v3087_v22, 1  ;;  %v2913_v32 = vld [vmem:[%s3642_s1 + $0x128] sm:$0xff]   ;;  %v2916_v37 = vld [vmem:[%s3642_s1 + $0x120] sm:$0xff]   ;;  %v2923_v48 = vld [vmem:[%s3642_s1 + $0x150] sm:$0xff]  }
  0x23   : > { %2509 = vmatprep.subr.bf16.mxu0 %v2989_v7  ;;  %2545 = vmatprep.subr.bf16.mxu1 %v2989_v7  ;;  %v334_v1 = vsel %vm298_vm1, %v329_v61, %v333_v62  ;;  %v3289_v43 = vld [vmem:[#allocation2 + $0x24] sm:$0xff]  }
  0x24   : > { %v342_v14 = vsel %vm298_vm1, %v337_v9, %v341_v10  ;;  %v617_v18 = vrot.slane %v2161_v15, 1  ;;  %v621_v31 = vsel %vm616_vm2, %v618_v19, %v620_v28  ;;  %v2926_v53 = vld [vmem:[%s3642_s1 + $0x148] sm:$0xff]   ;;  %v2928_v61 = vld [vmem:[%s3642_s1 + $0x140] sm:$0xff]  }
  0x25   : > { %v1178_v62 = vld [vmem:[#allocation2 + $0x4] sm:$0xc] }
  0x26   : > { %2510 = vmatpush3.bf16.msra.mxu0 %v2876_v16  ;;  %2546 = vmatpush3.bf16.msra.mxu1 %v2877_v17  ;;  %v3219_v16 = vcombine.low %v764_v12, %v3213_v13  ;;  %v3221_v17 = vld [vmem:[#allocation2 + $0xc] sm:$0xff]   ;;  %v619_v24 = vsel %vm616_vm2, %v617_v18, %v618_v19  ;;  %v2932_v19 = vld [vmem:[%s3642_s1 + $0x1f8] sm:$0xff]  }
  0x27   : > { %2511 = vmatprep.subr.bf16.mxu0 %v2989_v7  ;;  %2547 = vmatprep.subr.bf16.mxu1 %v2989_v7  ;;  %v998_v57 = vshrl.u32 %v3221_v17, 16  ;;  %v1001_v58 = vshll.u32 %v3221_v17, 16  ;;  %v1201_v12 = vrot.slane %v3221_v17, 2 }
  0x29   : > { %v1000_v2 = vrot.slane %v998_v57, 1  ;;  %v1003_v3 = vrot.slane %v1001_v58, 2  ;;  %v3428_v58 = vld [vmem:[#allocation2 + $0x10] sm:$0xff]  }
  0x2a   : > { %2512 = vmatpush3.bf16.msra.mxu0 %v2878_v20  ;;  %2548 = vmatpush3.bf16.msra.mxu1 %v2879_v23  ;;  %v820_v20 = vrot.slane %v3219_v16, 1  ;;  %v2909_v23 = vld [vmem:[%s3642_s1 + $0x138] sm:$0xff]  }
  0x2b   : > { %2513 = vmatprep.subr.bf16.mxu0 %v2989_v7  ;;  %2549 = vmatprep.subr.bf16.mxu1 %v2989_v7  ;;  %v1004_v8 = vor.u32 %v1003_v3, %v1000_v2  ;;  %v1584_v2 = vshll.u32 %v3428_v58, 16  ;;  %v2946_v3 = vld [vmem:[%s3642_s1 + $0x1c0] sm:$0xff]  }
  0x2e   : > { %2514 = vmatpush3.bf16.msra.mxu0 %v2880_v25  ;;  %2550 = vmatpush3.bf16.msra.mxu1 %v2881_v29  ;;  %v3237_v25 = vld [vmem:[#allocation2 + $0x14] sm:$0xff]  }
  0x2f   : > { %2515 = vmatprep.subr.bf16.mxu0 %v2989_v7  ;;  %2551 = vmatprep.subr.bf16.mxu1 %v2989_v7  ;;  %v823_v29 = vrot.slane %v3237_v25, 1  ;;  %v1007_v9 = vshrl.u32 %v3237_v25, 16  ;;  %v1010_v10 = vshll.u32 %v3237_v25, 16 }
  0x31   : > { %v1009_v15 = vrot.slane %v1007_v9, 1 }
  0x32   : > { %2516 = vmatpush3.bf16.msra.mxu0 %v2882_v30  ;;  %2552 = vmatpush3.bf16.msra.mxu1 %v2883_v34  ;;  %v2914_v30 = vld [vmem:[%s3642_s1 + $0x170] sm:$0xff]   ;;  %v3263_v34 = vld [vmem:[#allocation2 + $0x1c] sm:$0xff]  }
  0x33   : > { %2573 = vmatprep.subr.bf16.mxu0 %v2989_v7  ;;  %2609 = vmatprep.subr.bf16.mxu1 %v2989_v7  ;;  %v825_v38 = vrot.slane %v3263_v34, 1 }
  0x35   : > { %2518 = vmatmul.mubr.bf16.vlgmr.msra.gmra.mxu0 %v310_v36  ;;  %2554 = vmatmul.mubr.bf16.vlgmr.msra.gmra.mxu1 %v2123_v21  ;;  %v821_v21 = vrot.slane %v3221_v17, 1  ;;  %v622_v36 = vrot.slane %v3124_v40, 1  ;;  %v826_v42 = vsel %vm616_vm2, %v823_v29, %v825_v38  ;;  %v2931_v17 = vld [vmem:[%s3642_s1 + $0x1b0] sm:$0xff]  }
  0x36   : > { %2574 = vmatpush3.bf16.msra.mxu0 %v2886_v35  ;;  %2521 = vmatprep.mubr.msk.bf16.mxu0 %vm2990_vm0, %v2989_v7  ;;  %v2917_v35 = vld [vmem:[%s3642_s1 + $0x168] sm:$0xff]  }
  0x37   : > { %2575 = vmatprep.subr.bf16.mxu0 %v2989_v7  ;;  %2557 = vmatprep.mubr.msk.bf16.mxu1 %vm2990_vm0, %v2989_v7  ;;  %v822_v26 = vsel %vm616_vm2, %v820_v20, %v821_v21 }
  0x38   : > { %2610 = vmatpush3.bf16.msra.mxu1 %v2889_v39  ;;  %v2919_v39 = vld [vmem:[%s3642_s1 + $0x160] sm:$0xff]  }
  0x39   : > { %2611 = vmatprep.subr.bf16.mxu1 %v2989_v7 }
  0x3a   : > { %2576 = vmatpush3.bf16.msra.mxu0 %v2887_v41  ;;  %v2918_v41 = vld [vmem:[%s3642_s1 + $0x118] sm:$0xff]  }
  0x3b   : > { %2577 = vmatprep.subr.bf16.mxu0 %v2989_v7 }
  0x3c   : > { %2612 = vmatpush3.bf16.msra.mxu1 %v2891_v44  ;;  %v2921_v44 = vld [vmem:[%s3642_s1 + $0x158] sm:$0xff]  }
  0x3d   : > { %2522 = vmatmul.mubr.bf16.gmra.mxu0 %v318_v46  ;;  %2613 = vmatprep.subr.bf16.mxu1 %v2989_v7  ;;  %v2922_v46 = vld [vmem:[%s3642_s1 + $0x110] sm:$0xff]  }
  0x3e   : > { %2558 = vmatmul.mubr.bf16.gmra.mxu1 %v3087_v22  ;;  %2578 = vmatpush3.bf16.msra.mxu0 %v2890_v47  ;;  %v2912_v22 = vld [vmem:[%s3642_s1 + $0x178] sm:$0xff]   ;;  %v827_v47 = vrot.slane %v3289_v43, 1 }
  0x3f   : > { %2525 = vmatprep.mubr.msk.bf16.mxu0 %vm2990_vm0, %v2989_v7  ;;  %2561 = vmatprep.mubr.msk.bf16.mxu1 %vm2990_vm0, %v2989_v7 }
  0x40   : > { %2579 = vmatprep.subr.bf16.mxu0 %v2989_v7  ;;  %2614 = vmatpush3.bf16.msra.mxu1 %v2894_v49  ;;  %v625_v49 = vsel %vm616_vm2, %v622_v36, %v624_v45  ;;  %v828_v50 = vsel %vm616_vm2, %v825_v38, %v827_v47 }
  0x41   : > { %2615 = vmatprep.subr.bf16.mxu1 %v2989_v7 }
  0x42   : > { %2580 = vmatpush3.bf16.msra.mxu0 %v2893_v51  ;;  %v2924_v51 = vld [vmem:[%s3642_s1 + $0x108] sm:$0xff]  }
  0x43   : > { %2581 = vmatprep.subr.bf16.mxu0 %v2989_v7 }
  0x44   : > { %2616 = vmatpush3.bf16.msra.mxu1 %v2896_v54  ;;  %v626_v54 = vrot.slane %v3174_v60, 1  ;;  %v2927_v60 = vld [vmem:[%s3642_s1 + $0x100] sm:$0xff]  }
  0x45   : > { %2526 = vmatmul.mubr.bf16.gmra.mxu0 %v326_v56  ;;  %2617 = vmatprep.subr.bf16.mxu1 %v2989_v7  ;;  %v993_v56 = vshll.u32 %v3219_v16, 16 }
  0x46   : > { %2562 = vmatmul.mubr.bf16.gmra.mxu1 %v3106_v33  ;;  %2582 = vmatpush3.bf16.msra.mxu0 %v2895_v55  ;;  %v824_v33 = vsel %vm616_vm2, %v821_v21, %v823_v29  ;;  %v990_v55 = vshrl.u32 %v3219_v16, 16  ;;  %v1012_v16 = vrot.slane %v1010_v10, 2  ;;  %v1016_v21 = vshrl.u32 %v3263_v34, 16 }
  0x47   : > { %2529 = vmatprep.mubr.msk.bf16.mxu0 %vm2990_vm0, %v2989_v7  ;;  %2565 = vmatprep.mubr.msk.bf16.mxu1 %vm2990_vm0, %v2989_v7  ;;  %v1586_v10 = vrot.slane %v1584_v2, 3 }
  0x48   : > { %2583 = vmatprep.subr.bf16.mxu0 %v2989_v7  ;;  %2618 = vmatpush3.bf16.msra.mxu1 %v2898_v59  ;;  %v1013_v20 = vor.u32 %v1012_v16, %v1009_v15 }
  0x49   : > { %2619 = vmatprep.subr.bf16.mxu1 %v2989_v7 }
  0x4a   : > { %2584 = vmatpush3.bf16.msra.mxu0 %v2899_v63  ;;  %v627_v63 = vsel %vm616_vm2, %v624_v45, %v626_v54 }
  0x4b   : > { %2585 = vmatprep.subr.bf16.mxu0 %v2989_v7 }
  0x4c   : > { %2620 = vmatpush3.bf16.msra.mxu1 %v2900_v0  ;;  %v992_v0 = vrot.slane %v990_v55, 1 }
  0x4d   : > { %2530 = vmatmul.mubr.bf16.gmra.mxu0 %v334_v1  ;;  %2621 = vmatprep.subr.bf16.mxu1 %v2989_v7  ;;  %v995_v1 = vrot.slane %v993_v56, 2 }
  0x4e   : > { %2566 = vmatmul.mubr.bf16.gmra.mxu1 %v3124_v40  ;;  %2533 = vmatprep.mubr.msk.bf16.mxu0 %vm2990_vm0, %v2989_v7  ;;  %v623_v40 = vsel %vm616_vm2, %v620_v28, %v622_v36  ;;  %v1018_v28 = vrot.slane %v1016_v21, 1  ;;  %v1205_v36 = vrot.slane %v3263_v34, 2 }
  0x4f   : > { %2569 = vmatprep.mubr.msk.bf16.mxu1 %vm2990_vm0, %v2989_v7  ;;  %2586 = vmatpush3.bf16.msra.mxu0 %v2901_v4 }
  0x50   : > { %2622 = vmatpush3.bf16.msra.mxu1 %v2903_v5  ;;  %2587 = vmatprep.subr.bf16.mxu0 %v2989_v7  ;;  %v2241_v5 = vcombine.low %v1178_v62, %v3213_v13  ;;  %v2945_v62 = vld [vmem:[%s3642_s1 + $0x180] sm:$0xff]  }
  0x51   : > { %2623 = vmatprep.subr.bf16.mxu1 %v2989_v7 }
  0x53   : > { %2588 = vmatpush3.bf16.msra.mxu0 %v2904_v6  ;;  %v996_v6 = vor.u32 %v995_v1, %v992_v0  ;;  %v1581_v1 = vshrl.u32 %v3428_v58, 16 }
  0x54   : > { %2624 = vmatpush3.bf16.msra.mxu1 %v2905_v11  ;;  %2645 = vmatprep.subr.bf16.mxu0 %v2989_v7  ;;  %v1200_v11 = vrot.slane %v2241_v5, 2 }
  0x55   : > { %2534 = vmatmul.mubr.bf16.gmra.mxu0 %v342_v14  ;;  %2681 = vmatprep.subr.bf16.mxu1 %v2989_v7  ;;  %v1005_v13 = vsel %vm988_vm3, %v996_v6, %v1004_v8  ;;  %v2930_v14 = vld [vmem:[%s3642_s1 + $0x1b8] sm:$0xff]   ;;  %v1583_v9 = vrot.slane %v1581_v1, 2 }
  0x56   : > { %2570 = vmatmul.mubr.bf16.gmra.mxu1 %v3152_v52  ;;  %2589 = vmatprep.mubr.msk.bf16.mxu0 %vm2990_vm0, %v2989_v7  ;;  %v2925_v52 = vld [vmem:[#allocation2 + $0x2c] ss:$0 sps:$4 sm:$0x11]   ;;  %v1202_v18 = vsel %vm1199_vm4, %v1200_v11, %v1201_v12  ;;  %v3450_v11 = vld [vmem:[#allocation2 + $0x18] sm:$0xff]  }
  0x57   : > { %2625 = vmatprep.mubr.msk.bf16.mxu1 %vm2990_vm0, %v2989_v7  ;;  %v829_v59 = vrot.slane %v2925_v52, 1  ;;  %v3418_v52 = vld [vmem:[#allocation2 + $0xc] sm:$0xf]  ;;  %v1587_v15 = vor.u32 %v1586_v10, %v1583_v9  ;;  %v1590_v16 = vshrl.u32 %v3450_v11, 16 }
  0x59   : > { %v830_v4 = vsel %vm616_vm2, %v827_v47, %v829_v59  ;;  %v2944_v59 = vld [vmem:[%s3642_s1 + $0x1c8] sm:$0xff]   ;;  %v1592_v21 = vrot.slane %v1590_v16, 2 }
  0x5d   : > { %2590 = vmatmul.mubr.bf16.vlgmr.msra.gmra.mxu0 %v619_v24  ;;  %v1203_v24 = vrot.slane %v3237_v25, 2 }
  0x5e   : > { %2626 = vmatmul.mubr.bf16.vlgmr.msra.gmra.mxu1 %v822_v26  ;;  %2646 = vmatpush3.bf16.msra.mxu0 %v2909_v23  ;;  %v1019_v23 = vshll.u32 %v3263_v34, 16  ;;  %v2934_v26 = vld [vmem:[%s3642_s1 + $0x1f0] sm:$0xff]  }
  0x5f   : > { %2647 = vmatprep.subr.bf16.mxu0 %v2989_v7  ;;  %2593 = vmatprep.mubr.msk.bf16.mxu0 %vm2990_vm0, %v2989_v7  ;;  %v1204_v25 = vsel %vm1199_vm4, %v1201_v12, %v1203_v24  ;;  %v1206_v34 = vsel %vm1199_vm4, %v1203_v24, %v1205_v36  ;;  %v3466_v24 = vld [vmem:[#allocation2 + $0x20] sm:$0xff]  }
  0x60   : > { %2629 = vmatprep.mubr.msk.bf16.mxu1 %vm2990_vm0, %v2989_v7  ;;  %2682 = vmatpush3.bf16.msra.mxu1 %v2912_v22  ;;  %v1014_v22 = vsel %vm988_vm3, %v1004_v8, %v1013_v20  ;;  %v1021_v29 = vrot.slane %v1019_v23, 2 }
  0x61   : > { %2683 = vmatprep.subr.bf16.mxu1 %v2989_v7 }
  0x62   : > { %2648 = vmatpush3.bf16.msra.mxu0 %v2910_v27  ;;  %v2933_v27 = vld [vmem:[%s3642_s1 + $0x1a8] sm:$0xff]  }
  0x63   : > { %2649 = vmatprep.subr.bf16.mxu0 %v2989_v7 }
  0x64   : > { %2684 = vmatpush3.bf16.msra.mxu1 %v2914_v30  ;;  %v2936_v30 = vld [vmem:[%s3642_s1 + $0x1e8] sm:$0xff]  }
  0x65   : > { %2594 = vmatmul.mubr.bf16.gmra.mxu0 %v621_v31  ;;  %2685 = vmatprep.subr.bf16.mxu1 %v2989_v7  ;;  %v1022_v31 = vor.u32 %v1021_v29, %v1018_v28  ;;  %v1599_v28 = vshrl.u32 %v3466_v24, 16  ;;  %v1602_v29 = vshll.u32 %v3466_v24, 16 }
  0x66   : > { %2630 = vmatmul.mubr.bf16.gmra.mxu1 %v824_v33  ;;  %2650 = vmatpush3.bf16.msra.mxu0 %v2913_v32  ;;  %v2935_v32 = vld [vmem:[%s3642_s1 + $0x1a0] sm:$0xff]   ;;  %v1025_v33 = vshrl.u32 %v3289_v43, 16 }
  0x67   : > { %2597 = vmatprep.mubr.msk.bf16.mxu0 %vm2990_vm0, %v2989_v7  ;;  %2633 = vmatprep.mubr.msk.bf16.mxu1 %vm2990_vm0, %v2989_v7  ;;  %v1023_v38 = vsel %vm988_vm3, %v1013_v20, %v1022_v31 }
  0x68   : > { %2651 = vmatprep.subr.bf16.mxu0 %v2989_v7  ;;  %2686 = vmatpush3.bf16.msra.mxu1 %v2917_v35  ;;  %v1028_v35 = vshll.u32 %v3289_v43, 16 }
  0x69   : > { %2687 = vmatprep.subr.bf16.mxu1 %v2989_v7 }
  0x6a   : > { %2652 = vmatpush3.bf16.msra.mxu0 %v2916_v37  ;;  %v2938_v37 = vld [vmem:[%s3642_s1 + $0x1e0] sm:$0xff]  }
  0x6b   : > { %2653 = vmatprep.subr.bf16.mxu0 %v2989_v7 }
  0x6c   : > { %2688 = vmatpush3.bf16.msra.mxu1 %v2919_v39  ;;  %v2937_v39 = vld [vmem:[%s3642_s1 + $0x198] sm:$0xff]  }
  0x6d   : > { %2598 = vmatmul.mubr.bf16.gmra.mxu0 %v623_v40  ;;  %2689 = vmatprep.subr.bf16.mxu1 %v2989_v7  ;;  %v1027_v40 = vrot.slane %v1025_v33, 1  ;;  %v1604_v33 = vrot.slane %v1602_v29, 3 }
  0x6e   : > { %2634 = vmatmul.mubr.bf16.gmra.mxu1 %v826_v42  ;;  %2654 = vmatpush3.bf16.msra.mxu0 %v2918_v41  ;;  %v1030_v41 = vrot.slane %v1028_v35, 2  ;;  %v2943_v42 = vld [vmem:[#allocation2 + $0x2c] ss:$0 sps:$4 sm:$0x33]  }
  0x6f   : > { %2601 = vmatprep.mubr.msk.bf16.mxu0 %vm2990_vm0, %v2989_v7  ;;  %2637 = vmatprep.mubr.msk.bf16.mxu1 %vm2990_vm0, %v2989_v7  ;;  %v1034_v47 = vshrl.u32 %v2943_v42, 16  ;;  %v3486_v35 = vld [vmem:[#allocation2 + $0x28] sm:$0xff]  }
  0x70   : > { %2655 = vmatprep.subr.bf16.mxu0 %v2989_v7  ;;  %2690 = vmatpush3.bf16.msra.mxu1 %v2921_v44  ;;  %v2939_v44 = vld [vmem:[%s3642_s1 + $0x1d8] sm:$0xff]   ;;  %v1031_v45 = vor.u32 %v1030_v41, %v1027_v40  ;;  %v1611_v40 = vshll.u32 %v3486_v35, 16 }
  0x71   : > { %2691 = vmatprep.subr.bf16.mxu1 %v2989_v7  ;;  %v1036_v54 = vrot.slane %v1034_v47, 1  ;;  %v1410_v47 = vrot.slane %v3486_v35, 2 }
  0x72   : > { %2656 = vmatpush3.bf16.msra.mxu0 %v2922_v46  ;;  %v2940_v46 = vld [vmem:[%s3642_s1 + $0x190] sm:$0xff]  }
  0x73   : > { %2657 = vmatprep.subr.bf16.mxu0 %v2989_v7 }
  0x74   : > { %2692 = vmatpush3.bf16.msra.mxu1 %v2923_v48  ;;  %v1037_v48 = vshll.u32 %v2943_v42, 16 }
  0x75   : > { %2602 = vmatmul.mubr.bf16.gmra.mxu0 %v625_v49  ;;  %2693 = vmatprep.subr.bf16.mxu1 %v2989_v7  ;;  %v1207_v49 = vrot.slane %v3289_v43, 2  ;;  %v2942_v43 = vld [vmem:[%s3642_s1 + $0x188] sm:$0xff]  }
  0x76   : > { %2638 = vmatmul.mubr.bf16.gmra.mxu1 %v828_v50  ;;  %2605 = vmatprep.mubr.msk.bf16.mxu0 %vm2990_vm0, %v2989_v7  ;;  %v2941_v50 = vld [vmem:[%s3642_s1 + $0x1d0] sm:$0xff]   ;;  %v1039_v55 = vrot.slane %v1037_v48, 2 }
  0x77   : > { %2641 = vmatprep.mubr.msk.bf16.mxu1 %vm2990_vm0, %v2989_v7  ;;  %2658 = vmatpush3.bf16.msra.mxu0 %v2924_v51  ;;  %v1347_v51 = vld [vmem:[#allocation2 + $0x8] sm:$0xc]  ;;  %v1208_v56 = vsel %vm1199_vm4, %v1205_v36, %v1207_v49  ;;  %v1408_v36 = vrot.slane %v3466_v24, 2  ;;  %v2957_v48 = vld [vmem:[%s3642_s1 + $0x210] sm:$0xff]  }
  0x78   : > { %2694 = vmatpush3.bf16.msra.mxu1 %v2926_v53  ;;  %2659 = vmatprep.subr.bf16.mxu0 %v2989_v7  ;;  %v1032_v53 = vsel %vm988_vm3, %v1022_v31, %v1031_v45  ;;  %v2266_v57 = vcombine.low %v1347_v51, %v3418_v52 }
  0x79   : > { %2695 = vmatprep.subr.bf16.mxu1 %v2989_v7 }
  0x7a   : > { %v1576_v0 = vshll.u32 %v2266_v57, 16  ;;  %v1403_v12 = vrot.slane %v2266_v57, 2 }
  0x7b   : > { %2660 = vmatpush3.bf16.msra.mxu0 %v2927_v60  ;;  %v1040_v60 = vor.u32 %v1039_v55, %v1036_v54  ;;  %v2959_v54 = vld [vmem:[#allocation2 + $0x30] ss:$0 sps:$4 sm:$0x33]  }
  0x7c   : > { %2696 = vmatpush3.bf16.msra.mxu1 %v2928_v61  ;;  %2717 = vmatprep.subr.bf16.mxu0 %v2989_v7  ;;  %v1209_v61 = vrot.slane %v2943_v42, 2  ;;  %v1578_v8 = vrot.slane %v1576_v0, 3  ;;  %v2955_v42 = vld [vmem:[%s3642_s1 + $0x218] sm:$0xff]  }
  0x7d   : > { %2606 = vmatmul.mubr.bf16.gmra.mxu0 %v627_v63  ;;  %2753 = vmatprep.subr.bf16.mxu1 %v2989_v7  ;;  %v1573_v63 = vshrl.u32 %v2266_v57, 16 }
  0x7e   : > { %2642 = vmatmul.mubr.bf16.gmra.mxu1 %v830_v4  ;;  %2661 = vmatprep.mubr.msk.bf16.mxu0 %vm2990_vm0, %v2989_v7  ;;  %v1041_v4 = vsel %vm988_vm3, %v1031_v45, %v1040_v60  ;;  %v1210_v5 = vsel %vm1199_vm4, %v1207_v49, %v1209_v61  ;;  %v1613_v45 = vrot.slane %v1611_v40, 3  ;;  %v2961_v61 = vld [vmem:[%s3642_s1 + $0x200] sm:$0xff]  }
  0x7f   : > { %2697 = vmatprep.mubr.msk.bf16.mxu1 %vm2990_vm0, %v2989_v7  ;;  %v1575_v6 = vrot.slane %v1573_v63, 2 }
  0x85   : > { %2662 = vmatmul.mubr.bf16.vlgmr.msra.gmra.mxu0 %v1005_v13  ;;  %v1404_v13 = vrot.slane %v3428_v58, 2 }
  0x86   : > { %2698 = vmatmul.mubr.bf16.vlgmr.msra.gmra.mxu1 %v1202_v18  ;;  %2718 = vmatpush3.bf16.msra.mxu0 %v2930_v14  ;;  %v1579_v14 = vor.u32 %v1578_v8, %v1575_v6  ;;  %v1593_v18 = vshll.u32 %v3450_v11, 16  ;;  %v1786_v8 = vrot.slane %v3450_v11, 3 }
  0x87   : > { %2719 = vmatprep.subr.bf16.mxu0 %v2989_v7  ;;  %2665 = vmatprep.mubr.msk.bf16.mxu0 %vm2990_vm0, %v2989_v7 }
  0x88   : > { %2701 = vmatprep.mubr.msk.bf16.mxu1 %vm2990_vm0, %v2989_v7  ;;  %2754 = vmatpush3.bf16.msra.mxu1 %v2932_v19  ;;  %v1405_v19 = vsel %vm1199_vm4, %v1403_v12, %v1404_v13  ;;  %v1588_v20 = vsel %vm1571_vm5, %v1579_v14, %v1587_v15  ;;  %v1595_v23 = vrot.slane %v1593_v18, 3 }
  0x89   : > { %2755 = vmatprep.subr.bf16.mxu1 %v2989_v7 }
  0x8a   : > { %2720 = vmatpush3.bf16.msra.mxu0 %v2931_v17  ;;  %v2949_v17 = vld [vmem:[%s3642_s1 + $0x238] sm:$0xff]  }
  0x8b   : > { %2721 = vmatprep.subr.bf16.mxu0 %v2989_v7 }
  0x8c   : > { %2756 = vmatpush3.bf16.msra.mxu1 %v2934_v26  ;;  %v2950_v26 = vld [vmem:[%s3642_s1 + $0x230] sm:$0xff]  }
  0x8d   : > { %2666 = vmatmul.mubr.bf16.gmra.mxu0 %v1014_v22  ;;  %2757 = vmatprep.subr.bf16.mxu1 %v2989_v7  ;;  %v1406_v22 = vrot.slane %v3450_v11, 2 }
  0x8e   : > { %2702 = vmatmul.mubr.bf16.gmra.mxu1 %v1204_v25  ;;  %2722 = vmatpush3.bf16.msra.mxu0 %v2933_v27  ;;  %v1596_v27 = vor.u32 %v1595_v23, %v1592_v21 }
  0x8f   : > { %2669 = vmatprep.mubr.msk.bf16.mxu0 %vm2990_vm0, %v2989_v7  ;;  %2705 = vmatprep.mubr.msk.bf16.mxu1 %vm2990_vm0, %v2989_v7  ;;  %v1407_v25 = vsel %vm1199_vm4, %v1404_v13, %v1406_v22  ;;  %v1409_v41 = vsel %vm1199_vm4, %v1406_v22, %v1408_v36 }
  0x90   : > { %2723 = vmatprep.subr.bf16.mxu0 %v2989_v7  ;;  %2758 = vmatpush3.bf16.msra.mxu1 %v2936_v30  ;;  %v2952_v30 = vld [vmem:[%s3642_s1 + $0x228] sm:$0xff]   ;;  %v1597_v31 = vsel %vm1571_vm5, %v1587_v15, %v1596_v27 }
  0x91   : > { %2759 = vmatprep.subr.bf16.mxu1 %v2989_v7 }
  0x92   : > { %2724 = vmatpush3.bf16.msra.mxu0 %v2935_v32  ;;  %v1601_v32 = vrot.slane %v1599_v28, 2 }
  0x93   : > { %2725 = vmatprep.subr.bf16.mxu0 %v2989_v7 }
  0x94   : > { %2760 = vmatpush3.bf16.msra.mxu1 %v2938_v37  ;;  %v2954_v37 = vld [vmem:[%s3642_s1 + $0x220] sm:$0xff]  }
  0x95   : > { %2670 = vmatmul.mubr.bf16.gmra.mxu0 %v1023_v38  ;;  %2761 = vmatprep.subr.bf16.mxu1 %v2989_v7  ;;  %v1605_v38 = vor.u32 %v1604_v33, %v1601_v32 }
  0x96   : > { %2706 = vmatmul.mubr.bf16.gmra.mxu1 %v1206_v34  ;;  %2726 = vmatpush3.bf16.msra.mxu0 %v2937_v39  ;;  %v1608_v39 = vshrl.u32 %v3486_v35, 16 }
  0x97   : > { %2673 = vmatprep.mubr.msk.bf16.mxu0 %vm2990_vm0, %v2989_v7  ;;  %2709 = vmatprep.mubr.msk.bf16.mxu1 %vm2990_vm0, %v2989_v7  ;;  %v1606_v34 = vsel %vm1571_vm5, %v1596_v27, %v1605_v38 }
  0x98   : > { %2727 = vmatprep.subr.bf16.mxu0 %v2989_v7  ;;  %2762 = vmatpush3.bf16.msra.mxu1 %v2939_v44  ;;  %v1610_v44 = vrot.slane %v1608_v39, 2 }
  0x99   : > { %2763 = vmatprep.subr.bf16.mxu1 %v2989_v7 }
  0x9a   : > { %2728 = vmatpush3.bf16.msra.mxu0 %v2940_v46  ;;  %v3507_v46 = vld [vmem:[#allocation2 + $0x30] ss:$0 sps:$4 sm:$0x77]   ;;  %v1614_v49 = vor.u32 %v1613_v45, %v1610_v44 }
  0x9b   : > { %2729 = vmatprep.subr.bf16.mxu0 %v2989_v7  ;;  %v1620_v51 = vshll.u32 %v3507_v46, 16 }
  0x9c   : > { %2764 = vmatpush3.bf16.msra.mxu1 %v2941_v50  ;;  %v1617_v50 = vshrl.u32 %v3507_v46, 16  ;;  %v1615_v55 = vsel %vm1571_vm5, %v1605_v38, %v1614_v49 }
  0x9d   : > { %2674 = vmatmul.mubr.bf16.gmra.mxu0 %v1032_v53  ;;  %2765 = vmatprep.subr.bf16.mxu1 %v2989_v7  ;;  %v1411_v53 = vsel %vm1199_vm4, %v1408_v36, %v1410_v47  ;;  %v1622_v57 = vrot.slane %v1620_v51, 3 }
  0x9e   : > { %2710 = vmatmul.mubr.bf16.gmra.mxu1 %v1208_v56  ;;  %2677 = vmatprep.mubr.msk.bf16.mxu0 %vm2990_vm0, %v2989_v7  ;;  %v2958_v56 = vld [vmem:[%s3642_s1 + $0x208] sm:$0xff]  }
  0x9f   : > { %2713 = vmatprep.mubr.msk.bf16.mxu1 %vm2990_vm0, %v2989_v7  ;;  %2730 = vmatpush3.bf16.msra.mxu0 %v2942_v43  ;;  %v1619_v43 = vrot.slane %v1617_v50, 2 }
  0xa0   : > { %2766 = vmatpush3.bf16.msra.mxu1 %v2944_v59  ;;  %2731 = vmatprep.subr.bf16.mxu0 %v2989_v7  ;;  %v1412_v59 = vrot.slane %v2959_v54, 2 }
  0xa1   : > { %2767 = vmatprep.subr.bf16.mxu1 %v2989_v7  ;;  %v1623_v60 = vor.u32 %v1622_v57, %v1619_v43 }
  0xa2   : > { %v1413_v63 = vsel %vm1199_vm4, %v1410_v47, %v1412_v59 }
  0xa3   : > { %2732 = vmatpush3.bf16.msra.mxu0 %v2945_v62  ;;  %v1761_v62 = vld [vmem:[#allocation2 + $0x8] sm:$0x8]  ;;  %v1624_v1 = vsel %vm1571_vm5, %v1614_v49, %v1623_v60 }
  0xa4   : > { %2768 = vmatpush3.bf16.msra.mxu1 %v2946_v3  ;;  %2789 = vmatprep.subr.bf16.mxu0 %v2989_v7  ;;  %v2321_v0 = vcombine.low %v1761_v62, %v3418_v52  ;;  %v1784_v3 = vrot.slane %v3428_v58, 3  ;;  %v1790_v52 = vrot.slane %v3486_v35, 3  ;;  %v1792_v58 = vrot.slane %v3507_v46, 3 }
  0xa5   : > { %2678 = vmatmul.mubr.bf16.gmra.mxu0 %v1041_v4  ;;  %2825 = vmatprep.subr.bf16.mxu1 %v2989_v7  ;;  %v1788_v4 = vrot.slane %v3466_v24, 3 }
  0xa6   : > { %2714 = vmatmul.mubr.bf16.gmra.mxu1 %v1210_v5  ;;  %2733 = vmatprep.mubr.msk.bf16.mxu0 %vm2990_vm0, %v2989_v7  ;;  %v1783_v2 = vrot.slane %v2321_v0, 3  ;;  %v1787_v9 = vsel %vm1782_vm6, %v1784_v3, %v1786_v8  ;;  %v1793_v10 = vsel %vm1782_vm6, %v1790_v52, %v1792_v58 }
  0xa7   : > { %2769 = vmatprep.mubr.msk.bf16.mxu1 %vm2990_vm0, %v2989_v7  ;;  %v1791_v6 = vsel %vm1782_vm6, %v1788_v4, %v1790_v52  ;;  %v1789_v12 = vsel %vm1782_vm6, %v1786_v8, %v1788_v4 }
  0xa8   : > { %v1785_v5 = vsel %vm1782_vm6, %v1783_v2, %v1784_v3 }
  0xad   : > { %2734 = vmatmul.mubr.bf16.vlgmr.msra.gmra.mxu0 %v1405_v19 }
  0xae   : > { %2770 = vmatmul.mubr.bf16.vlgmr.msra.gmra.mxu1 %v1588_v20  ;;  %2790 = vmatpush3.bf16.msra.mxu0 %v2949_v17 }
  0xaf   : > { %2791 = vmatprep.subr.bf16.mxu0 %v2989_v7  ;;  %2737 = vmatprep.mubr.msk.bf16.mxu0 %vm2990_vm0, %v2989_v7 }
  0xb0   : > { %2773 = vmatprep.mubr.msk.bf16.mxu1 %vm2990_vm0, %v2989_v7  ;;  %2833 = vmatpush3.bf16.msra.mxu1 %v2949_v17 }
  0xb1   : > { %2826 = vmatprep.subr.bf16.mxu1 %v2989_v7 }
  0xb2   : > { %2792 = vmatpush3.bf16.msra.mxu0 %v2950_v26 }
  0xb3   : > { %2793 = vmatprep.subr.bf16.mxu0 %v2989_v7 }
  0xb4   : > { %2834 = vmatpush3.bf16.msra.mxu1 %v2950_v26 }
  0xb5   : > { %2738 = vmatmul.mubr.bf16.gmra.mxu0 %v1407_v25  ;;  %2827 = vmatprep.subr.bf16.mxu1 %v2989_v7 }
  0xb6   : > { %2774 = vmatmul.mubr.bf16.gmra.mxu1 %v1597_v31  ;;  %2794 = vmatpush3.bf16.msra.mxu0 %v2952_v30 }
  0xb7   : > { %2741 = vmatprep.mubr.msk.bf16.mxu0 %vm2990_vm0, %v2989_v7  ;;  %2777 = vmatprep.mubr.msk.bf16.mxu1 %vm2990_vm0, %v2989_v7 }
  0xb8   : > { %2795 = vmatprep.subr.bf16.mxu0 %v2989_v7  ;;  %2835 = vmatpush3.bf16.msra.mxu1 %v2952_v30 }
  0xb9   : > { %2828 = vmatprep.subr.bf16.mxu1 %v2989_v7 }
  0xba   : > { %2796 = vmatpush3.bf16.msra.mxu0 %v2954_v37 }
  0xbb   : > { %2797 = vmatprep.subr.bf16.mxu0 %v2989_v7 }
  0xbc   : > { %2836 = vmatpush3.bf16.msra.mxu1 %v2954_v37 }
  0xbd   : > { %2742 = vmatmul.mubr.bf16.gmra.mxu0 %v1409_v41  ;;  %2829 = vmatprep.subr.bf16.mxu1 %v2989_v7 }
  0xbe   : > { %2778 = vmatmul.mubr.bf16.gmra.mxu1 %v1606_v34  ;;  %2798 = vmatpush3.bf16.msra.mxu0 %v2955_v42 }
  0xbf   : > { %2745 = vmatprep.mubr.msk.bf16.mxu0 %vm2990_vm0, %v2989_v7  ;;  %2781 = vmatprep.mubr.msk.bf16.mxu1 %vm2990_vm0, %v2989_v7 }
  0xc0   : > { %2837 = vmatpush3.bf16.msra.mxu1 %v2955_v42  ;;  %2799 = vmatprep.subr.bf16.mxu0 %v2989_v7 }
  0xc1   : > { %2830 = vmatprep.subr.bf16.mxu1 %v2989_v7 }
  0xc2   : > { %2800 = vmatpush3.bf16.msra.mxu0 %v2957_v48 }
  0xc3   : > { %2801 = vmatprep.subr.bf16.mxu0 %v2989_v7 }
  0xc4   : > { %2838 = vmatpush3.bf16.msra.mxu1 %v2957_v48 }
  0xc5   : > { %2746 = vmatmul.mubr.bf16.gmra.mxu0 %v1411_v53  ;;  %2831 = vmatprep.subr.bf16.mxu1 %v2989_v7 }
  0xc6   : > { %2782 = vmatmul.mubr.bf16.gmra.mxu1 %v1615_v55  ;;  %2749 = vmatprep.mubr.msk.bf16.mxu0 %vm2990_vm0, %v2989_v7 }
  0xc7   : > { %2785 = vmatprep.mubr.msk.bf16.mxu1 %vm2990_vm0, %v2989_v7  ;;  %2802 = vmatpush3.bf16.msra.mxu0 %v2958_v56 }
  0xc8   : > { %2839 = vmatpush3.bf16.msra.mxu1 %v2958_v56  ;;  %2803 = vmatprep.subr.bf16.mxu0 %v2989_v7 }
  0xc9   : > { %2832 = vmatprep.subr.bf16.mxu1 %v2989_v7 }
  0xcb   : > { %2804 = vmatpush3.bf16.msra.mxu0 %v2961_v61 }
  0xcc   : > { %2840 = vmatpush3.bf16.msra.mxu1 %v2961_v61 }
  0xcd   : > { %2750 = vmatmul.mubr.bf16.gmra.mxu0 %v1413_v63 }
  0xce   : > { %2786 = vmatmul.mubr.bf16.gmra.mxu1 %v1624_v1  ;;  %2805 = vmatprep.mubr.msk.bf16.mxu0 %vm2990_vm0, %v2989_v7 }
  0xcf   : > { %2817 = vmatprep.mubr.msk.bf16.mxu1 %vm2990_vm0, %v2989_v7 }
  0xd5   : > { %2806 = vmatmul.mubr.bf16.vlgmr.msra.gmra.mxu0 %v1785_v5 }
  0xd6   : > { %2818 = vmatmul.mubr.bf16.vlgmr.msra.gmra.mxu1 %v1791_v6  ;;  %2809 = vmatprep.mubr.msk.bf16.mxu0 %vm2990_vm0, %v2989_v7 }
  0xd7   : > { %2821 = vmatprep.mubr.msk.bf16.mxu1 %vm2990_vm0, %v2989_v7 }
  0xdd   : > { %2810 = vmatmul.mubr.bf16.gmra.mxu0 %v1787_v9 }
  0xde   : > { %2822 = vmatmul.mubr.bf16.gmra.mxu1 %v1793_v10  ;;  %2813 = vmatprep.mubr.msk.bf16.mxu0 %vm2990_vm0, %v2989_v7 }
  0xe5   : > { %2814 = vmatmul.mubr.bf16.gmra.mxu0 %v1789_v12 }
  0xf5   : > { %v430_v13 = vpop.f32.mrf.mxu0  ;;  %v556_v14 = vpop.f32.mrf.mxu1 }
  0xf6   : > { %v557_v11 = vadd.f32 %v556_v14, %v430_v13 }
  0xf7   : > { %v2519_v15 = vpop.f32.mrf.mxu0  ;;  %v2555_v16 = vpop.f32.mrf.mxu1 }
  0xf9   : > { %v433_v18 = vpop.f32.mrf.mxu0  ;;  %v559_v19 = vpop.f32.mrf.mxu1 }
  0xfa   : > { %v560_v17 = vadd.f32 %v559_v19, %v433_v18 }
  0xfb   : > { %v2520_v20 = vpop.f32.mrf.mxu0  ;;  %v2556_v21 = vpop.f32.mrf.mxu1 }
  0xfd   : > { %v438_v23 = vpop.f32.mrf.mxu0 }
  0xfe   : > { %v564_v24 = vpop.f32.mrf.mxu1 }
  0xff   : > { %v565_v26 = vadd.f32 %v564_v24, %v438_v23  ;;  %v2523_v22 = vpop.f32.mrf.mxu0 }
 0x100   : > { %v2559_v27 = vpop.f32.mrf.mxu1 }
 0x101   : > { %v441_v28 = vpop.f32.mrf.mxu0 }
 0x102   : > { %v567_v7 = vpop.f32.mrf.mxu1 }
 0x103   : > { %v568_v29 = vadd.f32 %v567_v7, %v441_v28  ;;  %v2524_v25 = vpop.f32.mrf.mxu0 }
 0x104   : > { %v2560_v30 = vpop.f32.mrf.mxu1 }
 0x105   : > { %v446_v31 = vpop.f32.mrf.mxu0 }
 0x106   : > { %v572_v32 = vpop.f32.mrf.mxu1 }
 0x107   : > { %v573_v33 = vadd.f32 %v572_v32, %v446_v31  ;;  %v2527_v35 = vpop.f32.mrf.mxu0 }
 0x108   : > { %v2563_v36 = vpop.f32.mrf.mxu1 }
 0x109   : > { %v449_v37 = vpop.f32.mrf.mxu0 }
 0x10a   : > { %v575_v38 = vpop.f32.mrf.mxu1 }
 0x10b   : > { %v576_v39 = vadd.f32 %v575_v38, %v449_v37  ;;  %v2528_v40 = vpop.f32.mrf.mxu0 }
 0x10c   : > { %v2564_v41 = vpop.f32.mrf.mxu1 }
 0x10d   : > { %v454_v42 = vpop.f32.mrf.mxu0 }
 0x10e   : > { %v580_v34 = vpop.f32.mrf.mxu1 }
 0x10f   : > { %v581_v44 = vadd.f32 %v580_v34, %v454_v42  ;;  %v2531_v45 = vpop.f32.mrf.mxu0 }
 0x110   : > { %v2567_v46 = vpop.f32.mrf.mxu1 }
 0x111   : > { %v457_v47 = vpop.f32.mrf.mxu0 }
 0x112   : > { %v583_v48 = vpop.f32.mrf.mxu1 }
 0x113   : > { %v584_v49 = vadd.f32 %v583_v48, %v457_v47  ;;  %v2532_v50 = vpop.f32.mrf.mxu0 }
 0x114   : > { %v2568_v51 = vpop.f32.mrf.mxu1 }
 0x115   : > { %v462_v53 = vpop.f32.mrf.mxu0 }
 0x116   : > { %v588_v54 = vpop.f32.mrf.mxu1 }
 0x117   : > { %v589_v55 = vadd.f32 %v588_v54, %v462_v53  ;;  %v2535_v56 = vpop.f32.mrf.mxu0 }
 0x118   : > { %v2571_v43 = vpop.f32.mrf.mxu1 }
 0x119   : > { %v465_v57 = vpop.f32.mrf.mxu0 }
 0x11a   : > { %v591_v59 = vpop.f32.mrf.mxu1 }
 0x11b   : > { %v592_v60 = vadd.f32 %v591_v59, %v465_v57  ;;  %v2536_v61 = vpop.f32.mrf.mxu0 }
 0x11c   : > { %v2572_v62 = vpop.f32.mrf.mxu1 }
 0x11d   : > { %v715_v63 = vpop.f32.mrf.mxu0 }
 0x11e   : > { %v754_v0 = vadd.f32 %v715_v63, %v557_v11  ;;  %v918_v1 = vpop.f32.mrf.mxu1 }
 0x11f   : > { %v2591_v2 = vpop.f32.mrf.mxu0 }
 0x120   : > { %v957_v3 = vadd.f32 %v918_v1, %v754_v0  ;;  %v2627_v4 = vpop.f32.mrf.mxu1 }
 0x121   : > { %v718_v52 = vpop.f32.mrf.mxu0 }
 0x122   : > { %v755_v5 = vadd.f32 %v718_v52, %v560_v17  ;;  %v921_v6 = vpop.f32.mrf.mxu1 }
 0x123   : > { %v2592_v8 = vpop.f32.mrf.mxu0 }
 0x124   : > { %v958_v58 = vadd.f32 %v921_v6, %v755_v5  ;;  %v2628_v9 = vpop.f32.mrf.mxu1 }
 0x125   : > { %v723_v10 = vpop.f32.mrf.mxu0 }
 0x126   : > { %v756_v12 = vadd.f32 %v723_v10, %v565_v26  ;;  %v926_v13 = vpop.f32.mrf.mxu1 }
 0x127   : > { %v2595_v14 = vpop.f32.mrf.mxu0 }
 0x128   : > { %v959_v15 = vadd.f32 %v926_v13, %v756_v12  ;;  %v2631_v16 = vpop.f32.mrf.mxu1 }
 0x129   : > { %v726_v18 = vpop.f32.mrf.mxu0 }
 0x12a   : > { %v757_v19 = vadd.f32 %v726_v18, %v568_v29  ;;  %v929_v20 = vpop.f32.mrf.mxu1 }
 0x12b   : > { %v2596_v11 = vpop.f32.mrf.mxu0 }
 0x12c   : > { %v960_v21 = vadd.f32 %v929_v20, %v757_v19  ;;  %v2632_v23 = vpop.f32.mrf.mxu1 }
 0x12d   : > { %v731_v24 = vpop.f32.mrf.mxu0 }
 0x12e   : > { %v758_v22 = vadd.f32 %v731_v24, %v573_v33  ;;  %v934_v27 = vpop.f32.mrf.mxu1 }
 0x12f   : > { %v2599_v17 = vpop.f32.mrf.mxu0 }
 0x130   : > { %v961_v28 = vadd.f32 %v934_v27, %v758_v22  ;;  %v2635_v7 = vpop.f32.mrf.mxu1 }
 0x131   : > { %v734_v25 = vpop.f32.mrf.mxu0 }
 0x132   : > { %v759_v30 = vadd.f32 %v734_v25, %v576_v39  ;;  %v937_v31 = vpop.f32.mrf.mxu1 }
 0x133   : > { %v2600_v26 = vpop.f32.mrf.mxu0 }
 0x134   : > { %v962_v32 = vadd.f32 %v937_v31, %v759_v30  ;;  %v2636_v35 = vpop.f32.mrf.mxu1 }
 0x135   : > { %v739_v36 = vpop.f32.mrf.mxu0 }
 0x136   : > { %v760_v37 = vadd.f32 %v739_v36, %v581_v44  ;;  %v942_v38 = vpop.f32.mrf.mxu1 }
 0x137   : > { %v2603_v29 = vpop.f32.mrf.mxu0 }
 0x138   : > { %v3561_v40 = vadd.f32 %v942_v38, %v760_v37  ;;  %v2639_v41 = vpop.f32.mrf.mxu1 }
 0x139   : > { %v742_v42 = vpop.f32.mrf.mxu0 }
 0x13a   : > { %v761_v34 = vadd.f32 %v742_v42, %v584_v49  ;;  %v945_v33 = vpop.f32.mrf.mxu1 }
 0x13b   : > { %v2604_v45 = vpop.f32.mrf.mxu0 }
 0x13c   : > { %v3563_v46 = vadd.f32 %v945_v33, %v761_v34  ;;  %v2640_v47 = vpop.f32.mrf.mxu1 }
 0x13d   : > { %v747_v48 = vpop.f32.mrf.mxu0 }
 0x13e   : > { %v762_v39 = vadd.f32 %v747_v48, %v589_v55  ;;  %v950_v50 = vpop.f32.mrf.mxu1 }
 0x13f   : > { %v2607_v51 = vpop.f32.mrf.mxu0 }
 0x140   : > { %v3565_v53 = vadd.f32 %v950_v50, %v762_v39  ;;  %v2643_v54 = vpop.f32.mrf.mxu1 }
 0x141   : > { %v750_v44 = vpop.f32.mrf.mxu0 }
 0x142   : > { %v763_v56 = vadd.f32 %v750_v44, %v592_v60  ;;  %v953_v43 = vpop.f32.mrf.mxu1 }
 0x143   : > { %v2608_v57 = vpop.f32.mrf.mxu0 }
 0x144   : > { %v3567_v59 = vadd.f32 %v953_v43, %v763_v56  ;;  %v2644_v61 = vpop.f32.mrf.mxu1 }
 0x145   : > { %v1129_v49 = vpop.f32.mrf.mxu0 }
 0x146   : > { %v1168_v62 = vadd.f32 %v1129_v49, %v957_v3  ;;  %v1298_v63 = vpop.f32.mrf.mxu1 }
 0x147   : > { %v2663_v0 = vpop.f32.mrf.mxu0 }
 0x148   : > { %v3569_v1 = vadd.f32 %v1298_v63, %v1168_v62  ;;  %v2699_v2 = vpop.f32.mrf.mxu1 }
 0x149   : > { %v1132_v55 = vpop.f32.mrf.mxu0 }
 0x14a   : > { %v1169_v4 = vadd.f32 %v1132_v55, %v958_v58  ;;  %v1301_v52 = vpop.f32.mrf.mxu1 }
 0x14b   : > { %v2664_v5 = vpop.f32.mrf.mxu0 }
 0x14c   : > { %v3571_v6 = vadd.f32 %v1301_v52, %v1169_v4  ;;  %v2700_v8 = vpop.f32.mrf.mxu1 }
 0x14d   : > { %v1137_v60 = vpop.f32.mrf.mxu0 }
 0x14e   : > { %v1170_v9 = vadd.f32 %v1137_v60, %v959_v15  ;;  %v1306_v10 = vpop.f32.mrf.mxu1 }
 0x14f   : > { %v2667_v12 = vpop.f32.mrf.mxu0 }
 0x150   : > { %v3573_v13 = vadd.f32 %v1306_v10, %v1170_v9  ;;  %v2703_v14 = vpop.f32.mrf.mxu1 }
 0x151   : > { %v1140_v3 = vpop.f32.mrf.mxu0 }
 0x152   : > { %v1171_v16 = vadd.f32 %v1140_v3, %v960_v21  ;;  %v1309_v18 = vpop.f32.mrf.mxu1 }
 0x153   : > { %v2668_v19 = vpop.f32.mrf.mxu0 }
 0x154   : > { %v3575_v20 = vadd.f32 %v1309_v18, %v1171_v16  ;;  %v2704_v11 = vpop.f32.mrf.mxu1 }
 0x155   : > { %v1145_v58 = vpop.f32.mrf.mxu0 }
 0x156   : > { %v1172_v23 = vadd.f32 %v1145_v58, %v961_v28  ;;  %v1314_v24 = vpop.f32.mrf.mxu1 }
 0x157   : > { %v2671_v22 = vpop.f32.mrf.mxu0 }
 0x158   : > { %v3577_v27 = vadd.f32 %v1314_v24, %v1172_v23  ;;  %v2707_v17 = vpop.f32.mrf.mxu1 }
 0x159   : > { %v1148_v15 = vpop.f32.mrf.mxu0 }
 0x15a   : > { %v1173_v7 = vadd.f32 %v1148_v15, %v962_v32  ;;  %v1317_v25 = vpop.f32.mrf.mxu1 }
 0x15b   : > { %v2672_v30 = vpop.f32.mrf.mxu0 }
 0x15c   : > { %v3579_v31 = vadd.f32 %v1317_v25, %v1173_v7  ;;  %v2708_v26 = vpop.f32.mrf.mxu1 }
 0x15d   : > { %v1153_v21 = vpop.f32.mrf.mxu0 }
 0x15e   : > { %v1322_v35 = vpop.f32.mrf.mxu1  ;;  %v1174_v24 = vadd.f32 %v1153_v21, %v3561_v40 }
 0x15f   : > { %v2675_v36 = vpop.f32.mrf.mxu0 }
 0x160   : > { %v2711_v37 = vpop.f32.mrf.mxu1  ;;  %v1343_v25 = vadd.f32 %v1322_v35, %v1174_v24 }
 0x161   : > { %v1156_v38 = vpop.f32.mrf.mxu0 }
 0x162   : > { %v1325_v29 = vpop.f32.mrf.mxu1  ;;  %v1175_v30 = vadd.f32 %v1156_v38, %v3563_v46 }
 0x163   : > { %v2676_v41 = vpop.f32.mrf.mxu0 }
 0x164   : > { %v2712_v28 = vpop.f32.mrf.mxu1 }
 0x165   : > { %v1161_v42 = vpop.f32.mrf.mxu0 }
 0x166   : > { %v1330_v34 = vpop.f32.mrf.mxu1 }
 0x167   : > { %v2679_v33 = vpop.f32.mrf.mxu0 }
 0x168   : > { %v2715_v45 = vpop.f32.mrf.mxu1 }
 0x169   : > { %v1164_v47 = vpop.f32.mrf.mxu0  ;;  %v1344_v45 = vadd.f32 %v1325_v29, %v1175_v30 }
 0x16a   : > { %v3581_v48 = vpop.f32.mrf.mxu1 }
 0x16b   : > { %v2680_v32 = vpop.f32.mrf.mxu0 }
 0x16c   : > { %v2716_v39 = vpop.f32.mrf.mxu1  ;;  %v1176_v32 = vadd.f32 %v1161_v42, %v3565_v53 }
 0x16d   : > { %v1501_v50 = vpop.f32.mrf.mxu0 }
 0x16e   : > { %v1712_v51 = vpop.f32.mrf.mxu1  ;;  %v1540_v36 = vadd.f32 %v1501_v50, %v3569_v1  ;;  %v1345_v38 = vadd.f32 %v1330_v34, %v1176_v32  ;;  %v1177_v1 = vadd.f32 %v1164_v47, %v3567_v59  ;;  %v3604_v50 = vld [vmem:[%s3643_s2] ss:$0 sm:$0xff] }
 0x16f   : > { %v2735_v54 = vpop.f32.mrf.mxu0 }
 0x170   : > { %v2771_v44 = vpop.f32.mrf.mxu1  ;;  %v1751_v54 = vadd.f32 %v1712_v51, %v1540_v36  ;;  %v1346_v59 = vadd.f32 %v3581_v48, %v1177_v1 }
 0x171   : > { %v1504_v56 = vpop.f32.mrf.mxu0 }
 0x172   : > { %v1715_v43 = vpop.f32.mrf.mxu1  ;;  %v1541_v40 = vadd.f32 %v1504_v56, %v3571_v6 }
 0x173   : > { %v2736_v57 = vpop.f32.mrf.mxu0 }
 0x174   : > { %v2772_v61 = vpop.f32.mrf.mxu1  ;;  %v1752_v42 = vadd.f32 %v1715_v43, %v1541_v40 }
 0x175   : > { %v1509_v49 = vpop.f32.mrf.mxu0 }
 0x176   : > { %v3583_v62 = vpop.f32.mrf.mxu1  ;;  %v1542_v51 = vadd.f32 %v1509_v49, %v3573_v13 }
 0x177   : > { %v2739_v63 = vpop.f32.mrf.mxu0 }
 0x178   : > { %v2775_v0 = vpop.f32.mrf.mxu1 }
 0x179   : > { %v1512_v2 = vpop.f32.mrf.mxu0 }
 0x17a   : > { %v3585_v55 = vpop.f32.mrf.mxu1  ;;  %v1543_v43 = vadd.f32 %v1512_v2, %v3575_v20 }
 0x17b   : > { %v2740_v4 = vpop.f32.mrf.mxu0 }
 0x17c   : > { %v2776_v52 = vpop.f32.mrf.mxu1  ;;  %v1754_v20 = vadd.f32 %v3585_v55, %v1543_v43 }
 0x17d   : > { %v3587_v5 = vpop.f32.mrf.mxu0 }
 0x17e   : > { %v3589_v8 = vpop.f32.mrf.mxu1  ;;  %v1544_v2 = vadd.f32 %v3587_v5, %v3577_v27 }
 0x17f   : > { %v2743_v60 = vpop.f32.mrf.mxu0 }
 0x180   : > { %v2779_v9 = vpop.f32.mrf.mxu1  ;;  %v1755_v55 = vadd.f32 %v3589_v8, %v1544_v2 }
 0x181   : > { %v3591_v10 = vpop.f32.mrf.mxu0 }
 0x182   : > { %v3593_v12 = vpop.f32.mrf.mxu1  ;;  %v1545_v27 = vadd.f32 %v3591_v10, %v3579_v31 }
 0x183   : > { %v2744_v14 = vpop.f32.mrf.mxu0 }
 0x184   : > { %v2780_v3 = vpop.f32.mrf.mxu1  ;;  %v1753_v14 = vadd.f32 %v3583_v62, %v1542_v51  ;;  %v1756_v8 = vadd.f32 %v3593_v12, %v1545_v27 }
 0x185   : > { %v1525_v16 = vpop.f32.mrf.mxu0 }
 0x186   : > { %v1736_v18 = vpop.f32.mrf.mxu1  ;;  %v1546_v41 = vadd.f32 %v1525_v16, %v1343_v25 }
 0x187   : > { %v2747_v19 = vpop.f32.mrf.mxu0 }
 0x188   : > { %v2783_v11 = vpop.f32.mrf.mxu1  ;;  %v1757_v44 = vadd.f32 %v1736_v18, %v1546_v41 }
 0x189   : > { %v1528_v58 = vpop.f32.mrf.mxu0 }
 0x18a   : > { %v1739_v23 = vpop.f32.mrf.mxu1  ;;  %v1547_v57 = vadd.f32 %v1528_v58, %v1344_v45 }
 0x18b   : > { %v2748_v22 = vpop.f32.mrf.mxu0 }
 0x18c   : > { %v2784_v17 = vpop.f32.mrf.mxu1  ;;  %v1758_v56 = vadd.f32 %v1739_v23, %v1547_v57 }
 0x18d   : > { %v1533_v15 = vpop.f32.mrf.mxu0 }
 0x18e   : > { %v1744_v7 = vpop.f32.mrf.mxu1  ;;  %v1548_v63 = vadd.f32 %v1533_v15, %v1345_v38 }
 0x18f   : > { %v2751_v26 = vpop.f32.mrf.mxu0 }
 0x190   : > { %v2787_v37 = vpop.f32.mrf.mxu1  ;;  %v1759_v3 = vadd.f32 %v1744_v7, %v1548_v63 }
 0x191   : > { %v1536_v28 = vpop.f32.mrf.mxu0 }
 0x192   : > { %v1747_v33 = vpop.f32.mrf.mxu1  ;;  %v1549_v16 = vadd.f32 %v1536_v28, %v1346_v59 }
 0x193   : > { %v2752_v39 = vpop.f32.mrf.mxu0 }
 0x194   : > { %v2788_v21 = vpop.f32.mrf.mxu1  ;;  %v1760_v25 = vadd.f32 %v1747_v33, %v1549_v16 }
 0x195   : > { %v1881_v35 = vpop.f32.mrf.mxu0 }
 0x196   : > { %v1920_v61 = vadd.f32 %v1881_v35, %v1751_v54  ;;  %v1905_v46 = vpop.f32.mrf.mxu1 }
 0x197   : > { %v1926_v29 = vadd.f32 %v1905_v46, %v1757_v44  ;;  %v2807_v53 = vpop.f32.mrf.mxu0 }
 0x198   : > { %v2819_v6 = vpop.f32.mrf.mxu1  ;;  %v1937_v4 = vadd.f32 %v3604_v50, %v1920_v61 }
 0x199   : > { %v1884_v0 = vpop.f32.mrf.mxu0  ;;  %v1943_v47 = vadd.f32 %v3604_v50, %v1926_v29 }
 0x19a   : > { %v1921_v52 = vadd.f32 %v1884_v0, %v1752_v42  ;;  %v1908_v34 = vpop.f32.mrf.mxu1  ;;  %v1947_v11 = vmax.f32 %v1937_v4, 0.0 }
 0x19b   : > { %v1927_v60 = vadd.f32 %v1908_v34, %v1758_v56  ;;  %v2808_v9 = vpop.f32.mrf.mxu0  ;;  %v1953_v24 = vmax.f32 %v1943_v47, 0.0 }
 0x19c   : > { %v1938_v13 = vadd.f32 %v3604_v50, %v1921_v52  ;;  %v2820_v49 = vpop.f32.mrf.mxu1 }
 0x19d   : > { %v1944_v18 = vadd.f32 %v3604_v50, %v1927_v60  ;;  %v1889_v19 = vpop.f32.mrf.mxu0 }
 0x19e   : > { %v1948_v58 = vmax.f32 %v1938_v13, 0.0  ;;  %v1922_v48 = vadd.f32 %v1889_v19, %v1753_v14  ;;  %v1913_v23 = vpop.f32.mrf.mxu1 }
 0x19f   : > { %v1954_v22 = vmax.f32 %v1944_v18, 0.0  ;;  %v1928_v17 = vadd.f32 %v1913_v23, %v1759_v3  ;;  %v2811_v62 = vpop.f32.mrf.mxu0 }
 0x1a0   : > { %v2358_v15 = vpack.c.bf16 %v1948_v58, %v1947_v11  ;;  %v2823_v7 = vpop.f32.mrf.mxu1  ;;  %v1939_v36 = vadd.f32 %v3604_v50, %v1922_v48 }
 0x1a1   : > { %v2373_v30 = vpack.c.bf16 %v1954_v22, %v1953_v24  ;;  %v1892_v26 = vpop.f32.mrf.mxu0  ;;  %v1945_v28 = vadd.f32 %v3604_v50, %v1928_v17 }
 0x1a2   : > { %2359 = vst [vmem:[%s3035_s23] sm:$0xff] %v2358_v15   ;;  %v1923_v37 = vadd.f32 %v1892_v26, %v1754_v20  ;;  %v1916_v41 = vpop.f32.mrf.mxu1  ;;  %v1949_v40 = vmax.f32 %v1939_v36, 0.0 }
 0x1a3   : > { %2382 = vst [vmem:[%s3035_s23 + $0x18] sm:$0xff] %v2373_v30   ;;  %v1929_v45 = vadd.f32 %v1916_v41, %v1760_v25  ;;  %v2812_v32 = vpop.f32.mrf.mxu0  ;;  %v1955_v57 = vmax.f32 %v1945_v28, 0.0 }
 0x1a4   : > { %v1940_v5 = vadd.f32 %v3604_v50, %v1923_v37  ;;  %v2824_v33 = vpop.f32.mrf.mxu1 }
 0x1a5   : > { %v1946_v39 = vadd.f32 %v3604_v50, %v1929_v45  ;;  %v1897_v54 = vpop.f32.mrf.mxu0 }
 0x1a6   : > { %v1950_v21 = vmax.f32 %v1940_v5, 0.0  ;;  %v1924_v44 = vadd.f32 %v1897_v54, %v1755_v55 }
 0x1a7   : > { %v1956_v35 = vmax.f32 %v1946_v39, 0.0  ;;  %v2815_v61 = vpop.f32.mrf.mxu0 }
 0x1a8   : > { %v2363_v46 = vpack.c.bf16 %v1950_v21, %v1949_v40  ;;  %v1941_v31 = vadd.f32 %v3604_v50, %v1924_v44 }
 0x1a9   : > { %v2378_v38 = vpack.c.bf16 %v1956_v35, %v1955_v57  ;;  %v1900_v1 = vpop.f32.mrf.mxu0 }
 0x1aa   : > { %2380 = vst [vmem:[%s3035_s23 + $0x8] sm:$0xff] %v2363_v46   ;;  %v1925_v10 = vadd.f32 %v1900_v1, %v1756_v8  ;;  %v1951_v42 = vmax.f32 %v1941_v31, 0.0 }
 0x1ab   : > { %2383 = vst [vmem:[%s3035_s23 + $0x20] sm:$0xff] %v2378_v38   ;;  %v2816_v29 = vpop.f32.mrf.mxu0 }
 0x1ac   : > { %v1942_v53 = vadd.f32 %v3604_v50, %v1925_v10 }
 0x1ae   : > { %v1952_v51 = vmax.f32 %v1942_v53, 0.0 }
 0x1b0   : > { %v2368_v6 = vpack.c.bf16 %v1952_v51, %v1951_v42 }
 0x1b2   : > { %2381 = vst [vmem:[%s3035_s23 + $0x10] sm:$0xff] %v2368_v6  }
 0x1b3 PF: > { %s13_s14 = sadd.s32 1, %s2987_s14   ;;  %s3645_s12 = smov %s2983_s13 }
 0x1b4   : > { %p10_p5 = scmp.ge.s32.totalorder %s13_s14, 4   ;;  %s3646_s13 = smov %s3648_s15 }
 0x1b6   :  { %12 = sbr.rel (!%p10_p5) target bundleno = 2 (0x2), region = 115 }
 0x1bb   :  { %2037 = vsyncmov [#allocation3] }
 0x1be   :  { %s2038_s5 = vpop.sfrf %2037 }
 0x1bf   :  { %p2343_p6 = scmp.ne.s32.totalorder %s2038_s5, 0 }
 0x1c1   :  { %2042 = shalt.err (%p2343_p6)  }

// kernel: a_call__.7
= control target key start
LH: loop header
LB: loop body
LE: loop exit
PB: predicated region body
PF: predicated region fallthrough
CT: control target
= control target key end

     0   :  { %s2851_s12 = smov 0   ;;  %s2853_s13 = smov 0   ;;  %s3360_s0 = inlined_call_operand.vmem [shape: bf16[2,32,512], index: 0, kind: input, shape index: {}]   ;;  %s3361_s1 = inlined_call_operand.vmem [shape: bf16[4,512,128], index: 1, kind: input, shape index: {}]   ;;  %s3362_s2 = inlined_call_operand.vmem [shape: f32[1,128], index: 2, kind: input, shape index: {}]   ;;  %s3363_s3 = inlined_call_operand.vmem [shape: bf16[2,24,128], index: 3, kind: output, shape index: {}]  }
   0x1   :  { %s2855_s14 = smov 0  }
   0x2 LB: > { %s25_s15 = sadd.s32 1, %s2825_s13  ;;  %p2038_p0 = scmp.ge.s32.totalorder %s2829_s14, 1  ;;  %s2829_s14 = sphi %s2855_s14, %s13_s14   ;;  %s2825_s13 = sphi %s2853_s13, %s3365_s13   ;;  %s2821_s12 = sphi %s2851_s12, %s3364_s12  }
   0x3   : > { %p27_p1 = scmp.ge.s32.totalorder %s25_s15, 2  ;;  %p117_p2 = scmp.lt.s32.totalorder %s2829_s14, 3 }
   0x5   : > { %s3367_s15 = smov (%p27_p1, %s25_s15), 0  ;;  %p118_p3 = pnand %p2038_p0, %p117_p2 }
   0x6   : > { %p139_p4 = scmp.lt.s32.totalorder (!%p118_p3), %s2821_s12, 1  ;;  %s2397_s16 = sshll.u32 (!%p118_p3), %s2821_s12, 6 }
   0x7   : > { %121 = sbr.rel (%p118_p3) target bundleno = 367 (0x16f), region = 28  ;;  %s156_s19 = scalar_lea.vmem (!%p118_p3), %s3360_s0, %s2397_s16 }
   0xc   : > { %s3369_s12 = smov (!%p139_p4, %s2821_s12), 1  ;;  %v190_v0 = vld [vmem:[%s156_s19] sm:$0xff]  ;;  %v192_v1 = vld [vmem:[%s156_s19 + $0x8] sm:$0xff]  ;;  %v194_v2 = vld [vmem:[%s156_s19 + $0x10] sm:$0xff] }
   0xd   : > { %191 = vst [vmem:[#allocation2 + $0x30] sm:$0xff] %v190_v0  ;;  %193 = vst [vmem:[#allocation2] sm:$0xff] %v192_v1  ;;  %v196_v3 = vld [vmem:[%s156_s19 + $0x18] sm:$0xff]  ;;  %v198_v4 = vld [vmem:[%s156_s19 + $0x20] sm:$0xff]  ;;  %s2630_s20 = smul.u32 12, %s3369_s12 }
   0xe   : > { %195 = vst [vmem:[#allocation2 + $0x18] sm:$0xff] %v194_v2  ;;  %v200_v5 = vld [vmem:[%s156_s19 + $0x28] sm:$0xff]  ;;  %197 = vst [vmem:[#allocation2 + $0x10] sm:$0xff] %v196_v3  ;;  %v202_v6 = vld [vmem:[%s156_s19 + $0x30] sm:$0xff] }
   0xf   : > { %199 = vst [vmem:[#allocation2 + $0x8] sm:$0xff] %v198_v4  ;;  %201 = vst [vmem:[#allocation2 + $0x20] sm:$0xff] %v200_v5  ;;  %v204_v7 = vld [vmem:[%s156_s19 + $0x38] sm:$0xff]  ;;  %s2875_s23 = scalar_lea.vmem %s3363_s3, %s2630_s20 }
  0x10   : > { %203 = vst [vmem:[#allocation2 + $0x28] sm:$0xff] %v202_v6  ;;  %205 = vst [vmem:[#allocation2 + $0x38] sm:$0xff] %v204_v7 }
  0x11   : > { %213 = vsyncadd [#allocation3], 1024 }
  0x12   : > { %2817 = dma.done.wait [#allocation3], 1024 }
  0x13   : > { %2818 = vsyncadd [#allocation3], 4294966272  ;;  %v2655_v8 = vld [vmem:[%s3361_s1 + $0x178] sm:$0xff]   ;;  %v2659_v12 = vld [vmem:[%s3361_s1 + $0x170] sm:$0xff]   ;;  %vm393_vm0 = vsmask.f32 7424 }
  0x14   : > { %v2656_v9 = vld [vmem:[%s3361_s1 + $0x1f8] sm:$0xff]   ;;  %2406 = vmatprep.subr.bf16.mxu0 %v2655_v8  ;;  %v2660_v13 = vld [vmem:[%s3361_s1 + $0x1f0] sm:$0xff]   ;;  %v2663_v16 = vld [vmem:[%s3361_s1 + $0x168] sm:$0xff]   ;;  %vm1161_vm1 = vsmask.f32 5376  ;;  %vm1606_vm2 = vcmask 1044480  }
  0x15   : > { %v2657_v10 = vld [vmem:[%s3361_s1 + $0x138] sm:$0xff]   ;;  %2434 = vmatprep.subr.bf16.mxu1 %v2656_v9  ;;  %v2661_v14 = vld [vmem:[%s3361_s1 + $0x130] sm:$0xff]   ;;  %v2664_v17 = vld [vmem:[%s3361_s1 + $0x1e8] sm:$0xff]  }
  0x16   : > { %v2658_v11 = vld [vmem:[%s3361_s1 + $0x1b8] sm:$0xff]   ;;  %2407 = vmatpush3.bf16.msra.mxu0 %v2657_v10  ;;  %v2662_v15 = vld [vmem:[%s3361_s1 + $0x1b0] sm:$0xff]   ;;  %v2665_v18 = vld [vmem:[%s3361_s1 + $0x128] sm:$0xff]  }
  0x17   : > { %2435 = vmatpush3.bf16.msra.mxu1 %v2658_v11  ;;  %2408 = vmatprep.subr.bf16.mxu0 %v2659_v12  ;;  %v2666_v19 = vld [vmem:[%s3361_s1 + $0x1a8] sm:$0xff]   ;;  %v2667_v20 = vld [vmem:[%s3361_s1 + $0x160] sm:$0xff]   ;;  %v2671_v24 = vld [vmem:[%s3361_s1 + $0x158] sm:$0xff]  }
  0x18   : > { %2436 = vmatprep.subr.bf16.mxu1 %v2660_v13  ;;  %v2668_v21 = vld [vmem:[%s3361_s1 + $0x1e0] sm:$0xff]   ;;  %v2672_v25 = vld [vmem:[%s3361_s1 + $0x1d8] sm:$0xff]   ;;  %v2675_v28 = vld [vmem:[%s3361_s1 + $0x150] sm:$0xff]  }
  0x19   : > { %v2669_v22 = vld [vmem:[%s3361_s1 + $0x120] sm:$0xff]   ;;  %v2673_v26 = vld [vmem:[%s3361_s1 + $0x118] sm:$0xff]   ;;  %v2676_v29 = vld [vmem:[%s3361_s1 + $0x1d0] sm:$0xff]  }
  0x1a   : > { %2409 = vmatpush3.bf16.msra.mxu0 %v2661_v14  ;;  %v2670_v23 = vld [vmem:[%s3361_s1 + $0x1a0] sm:$0xff]   ;;  %v2674_v27 = vld [vmem:[%s3361_s1 + $0x198] sm:$0xff]   ;;  %v2677_v30 = vld [vmem:[%s3361_s1 + $0x110] sm:$0xff]  }
  0x1b   : > { %2437 = vmatpush3.bf16.msra.mxu1 %v2662_v15  ;;  %2410 = vmatprep.subr.bf16.mxu0 %v2663_v16  ;;  %v2678_v31 = vld [vmem:[%s3361_s1 + $0x190] sm:$0xff]   ;;  %v2679_v32 = vld [vmem:[%s3361_s1 + $0x148] sm:$0xff]   ;;  %v2683_v36 = vld [vmem:[%s3361_s1 + $0x140] sm:$0xff]  }
  0x1c   : > { %2438 = vmatprep.subr.bf16.mxu1 %v2664_v17  ;;  %v2680_v33 = vld [vmem:[%s3361_s1 + $0x1c8] sm:$0xff]   ;;  %v2684_v37 = vld [vmem:[%s3361_s1 + $0x1c0] sm:$0xff]   ;;  %v288_v40 = vld [vmem:[#allocation2 + $0x30] sm:$0xff] }
  0x1d   : > { %v2681_v34 = vld [vmem:[%s3361_s1 + $0x108] sm:$0xff]   ;;  %v2685_v38 = vld [vmem:[%s3361_s1 + $0x100] sm:$0xff]   ;;  %v2973_v41 = vld [vmem:[#allocation2 + $0x18] sm:$0xff] }
  0x1e   : > { %2411 = vmatpush3.bf16.msra.mxu0 %v2665_v18  ;;  %v2682_v35 = vld [vmem:[%s3361_s1 + $0x188] sm:$0xff]   ;;  %v2686_v39 = vld [vmem:[%s3361_s1 + $0x180] sm:$0xff]   ;;  %v2978_v44 = vcombine.high %v288_v40, %v2973_v41  ;;  %v2980_v46 = vld [vmem:[#allocation2 + $0x10] sm:$0xff]  ;;  %v2983_v47 = vcombine.low %v288_v40, %v2973_v41 }
  0x1f   : > { %2439 = vmatpush3.bf16.msra.mxu1 %v2666_v19  ;;  %2412 = vmatprep.subr.bf16.mxu0 %v2667_v20  ;;  %v2975_v42 = vld [vmem:[#allocation2 + $0x8] sm:$0xff]  ;;  %v289_v45 = vld [vmem:[#allocation2] sm:$0xff]  ;;  %v295_v50 = vld [vmem:[#allocation2 + $0x38] sm:$0x11] }
  0x20   : > { %2440 = vmatprep.subr.bf16.mxu1 %v2668_v21  ;;  %v294_v43 = vld [vmem:[#allocation2 + $0x28] sm:$0x11]  ;;  %v2986_v49 = vld [vmem:[#allocation2 + $0x20] sm:$0xff]  ;;  %v2989_v51 = vcombine.high %v289_v45, %v2980_v46  ;;  %v2993_v53 = vcombine.low %v289_v45, %v2980_v46  ;;  %v407_v54 = vshrl.u32 %v2978_v44, 16  ;;  %v409_v55 = vshll.u32 %v2978_v44, 16  ;;  %v2693_v58 = vld [vmem:[%s3361_s1 + $0x78] sm:$0xff]  }
  0x21   : > { %v2111_v48 = vcombine.high %v2975_v42, %v294_v43  ;;  %v2110_v52 = vcombine.low %v2975_v42, %v294_v43  ;;  %v2113_v56 = vcombine.high %v2986_v49, %v295_v50  ;;  %v395_v57 = vshrl.u32 %v2983_v47, 16  ;;  %v2694_v3 = vld [vmem:[%s3361_s1 + $0xf8] sm:$0xff]   ;;  %v2697_v18 = vld [vmem:[%s3361_s1 + $0x70] sm:$0xff]   ;;  %v2706_v43 = vld [vmem:[%s3361_s1 + $0xe0] sm:$0xff]  }
  0x22   : > { %2413 = vmatpush3.bf16.msra.mxu0 %v2669_v22  ;;  %v431_v60 = vshrl.u32 %v2989_v51, 16  ;;  %v433_v61 = vshll.u32 %v2989_v51, 16  ;;  %v397_v62 = vshll.u32 %v2983_v47, 16  ;;  %v411_v63 = vrot.slane %v409_v55, 1  ;;  %v2695_v15 = vld [vmem:[%s3361_s1 + $0x38] sm:$0xff]   ;;  %v2707_v45 = vld [vmem:[%s3361_s1 + $0x20] sm:$0xff]  }
  0x23   : > { %2441 = vmatpush3.bf16.msra.mxu1 %v2670_v23  ;;  %2414 = vmatprep.subr.bf16.mxu0 %v2671_v24  ;;  %v414_v59 = vshll.u32 %v2111_v48, 16  ;;  %v438_v0 = vshll.u32 %v2113_v56, 16  ;;  %v402_v1 = vshll.u32 %v2110_v52, 16  ;;  %v2112_v2 = vcombine.low %v2986_v49, %v295_v50  ;;  %v2696_v22 = vld [vmem:[%s3361_s1 + $0xb8] sm:$0xff]   ;;  %v2698_v24 = vld [vmem:[%s3361_s1 + $0xf0] sm:$0xff]   ;;  %v2708_v50 = vld [vmem:[%s3361_s1 + $0xa0] sm:$0xff]  }
  0x24   : > { %2442 = vmatprep.subr.bf16.mxu1 %v2672_v25  ;;  %v435_v5 = vrot.slane %v433_v61, 1  ;;  %v399_v6 = vrot.slane %v397_v62, 1  ;;  %v419_v7 = vshrl.u32 %v2993_v53, 16  ;;  %v412_v8 = vor.u32 %v411_v63, %v407_v54  ;;  %v2711_v54 = vld [vmem:[%s3361_s1 + $0x18] sm:$0xff]   ;;  %v2721_v61 = vld [vmem:[%s3361_s1 + $0x40] sm:$0xff]   ;;  %v2720_v62 = vld [vmem:[%s3361_s1 + $0x88] sm:$0xff]  }
  0x25   : > { %v416_v4 = vrot.slane %v414_v59, 1  ;;  %v440_v9 = vrot.slane %v438_v0, 1  ;;  %v404_v10 = vrot.slane %v402_v1, 1  ;;  %v421_v11 = vshll.u32 %v2993_v53, 16  ;;  %v2712_v55 = vld [vmem:[%s3361_s1 + $0x98] sm:$0xff]   ;;  %v2718_v59 = vld [vmem:[%s3361_s1 + $0xc8] sm:$0xff]  }
  0x26   : > { %2415 = vmatpush3.bf16.msra.mxu0 %v2673_v26  ;;  %v436_v12 = vor.u32 %v435_v5, %v431_v60  ;;  %v400_v13 = vor.u32 %v399_v6, %v395_v57  ;;  %v426_v14 = vshll.u32 %v2112_v2, 16  ;;  %v445_v25 = vshrl.u32 %v2111_v48, 16  ;;  %v2699_v26 = vld [vmem:[%s3361_s1 + $0x30] sm:$0xff]   ;;  %v2709_v48 = vld [vmem:[%s3361_s1 + $0x58] sm:$0xff]   ;;  %v2717_v57 = vld [vmem:[%s3361_s1 + $0x48] sm:$0xff]  }
  0x27   : > { %2443 = vmatpush3.bf16.msra.mxu1 %v2674_v27  ;;  %2416 = vmatprep.subr.bf16.mxu0 %v2675_v28  ;;  %v417_v16 = vsel %vm393_vm0, %v412_v8, %v416_v4  ;;  %v423_v17 = vrot.slane %v421_v11, 1  ;;  %v451_v27 = vshrl.u32 %v2113_v56, 16  ;;  %v2715_v56 = vld [vmem:[%s3361_s1 + $0x10] sm:$0xff]   ;;  %v2719_v60 = vld [vmem:[%s3361_s1 + $0x8] sm:$0xff]   ;;  %v2722_v63 = vld [vmem:[%s3361_s1 + $0xc0] sm:$0xff]   ;;  %v2151_v6 = vcombine.high %v2975_v42, %v2975_v42 }
  0x28   : > { %2444 = vmatprep.subr.bf16.mxu1 %v2676_v29  ;;  %686 = vmatprep.mubr.bf16.mxu0 %v417_v16  ;;  %v441_v19 = vsel %vm393_vm0, %v436_v12, %v440_v9  ;;  %v405_v20 = vsel %vm393_vm0, %v400_v13, %v404_v10  ;;  %v428_v21 = vrot.slane %v426_v14, 1  ;;  %v2701_v29 = vld [vmem:[%s3361_s1 + $0x68] sm:$0xff]   ;;  %v2723_v0 = vld [vmem:[%s3361_s1] sm:$0xff]   ;;  %v2725_v1 = vld [vmem:[%s3361_s1 + $0x278] sm:$0xff]   ;;  %v2150_v12 = vcombine.low %v2975_v42, %v2975_v42 }
  0x29   : > { %734 = vmatprep.mubr.bf16.mxu1 %v441_v19  ;;  %v424_v23 = vor.u32 %v423_v17, %v419_v7  ;;  %v2729_v5 = vld [vmem:[%s3361_s1 + $0x270] sm:$0xff]   ;;  %v2728_v7 = vld [vmem:[%s3361_s1 + $0x2b8] sm:$0xff]   ;;  %v2735_v11 = vld [vmem:[%s3361_s1 + $0x268] sm:$0xff]   ;;  %v2152_v16 = vcombine.low %v2986_v49, %v2986_v49 }
  0x2a   : > { %2417 = vmatpush3.bf16.msra.mxu0 %v2677_v30  ;;  %v447_v30 = vor.u32 %v445_v25, %v416_v4  ;;  %v2727_v4 = vld [vmem:[%s3361_s1 + $0x238] sm:$0xff]   ;;  %v2730_v8 = vld [vmem:[%s3361_s1 + $0x2f0] sm:$0xff]   ;;  %v2736_v13 = vld [vmem:[%s3361_s1 + $0x2e8] sm:$0xff]  }
  0x2b   : > { %2445 = vmatpush3.bf16.msra.mxu1 %v2678_v31  ;;  %2418 = vmatprep.subr.bf16.mxu0 %v2679_v32  ;;  %v429_v28 = vsel %vm393_vm0, %v424_v23, %v428_v21  ;;  %v442_v31 = vshrl.u32 %v2110_v52, 16  ;;  %v2700_v32 = vld [vmem:[%s3361_s1 + $0xb0] sm:$0xff]   ;;  %v2710_v52 = vld [vmem:[%s3361_s1 + $0xd8] sm:$0xff]   ;;  %v2738_v14 = vld [vmem:[%s3361_s1 + $0x228] sm:$0xff]  }
  0x2c   : > { %2446 = vmatprep.subr.bf16.mxu1 %v2680_v33  ;;  %v453_v33 = vor.u32 %v451_v27, %v440_v9  ;;  %v2153_v9 = vcombine.high %v2986_v49, %v2986_v49  ;;  %v2742_v17 = vld [vmem:[%s3361_s1 + $0x2e0] sm:$0xff]   ;;  %v2745_v19 = vld [vmem:[%s3361_s1 + $0x258] sm:$0xff]   ;;  %v2749_v23 = vld [vmem:[%s3361_s1 + $0x250] sm:$0xff]  }
  0x2d   : > { %v2750_v25 = vld [vmem:[%s3361_s1 + $0x2d0] sm:$0xff]   ;;  %v2753_v27 = vld [vmem:[%s3361_s1 + $0x248] sm:$0xff]  }
  0x2e   : > { %2419 = vmatpush3.bf16.msra.mxu0 %v2681_v34  ;;  %v448_v34 = vshrl.u32 %v2112_v2, 16  ;;  %v2724_v2 = vld [vmem:[%s3361_s1 + $0x80] sm:$0xff]  }
  0x2f   : > { %2447 = vmatpush3.bf16.msra.mxu1 %v2682_v35  ;;  %2420 = vmatprep.subr.bf16.mxu0 %v2683_v36  ;;  %v2702_v35 = vld [vmem:[%s3361_s1 + $0xe8] sm:$0xff]   ;;  %v444_v36 = vor.u32 %v442_v31, %v404_v10  ;;  %v2731_v10 = vld [vmem:[%s3361_s1 + $0x230] sm:$0xff]   ;;  %v2757_v31 = vld [vmem:[%s3361_s1 + $0x240] sm:$0xff]  }
  0x30   : > { %2448 = vmatprep.subr.bf16.mxu1 %v2684_v37  ;;  %v2703_v37 = vld [vmem:[%s3361_s1 + $0x28] sm:$0xff]   ;;  %v450_v40 = vor.u32 %v448_v34, %v428_v21  ;;  %v2746_v21 = vld [vmem:[%s3361_s1 + $0x2d8] sm:$0xff]   ;;  %v2759_v34 = vld [vmem:[%s3361_s1 + $0x200] sm:$0xff]  }
  0x32   : > { %2421 = vmatpush3.bf16.msra.mxu0 %v2685_v38  ;;  %v2705_v38 = vld [vmem:[%s3361_s1 + $0x60] sm:$0xff]  }
  0x33   : > { %2449 = vmatpush3.bf16.msra.mxu1 %v2686_v39  ;;  %2462 = vmatprep.subr.bf16.mxu0 %v2693_v58  ;;  %v2704_v39 = vld [vmem:[%s3361_s1 + $0xa8] sm:$0xff]   ;;  %v2716_v58 = vld [vmem:[%s3361_s1 + $0x90] sm:$0xff]  }
  0x34   : > { %2490 = vmatprep.subr.bf16.mxu1 %v2694_v3  ;;  %v2726_v3 = vld [vmem:[%s3361_s1 + $0x2f8] sm:$0xff]  }
  0x35   : > { %687 = vmatmul.mubr.bf16.vlgmr.msra.gmra.mxu0 %v405_v20  ;;  %v2744_v20 = vld [vmem:[%s3361_s1 + $0x2a0] sm:$0xff]  }
  0x36   : > { %2463 = vmatpush3.bf16.msra.mxu0 %v2695_v15  ;;  %735 = vmatmul.mubr.bf16.vlgmr.msra.gmra.mxu1 %v429_v28  ;;  %v2739_v15 = vld [vmem:[%s3361_s1 + $0x2a8] sm:$0xff]   ;;  %v2752_v28 = vld [vmem:[%s3361_s1 + $0x290] sm:$0xff]  }
  0x37   : > { %2464 = vmatprep.subr.bf16.mxu0 %v2697_v18  ;;  %2491 = vmatpush3.bf16.msra.mxu1 %v2696_v22  ;;  %v2743_v18 = vld [vmem:[%s3361_s1 + $0x220] sm:$0xff]   ;;  %v2747_v22 = vld [vmem:[%s3361_s1 + $0x218] sm:$0xff]  }
  0x38   : > { %694 = vmatprep.mubr.bf16.mxu0 %v447_v30  ;;  %2492 = vmatprep.subr.bf16.mxu1 %v2698_v24  ;;  %v2748_v24 = vld [vmem:[%s3361_s1 + $0x298] sm:$0xff]   ;;  %v2755_v30 = vld [vmem:[%s3361_s1 + $0x208] sm:$0xff]  }
  0x39   : > { %742 = vmatprep.mubr.bf16.mxu1 %v453_v33  ;;  %v2758_v33 = vld [vmem:[%s3361_s1 + $0x2c0] sm:$0xff]  }
  0x3a   : > { %2465 = vmatpush3.bf16.msra.mxu0 %v2699_v26  ;;  %v2751_v26 = vld [vmem:[%s3361_s1 + $0x210] sm:$0xff]  }
  0x3b   : > { %2466 = vmatprep.subr.bf16.mxu0 %v2701_v29  ;;  %2493 = vmatpush3.bf16.msra.mxu1 %v2700_v32  ;;  %v2754_v29 = vld [vmem:[%s3361_s1 + $0x2c8] sm:$0xff]  }
  0x3c   : > { %2494 = vmatprep.subr.bf16.mxu1 %v2702_v35  ;;  %v2756_v32 = vld [vmem:[%s3361_s1 + $0x288] sm:$0xff]   ;;  %v2760_v35 = vld [vmem:[%s3361_s1 + $0x280] sm:$0xff]  }
  0x3d   : > { %695 = vmatmul.mubr.bf16.gmra.mxu0 %v444_v36  ;;  %v1072_v36 = vld [vmem:[#allocation2 + $0x30] sm:$0xcc] }
  0x3e   : > { %2467 = vmatpush3.bf16.msra.mxu0 %v2703_v37  ;;  %1008 = vmatprep.mubr.bf16.mxu0 %v2978_v44  ;;  %v2713_v44 = vld [vmem:[%s3361_s1 + $0x50] sm:$0xff]   ;;  %v1074_v37 = vld [vmem:[#allocation2 + $0x28] sm:$0x77] }
  0x3f   : > { %2468 = vmatprep.subr.bf16.mxu0 %v2705_v38  ;;  %743 = vmatmul.mubr.bf16.gmra.mxu1 %v450_v40  ;;  %v1073_v38 = vld [vmem:[#allocation2] sm:$0xcc]  ;;  %v2251_v40 = vcombine.high %v1072_v36, %v2973_v41 }
  0x40   : > { %2495 = vmatpush3.bf16.msra.mxu1 %v2704_v39  ;;  %1056 = vmatprep.mubr.bf16.mxu1 %v2989_v51  ;;  %v2714_v51 = vld [vmem:[%s3361_s1 + $0xd0] sm:$0xff]   ;;  %v2250_v39 = vcombine.low %v1072_v36, %v2973_v41  ;;  %v2767_v41 = vld [vmem:[%s3361_s1 + $0x378] sm:$0xff]   ;;  %v2775_v36 = vld [vmem:[%s3361_s1 + $0x368] sm:$0xff]  }
  0x41   : > { %2496 = vmatprep.subr.bf16.mxu1 %v2706_v43  ;;  %v3216_v43 = vcombine.low %v2975_v42, %v1074_v37 }
  0x42   : > { %2469 = vmatpush3.bf16.msra.mxu0 %v2707_v45  ;;  %v3219_v45 = vcombine.high %v2975_v42, %v1074_v37  ;;  %v1180_v42 = vshrl.u32 %v2251_v40, 16  ;;  %v2774_v37 = vld [vmem:[%s3361_s1 + $0x3b0] sm:$0xff]  }
  0x43   : > { %2470 = vmatprep.subr.bf16.mxu0 %v2709_v48  ;;  %v1075_v48 = vld [vmem:[#allocation2 + $0x38] sm:$0x77] }
  0x44   : > { %2497 = vmatpush3.bf16.msra.mxu1 %v2708_v50  ;;  %v2252_v50 = vcombine.low %v1073_v38, %v2980_v46 }
  0x45   : > { %2498 = vmatprep.subr.bf16.mxu1 %v2710_v52  ;;  %v2253_v52 = vcombine.high %v1073_v38, %v2980_v46  ;;  %v2776_v38 = vld [vmem:[%s3361_s1 + $0x3e8] sm:$0xff]  }
  0x46   : > { %2471 = vmatpush3.bf16.msra.mxu0 %v2711_v54  ;;  %v3224_v54 = vcombine.low %v2986_v49, %v1075_v48 }
  0x47   : > { %2472 = vmatprep.subr.bf16.mxu0 %v2713_v44  ;;  %v3227_v44 = vcombine.high %v2986_v49, %v1075_v48  ;;  %v2778_v48 = vld [vmem:[%s3361_s1 + $0x3a8] sm:$0xff]  }
  0x48   : > { %2499 = vmatpush3.bf16.msra.mxu1 %v2712_v55  ;;  %v1183_v55 = vshll.u32 %v2251_v40, 16  ;;  %v2779_v40 = vld [vmem:[%s3361_s1 + $0x360] sm:$0xff]  }
  0x49   : > { %2500 = vmatprep.subr.bf16.mxu1 %v2714_v51  ;;  %v1188_v51 = vshrl.u32 %v3219_v45, 16  ;;  %v1222_v49 = vshrl.u32 %v3227_v44, 16 }
  0x4a   : > { %2473 = vmatpush3.bf16.msra.mxu0 %v2715_v56  ;;  %v1191_v56 = vshll.u32 %v3219_v45, 16 }
  0x4b   : > { %2474 = vmatprep.subr.bf16.mxu0 %v2717_v57  ;;  %v2768_v57 = vld [vmem:[%s3361_s1 + $0x3f8] sm:$0xff]  }
  0x4c   : > { %2501 = vmatpush3.bf16.msra.mxu1 %v2716_v58  ;;  %v1214_v58 = vshrl.u32 %v2253_v52, 16 }
  0x4d   : > { %2502 = vmatprep.subr.bf16.mxu1 %v2718_v59  ;;  %v1217_v59 = vshll.u32 %v2253_v52, 16  ;;  %v2781_v52 = vld [vmem:[%s3361_s1 + $0x320] sm:$0xff]  }
  0x4e   : > { %2475 = vmatpush3.bf16.msra.mxu0 %v2719_v60  ;;  %v1225_v60 = vshll.u32 %v3227_v44, 16 }
  0x4f   : > { %2476 = vmatprep.subr.bf16.mxu0 %v2721_v61  ;;  %v1182_v61 = vrot.slane %v1180_v42, 2  ;;  %v2782_v42 = vld [vmem:[%s3361_s1 + $0x3a0] sm:$0xff]  }
  0x50   : > { %2503 = vmatpush3.bf16.msra.mxu1 %v2720_v62  ;;  %v1185_v62 = vrot.slane %v1183_v55, 3  ;;  %v2784_v55 = vld [vmem:[%s3361_s1 + $0x3d8] sm:$0xff]  }
  0x51   : > { %2504 = vmatprep.subr.bf16.mxu1 %v2722_v63  ;;  %v1190_v63 = vrot.slane %v1188_v51, 2  ;;  %v2785_v51 = vld [vmem:[%s3361_s1 + $0x318] sm:$0xff]  }
  0x52   : > { %2477 = vmatpush3.bf16.msra.mxu0 %v2723_v0  ;;  %v1193_v0 = vrot.slane %v1191_v56, 3  ;;  %v2787_v56 = vld [vmem:[%s3361_s1 + $0x350] sm:$0xff]  }
  0x53   : > { %2518 = vmatprep.subr.bf16.mxu0 %v2725_v1  ;;  %v1216_v1 = vrot.slane %v1214_v58, 2  ;;  %v2788_v58 = vld [vmem:[%s3361_s1 + $0x3d0] sm:$0xff]  }
  0x54   : > { %2505 = vmatpush3.bf16.msra.mxu1 %v2724_v2  ;;  %v1219_v2 = vrot.slane %v1217_v59, 3  ;;  %v2789_v59 = vld [vmem:[%s3361_s1 + $0x310] sm:$0xff]  }
  0x55   : > { %1009 = vmatmul.mubr.bf16.vlgmr.msra.gmra.mxu0 %v2983_v47  ;;  %2546 = vmatprep.subr.bf16.mxu1 %v2726_v3  ;;  %v2732_v47 = vld [vmem:[%s3361_s1 + $0x2b0] sm:$0xff]   ;;  %v1224_v3 = vrot.slane %v1222_v49, 2  ;;  %v2791_v49 = vld [vmem:[%s3361_s1 + $0x348] sm:$0xff]  }
  0x56   : > { %2519 = vmatpush3.bf16.msra.mxu0 %v2727_v4  ;;  %1016 = vmatprep.mubr.bf16.mxu0 %v2151_v6  ;;  %v1227_v4 = vrot.slane %v1225_v60, 3  ;;  %v1194_v6 = vor.u32 %v1193_v0, %v1190_v63  ;;  %v2790_v60 = vld [vmem:[%s3361_s1 + $0x390] sm:$0xff]   ;;  %v2795_v63 = vld [vmem:[%s3361_s1 + $0x340] sm:$0xff]  }
  0x57   : > { %2520 = vmatprep.subr.bf16.mxu0 %v2729_v5  ;;  %1057 = vmatmul.mubr.bf16.vlgmr.msra.gmra.mxu1 %v2993_v53  ;;  %v2741_v53 = vld [vmem:[%s3361_s1 + $0x260] sm:$0xff]   ;;  %v1186_v5 = vor.u32 %v1185_v62, %v1182_v61  ;;  %v2792_v61 = vld [vmem:[%s3361_s1 + $0x3c8] sm:$0xff]   ;;  %v1529_v0 = vld [vmem:[#allocation2 + $0x30] sm:$0x88] }
  0x58   : > { %2547 = vmatpush3.bf16.msra.mxu1 %v2728_v7  ;;  %1064 = vmatprep.mubr.bf16.mxu1 %v2153_v9  ;;  %v1163_v7 = vshrl.u32 %v2250_v39, 16  ;;  %v1220_v9 = vor.u32 %v1219_v2, %v1216_v1  ;;  %v2793_v62 = vld [vmem:[%s3361_s1 + $0x308] sm:$0xff]   ;;  %v1611_v1 = vrot.slane %v3219_v45, 3  ;;  %v1530_v2 = vld [vmem:[#allocation2] sm:$0x88] }
  0x59   : > { %2548 = vmatprep.subr.bf16.mxu1 %v2730_v8  ;;  %v1166_v8 = vshll.u32 %v2250_v39, 16  ;;  %v2777_v39 = vld [vmem:[%s3361_s1 + $0x328] sm:$0xff]   ;;  %v2796_v45 = vld [vmem:[%s3361_s1 + $0x3c0] sm:$0xff]  }
  0x5a   : > { %2521 = vmatpush3.bf16.msra.mxu0 %v2731_v10  ;;  %v1228_v10 = vor.u32 %v1227_v4, %v1224_v3  ;;  %v2803_v3 = vld [vmem:[#allocation2 + $0x18] sm:$0xff] }
  0x5b   : > { %2522 = vmatprep.subr.bf16.mxu0 %v2735_v11  ;;  %v1171_v11 = vshrl.u32 %v3216_v43, 16  ;;  %v2354_v4 = vcombine.low %v1529_v0, %v2803_v3 }
  0x5c   : > { %2549 = vmatpush3.bf16.msra.mxu1 %v2732_v47  ;;  %v1174_v47 = vshll.u32 %v3216_v43, 16 }
  0x5d   : > { %1017 = vmatmul.mubr.bf16.gmra.mxu0 %v2150_v12  ;;  %2550 = vmatprep.subr.bf16.mxu1 %v2736_v13  ;;  %v1195_v12 = vsel %vm1161_vm1, %v1186_v5, %v1194_v6  ;;  %v1165_v13 = vrot.slane %v1163_v7, 2  ;;  %v2355_v5 = vcombine.high %v1529_v0, %v2803_v3  ;;  %v1617_v7 = vrot.slane %v3227_v44, 3 }
  0x5e   : > { %2523 = vmatpush3.bf16.msra.mxu0 %v2738_v14  ;;  %v1168_v14 = vrot.slane %v1166_v8, 3  ;;  %1462 = vmatprep.mubr.bf16.mxu0 %v1195_v12  ;;  %v2794_v8 = vld [vmem:[%s3361_s1 + $0x388] sm:$0xff]   ;;  %v1608_v12 = vrot.slane %v3216_v43, 3 }
  0x5f   : > { %2524 = vmatprep.subr.bf16.mxu0 %v2741_v53  ;;  %1065 = vmatmul.mubr.bf16.gmra.mxu1 %v2152_v16  ;;  %v1197_v53 = vshrl.u32 %v2252_v50, 16  ;;  %v1173_v16 = vrot.slane %v1171_v11, 2  ;;  %v1607_v11 = vrot.slane %v2354_v4, 3  ;;  %v1610_v44 = vrot.slane %v2355_v5, 3 }
  0x60   : > { %2551 = vmatpush3.bf16.msra.mxu1 %v2739_v15  ;;  %v1229_v15 = vsel %vm1161_vm1, %v1220_v9, %v1228_v10  ;;  %v2804_v9 = vld [vmem:[#allocation2 + $0x10] sm:$0xff] }
  0x61   : > { %2552 = vmatprep.subr.bf16.mxu1 %v2742_v17  ;;  %v1176_v17 = vrot.slane %v1174_v47, 3  ;;  %1510 = vmatprep.mubr.bf16.mxu1 %v1229_v15 }
  0x62   : > { %2525 = vmatpush3.bf16.msra.mxu0 %v2743_v18  ;;  %v1200_v18 = vshll.u32 %v2252_v50, 16  ;;  %v2780_v50 = vld [vmem:[%s3361_s1 + $0x3e0] sm:$0xff]  }
  0x63   : > { %2526 = vmatprep.subr.bf16.mxu0 %v2745_v19  ;;  %v1169_v19 = vor.u32 %v1168_v14, %v1165_v13  ;;  %v1612_v13 = vsel %vm1606_vm2, %v1610_v44, %v1611_v1 }
  0x64   : > { %2553 = vmatpush3.bf16.msra.mxu1 %v2744_v20  ;;  %v1199_v20 = vrot.slane %v1197_v53, 2  ;;  %v2798_v53 = vld [vmem:[%s3361_s1 + $0x380] sm:$0xff]  }
  0x65   : > { %2554 = vmatprep.subr.bf16.mxu1 %v2746_v21  ;;  %v1205_v21 = vshrl.u32 %v3224_v54, 16 }
  0x66   : > { %2527 = vmatpush3.bf16.msra.mxu0 %v2747_v22  ;;  %v1208_v22 = vshll.u32 %v3224_v54, 16 }
  0x67   : > { %2528 = vmatprep.subr.bf16.mxu0 %v2749_v23  ;;  %v2769_v23 = vld [vmem:[%s3361_s1 + $0x338] sm:$0xff]  }
  0x68   : > { %2555 = vmatpush3.bf16.msra.mxu1 %v2748_v24  ;;  %v1177_v24 = vor.u32 %v1176_v17, %v1173_v16  ;;  %v1614_v16 = vrot.slane %v3224_v54, 3  ;;  %v1609_v17 = vsel %vm1606_vm2, %v1607_v11, %v1608_v12 }
  0x69   : > { %2556 = vmatprep.subr.bf16.mxu1 %v2750_v25  ;;  %v1202_v25 = vrot.slane %v1200_v18, 3 }
  0x6a   : > { %2529 = vmatpush3.bf16.msra.mxu0 %v2751_v26  ;;  %v2771_v26 = vld [vmem:[%s3361_s1 + $0x370] sm:$0xff]  }
  0x6b   : > { %2530 = vmatprep.subr.bf16.mxu0 %v2753_v27  ;;  %v1207_v27 = vrot.slane %v1205_v21, 2 }
  0x6c   : > { %2557 = vmatpush3.bf16.msra.mxu1 %v2752_v28  ;;  %v1210_v28 = vrot.slane %v1208_v22, 3 }
  0x6d   : > { %2558 = vmatprep.subr.bf16.mxu1 %v2754_v29  ;;  %v2770_v29 = vld [vmem:[%s3361_s1 + $0x3b8] sm:$0xff]  }
  0x6e   : > { %2531 = vmatpush3.bf16.msra.mxu0 %v2755_v30  ;;  %v1178_v30 = vsel %vm1161_vm1, %v1169_v19, %v1177_v24 }
  0x6f   : > { %2532 = vmatprep.subr.bf16.mxu0 %v2757_v31  ;;  %v1203_v31 = vor.u32 %v1202_v25, %v1199_v20 }
  0x70   : > { %2559 = vmatpush3.bf16.msra.mxu1 %v2756_v32  ;;  %v1211_v32 = vor.u32 %v1210_v28, %v1207_v27 }
  0x71   : > { %2560 = vmatprep.subr.bf16.mxu1 %v2758_v33  ;;  %v2772_v33 = vld [vmem:[%s3361_s1 + $0x3f0] sm:$0xff]  }
  0x72   : > { %2533 = vmatpush3.bf16.msra.mxu0 %v2759_v34  ;;  %v2773_v34 = vld [vmem:[%s3361_s1 + $0x330] sm:$0xff]  }
  0x73   : > { %2574 = vmatprep.subr.bf16.mxu0 %v2767_v41  ;;  %v2783_v41 = vld [vmem:[%s3361_s1 + $0x358] sm:$0xff]  }
  0x74   : > { %2561 = vmatpush3.bf16.msra.mxu1 %v2760_v35  ;;  %v1212_v35 = vsel %vm1161_vm1, %v1203_v31, %v1211_v32 }
  0x75   : > { %2602 = vmatprep.subr.bf16.mxu1 %v2768_v57  ;;  %1463 = vmatmul.mubr.bf16.vlgmr.msra.gmra.mxu0 %v1178_v30  ;;  %v2786_v57 = vld [vmem:[%s3361_s1 + $0x398] sm:$0xff]  }
  0x76   : > { %2575 = vmatpush3.bf16.msra.mxu0 %v2769_v23  ;;  %1470 = vmatprep.mubr.bf16.mxu0 %v1194_v6  ;;  %v2357_v6 = vcombine.high %v1530_v2, %v2980_v46  ;;  %v2797_v46 = vld [vmem:[%s3361_s1 + $0x300] sm:$0xff]  }
  0x77   : > { %2576 = vmatprep.subr.bf16.mxu0 %v2771_v26  ;;  %1511 = vmatmul.mubr.bf16.vlgmr.msra.gmra.mxu1 %v1212_v35 }
  0x78   : > { %2603 = vmatpush3.bf16.msra.mxu1 %v2770_v29  ;;  %1518 = vmatprep.mubr.bf16.mxu1 %v1228_v10  ;;  %v2356_v10 = vcombine.low %v1530_v2, %v2804_v9  ;;  %v1616_v47 = vrot.slane %v2357_v6, 3 }
  0x79   : > { %2604 = vmatprep.subr.bf16.mxu1 %v2772_v33 }
  0x7a   : > { %2577 = vmatpush3.bf16.msra.mxu0 %v2773_v34  ;;  %v1618_v14 = vsel %vm1606_vm2, %v1616_v47, %v1617_v7  ;;  %v1613_v15 = vrot.slane %v2356_v10, 3 }
  0x7b   : > { %2578 = vmatprep.subr.bf16.mxu0 %v2775_v36 }
  0x7c   : > { %2605 = vmatpush3.bf16.msra.mxu1 %v2774_v37  ;;  %v1615_v43 = vsel %vm1606_vm2, %v1613_v15, %v1614_v16 }
  0x7d   : > { %1471 = vmatmul.mubr.bf16.gmra.mxu0 %v1177_v24  ;;  %2606 = vmatprep.subr.bf16.mxu1 %v2776_v38 }
  0x7e   : > { %2579 = vmatpush3.bf16.msra.mxu0 %v2777_v39  ;;  %1851 = vmatprep.mubr.bf16.mxu0 %v1612_v13 }
  0x7f   : > { %2580 = vmatprep.subr.bf16.mxu0 %v2779_v40  ;;  %1519 = vmatmul.mubr.bf16.gmra.mxu1 %v1211_v32 }
  0x80   : > { %2607 = vmatpush3.bf16.msra.mxu1 %v2778_v48  ;;  %1899 = vmatprep.mubr.bf16.mxu1 %v1618_v14 }
  0x81   : > { %2608 = vmatprep.subr.bf16.mxu1 %v2780_v50 }
  0x82   : > { %2581 = vmatpush3.bf16.msra.mxu0 %v2781_v52 }
  0x83   : > { %2582 = vmatprep.subr.bf16.mxu0 %v2783_v41 }
  0x84   : > { %2609 = vmatpush3.bf16.msra.mxu1 %v2782_v42 }
  0x85   : > { %2610 = vmatprep.subr.bf16.mxu1 %v2784_v55 }
  0x86   : > { %2583 = vmatpush3.bf16.msra.mxu0 %v2785_v51 }
  0x87   : > { %2584 = vmatprep.subr.bf16.mxu0 %v2787_v56 }
  0x88   : > { %2611 = vmatpush3.bf16.msra.mxu1 %v2786_v57 }
  0x89   : > { %2612 = vmatprep.subr.bf16.mxu1 %v2788_v58 }
  0x8a   : > { %2585 = vmatpush3.bf16.msra.mxu0 %v2789_v59 }
  0x8b   : > { %2586 = vmatprep.subr.bf16.mxu0 %v2791_v49 }
  0x8c   : > { %2613 = vmatpush3.bf16.msra.mxu1 %v2790_v60 }
  0x8d   : > { %2614 = vmatprep.subr.bf16.mxu1 %v2792_v61 }
  0x8e   : > { %2587 = vmatpush3.bf16.msra.mxu0 %v2793_v62 }
  0x8f   : > { %2588 = vmatprep.subr.bf16.mxu0 %v2795_v63 }
  0x90   : > { %2615 = vmatpush3.bf16.msra.mxu1 %v2794_v8 }
  0x91   : > { %2616 = vmatprep.subr.bf16.mxu1 %v2796_v45 }
  0x92   : > { %2589 = vmatpush3.bf16.msra.mxu0 %v2797_v46 }
  0x94   : > { %2617 = vmatpush3.bf16.msra.mxu1 %v2798_v53 }
  0x95   : > { %1852 = vmatmul.mubr.bf16.vlgmr.msra.gmra.mxu0 %v1609_v17 }
  0x96   : > { %1859 = vmatprep.mubr.bf16.mxu0 %v1611_v1 }
  0x97   : > { %1900 = vmatmul.mubr.bf16.vlgmr.msra.gmra.mxu1 %v1615_v43 }
  0x98   : > { %1907 = vmatprep.mubr.bf16.mxu1 %v1617_v7 }
  0x9d   : > { %1860 = vmatmul.mubr.bf16.gmra.mxu0 %v1608_v12 }
  0x9f   : > { %1908 = vmatmul.mubr.bf16.gmra.mxu1 %v1614_v16 }
  0xf5   : > { %v2422_v18 = vpop.f32.mrf.mxu0 }
  0xf6   : > { %v2450_v20 = vpop.f32.mrf.mxu1 }
  0xf7   : > { %v2423_v19 = vpop.f32.mrf.mxu0 }
  0xf8   : > { %v2424_v21 = vadd.f32 %v2423_v19, %v2422_v18  ;;  %v2451_v54 = vpop.f32.mrf.mxu1 }
  0xf9   : > { %v2425_v22 = vpop.f32.mrf.mxu0  ;;  %v2452_v23 = vadd.f32 %v2451_v54, %v2450_v20 }
  0xfa   : > { %v2453_v25 = vpop.f32.mrf.mxu1 }
  0xfb   : > { %v2426_v24 = vpop.f32.mrf.mxu0  ;;  %v737_v27 = vadd.f32 %v2452_v23, %v2424_v21 }
  0xfc   : > { %v2427_v26 = vadd.f32 %v2426_v24, %v2425_v22  ;;  %v2454_v29 = vpop.f32.mrf.mxu1 }
  0xfd   : > { %v2428_v28 = vpop.f32.mrf.mxu0  ;;  %v2455_v30 = vadd.f32 %v2454_v29, %v2453_v25 }
  0xff   : > { %v2429_v31 = vpop.f32.mrf.mxu0  ;;  %v2456_v32 = vpop.f32.mrf.mxu1  ;;  %v740_v34 = vadd.f32 %v2455_v30, %v2427_v26 }
 0x100   : > { %v2430_v33 = vadd.f32 %v2429_v31, %v2428_v28 }
 0x101   : > { %v2431_v35 = vpop.f32.mrf.mxu0  ;;  %v2457_v36 = vpop.f32.mrf.mxu1 }
 0x102   : > { %v2458_v37 = vadd.f32 %v2457_v36, %v2456_v32 }
 0x103   : > { %v2432_v38 = vpop.f32.mrf.mxu0  ;;  %v2459_v39 = vpop.f32.mrf.mxu1 }
 0x104   : > { %v745_v40 = vadd.f32 %v2458_v37, %v2430_v33 }
 0x105   : > { %v2460_v48 = vpop.f32.mrf.mxu1 }
 0x115   : > { %v2478_v50 = vpop.f32.mrf.mxu0 }
 0x117   : > { %v2479_v52 = vpop.f32.mrf.mxu0  ;;  %v2506_v41 = vpop.f32.mrf.mxu1 }
 0x118   : > { %v2480_v42 = vadd.f32 %v2479_v52, %v2478_v50 }
 0x119   : > { %v2481_v55 = vpop.f32.mrf.mxu0  ;;  %v2507_v56 = vpop.f32.mrf.mxu1 }
 0x11a   : > { %v1011_v51 = vadd.f32 %v2480_v42, %v737_v27  ;;  %v2508_v57 = vadd.f32 %v2507_v56, %v2506_v41 }
 0x11b   : > { %v2482_v58 = vpop.f32.mrf.mxu0  ;;  %v2509_v59 = vpop.f32.mrf.mxu1 }
 0x11c   : > { %v2483_v49 = vadd.f32 %v2482_v58, %v2481_v55  ;;  %v1059_v60 = vadd.f32 %v2508_v57, %v1011_v51  ;;  %v2390_v51 = vld [vmem:[%s3362_s2] ss:$0 sm:$0xff] }
 0x11d   : > { %v2484_v61 = vpop.f32.mrf.mxu0  ;;  %v2510_v63 = vpop.f32.mrf.mxu1 }
 0x11e   : > { %v1014_v62 = vadd.f32 %v2483_v49, %v740_v34  ;;  %v2511_v0 = vadd.f32 %v2510_v63, %v2509_v59 }
 0x11f   : > { %v2485_v1 = vpop.f32.mrf.mxu0  ;;  %v2512_v3 = vpop.f32.mrf.mxu1 }
 0x120   : > { %v2486_v2 = vadd.f32 %v2485_v1, %v2484_v61  ;;  %v1062_v4 = vadd.f32 %v2511_v0, %v1014_v62 }
 0x121   : > { %v2487_v5 = vpop.f32.mrf.mxu0  ;;  %v2513_v7 = vpop.f32.mrf.mxu1 }
 0x122   : > { %v1019_v6 = vadd.f32 %v2486_v2, %v745_v40  ;;  %v2514_v8 = vadd.f32 %v2513_v7, %v2512_v3 }
 0x123   : > { %v2488_v9 = vpop.f32.mrf.mxu0  ;;  %v2515_v10 = vpop.f32.mrf.mxu1 }
 0x124   : > { %v1067_v45 = vadd.f32 %v2514_v8, %v1019_v6 }
 0x125   : > { %v2516_v46 = vpop.f32.mrf.mxu1 }
 0x135   : > { %v2534_v11 = vpop.f32.mrf.mxu0 }
 0x137   : > { %v2535_v44 = vpop.f32.mrf.mxu0  ;;  %v2562_v47 = vpop.f32.mrf.mxu1 }
 0x138   : > { %v2536_v54 = vadd.f32 %v2535_v44, %v2534_v11 }
 0x139   : > { %v2537_v12 = vpop.f32.mrf.mxu0  ;;  %v2563_v13 = vpop.f32.mrf.mxu1 }
 0x13a   : > { %v2564_v23 = vadd.f32 %v2563_v13, %v2562_v47 }
 0x13b   : > { %v2538_v14 = vpop.f32.mrf.mxu0  ;;  %v2565_v53 = vpop.f32.mrf.mxu1 }
 0x13c   : > { %v1513_v26 = vadd.f32 %v2564_v23, %v2536_v54  ;;  %v2539_v28 = vadd.f32 %v2538_v14, %v2537_v12 }
 0x13d   : > { %v2540_v15 = vpop.f32.mrf.mxu0  ;;  %v2566_v16 = vpop.f32.mrf.mxu1 }
 0x13e   : > { %v2567_v29 = vadd.f32 %v2566_v16, %v2565_v53  ;;  %v1526_v35 = vadd.f32 %v1513_v26, %v1059_v60 }
 0x13f   : > { %v2541_v17 = vpop.f32.mrf.mxu0  ;;  %v2568_v43 = vpop.f32.mrf.mxu1 }
 0x140   : > { %v2542_v36 = vadd.f32 %v2541_v17, %v2540_v15  ;;  %v1516_v38 = vadd.f32 %v2567_v29, %v2539_v28 }
 0x141   : > { %v2543_v18 = vpop.f32.mrf.mxu0  ;;  %v2569_v19 = vpop.f32.mrf.mxu1 }
 0x142   : > { %v2570_v39 = vadd.f32 %v2569_v19, %v2568_v43  ;;  %v1527_v57 = vadd.f32 %v1516_v38, %v1062_v4 }
 0x143   : > { %v2544_v20 = vpop.f32.mrf.mxu0  ;;  %v2571_v21 = vpop.f32.mrf.mxu1 }
 0x144   : > { %v1521_v58 = vadd.f32 %v2570_v39, %v2542_v36 }
 0x145   : > { %v2572_v22 = vpop.f32.mrf.mxu1 }
 0x146   : > { %v1528_v3 = vadd.f32 %v1521_v58, %v1067_v45 }
 0x155   : > { %v2590_v24 = vpop.f32.mrf.mxu0 }
 0x157   : > { %v2591_v25 = vpop.f32.mrf.mxu0  ;;  %v2618_v27 = vpop.f32.mrf.mxu1 }
 0x158   : > { %v2592_v30 = vadd.f32 %v2591_v25, %v2590_v24 }
 0x159   : > { %v2593_v31 = vpop.f32.mrf.mxu0  ;;  %v2619_v32 = vpop.f32.mrf.mxu1 }
 0x15a   : > { %v2620_v33 = vadd.f32 %v2619_v32, %v2618_v27 }
 0x15b   : > { %v2594_v34 = vpop.f32.mrf.mxu0  ;;  %v2621_v37 = vpop.f32.mrf.mxu1 }
 0x15c   : > { %v1902_v40 = vadd.f32 %v2620_v33, %v2592_v30  ;;  %v2595_v48 = vadd.f32 %v2594_v34, %v2593_v31 }
 0x15d   : > { %v2596_v50 = vpop.f32.mrf.mxu0  ;;  %v2622_v52 = vpop.f32.mrf.mxu1 }
 0x15e   : > { %v1915_v41 = vadd.f32 %v1902_v40, %v1526_v35  ;;  %v2623_v42 = vadd.f32 %v2622_v52, %v2621_v37 }
 0x15f   : > { %v2597_v55 = vpop.f32.mrf.mxu0  ;;  %v2624_v56 = vpop.f32.mrf.mxu1 }
 0x160   : > { %v1905_v59 = vadd.f32 %v2623_v42, %v2595_v48  ;;  %v2598_v49 = vadd.f32 %v2597_v55, %v2596_v50  ;;  %v1925_v62 = vadd.f32 %v2390_v51, %v1915_v41 }
 0x161   : > { %v2599_v60 = vpop.f32.mrf.mxu0  ;;  %v2625_v61 = vpop.f32.mrf.mxu1 }
 0x162   : > { %v1916_v63 = vadd.f32 %v1905_v59, %v1527_v57  ;;  %v2626_v0 = vadd.f32 %v2625_v61, %v2624_v56  ;;  %v1928_v8 = vmax.f32 %v1925_v62, 0.0 }
 0x163   : > { %v2600_v1 = vpop.f32.mrf.mxu0  ;;  %v2627_v2 = vpop.f32.mrf.mxu1 }
 0x164   : > { %v1926_v5 = vadd.f32 %v2390_v51, %v1916_v63  ;;  %v1910_v6 = vadd.f32 %v2626_v0, %v2598_v49 }
 0x165   : > { %v2628_v7 = vpop.f32.mrf.mxu1 }
 0x166   : > { %v1929_v9 = vmax.f32 %v1926_v5, 0.0  ;;  %v1917_v10 = vadd.f32 %v1910_v6, %v1528_v3 }
 0x168   : > { %v2404_v4 = vpack.c.bf16 %v1929_v9, %v1928_v8  ;;  %v1927_v46 = vadd.f32 %v2390_v51, %v1917_v10 }
 0x16a   : > { %2405 = vst [vmem:[%s2875_s23] sm:$0xff] %v2404_v4   ;;  %v1930_v11 = vmax.f32 %v1927_v46, 0.0 }
 0x16c   : > { %v2400_v44 = vpack.c.bf16 %v1930_v11, %v1930_v11 }
 0x16e   : > { %1946 = vst [vmem:[%s2875_s23 + $0x8] sm:$0xf] %v2400_v44 }
 0x16f PF: > { %s13_s14 = sadd.s32 1, %s2829_s14   ;;  %s3364_s12 = smov %s2825_s13 }
 0x170   : > { %p10_p5 = scmp.ge.s32.totalorder %s13_s14, 4   ;;  %s3365_s13 = smov %s3367_s15 }
 0x172   :  { %12 = sbr.rel (!%p10_p5) target bundleno = 2 (0x2), region = 101 }
 0x177   :  { %1977 = vsyncmov [#allocation3] }
 0x17a   :  { %s1978_s29 = vpop.sfrf %1977 }
 0x17b   :  { %p2396_p6 = scmp.ne.s32.totalorder %s1978_s29, 0 }
 0x17d   :  { %1982 = shalt.err (%p2396_p6)  }

// kernel: a_call__.8
= control target key start
LH: loop header
LB: loop body
LE: loop exit
PB: predicated region body
PF: predicated region fallthrough
CT: control target
= control target key end

     0   :  { %s2525_s12 = smov 0   ;;  %s2527_s13 = smov 0   ;;  %s2976_s0 = inlined_call_operand.vmem [shape: bf16[2,16,512], index: 0, kind: input, shape index: {}]   ;;  %s2977_s1 = inlined_call_operand.vmem [shape: bf16[4,512,128], index: 1, kind: input, shape index: {}]   ;;  %s2978_s2 = inlined_call_operand.vmem [shape: f32[1,128], index: 2, kind: input, shape index: {}]   ;;  %s2979_s3 = inlined_call_operand.vmem [shape: bf16[2,8,128], index: 3, kind: output, shape index: {}]  }
   0x1   :  { %s2529_s14 = smov 0  }
   0x2 LB: > { %s25_s15 = sadd.s32 1, %s2499_s13  ;;  %p1790_p0 = scmp.ge.s32.totalorder %s2503_s14, 1  ;;  %s2503_s14 = sphi %s2529_s14, %s13_s14   ;;  %s2499_s13 = sphi %s2527_s13, %s2981_s13   ;;  %s2495_s12 = sphi %s2525_s12, %s2980_s12  }
   0x3   : > { %p27_p1 = scmp.ge.s32.totalorder %s25_s15, 2  ;;  %p117_p2 = scmp.lt.s32.totalorder %s2503_s14, 3 }
   0x5   : > { %s2983_s15 = smov (%p27_p1, %s25_s15), 0  ;;  %p118_p3 = pnand %p1790_p0, %p117_p2 }
   0x6   : > { %p136_p4 = scmp.lt.s32.totalorder (!%p118_p3), %s2495_s12, 1  ;;  %s2134_s16 = sshll.u32 (!%p118_p3), %s2495_s12, 5 }
   0x7   : > { %121 = sbr.rel (%p118_p3) target bundleno = 356 (0x164), region = 28  ;;  %s151_s19 = scalar_lea.vmem (!%p118_p3), %s2976_s0, %s2134_s16 }
   0xc   : > { %s2985_s12 = smov (!%p136_p4, %s2495_s12), 1  ;;  %v185_v0 = vld [vmem:[%s151_s19] sm:$0xff]  ;;  %v187_v1 = vld [vmem:[%s151_s19 + $0x8] sm:$0xff]  ;;  %v189_v2 = vld [vmem:[%s151_s19 + $0x10] sm:$0xff] }
   0xd   : > { %186 = vst [vmem:[#allocation2 + $0x10] sm:$0xff] %v185_v0  ;;  %188 = vst [vmem:[#allocation2] sm:$0xff] %v187_v1  ;;  %v191_v3 = vld [vmem:[%s151_s19 + $0x18] sm:$0xff]  ;;  %s1791_s20 = sshll.u32 %s2985_s12, 2 }
   0xe   : > { %190 = vst [vmem:[#allocation2 + $0x18] sm:$0xff] %v189_v2  ;;  %192 = vst [vmem:[#allocation2 + $0x8] sm:$0xff] %v191_v3  ;;  %s2549_s23 = scalar_lea.vmem %s2979_s3, %s1791_s20 }
   0xf   : > { %200 = vsyncadd [#allocation3], 512 }
  0x10   : > { %2491 = dma.done.wait [#allocation3], 512 }
  0x11   : > { %2492 = vsyncadd [#allocation3], 4294966784  ;;  %v2335_v4 = vld [vmem:[%s2977_s1 + $0x178] sm:$0xff]   ;;  %v2339_v8 = vld [vmem:[%s2977_s1 + $0x170] sm:$0xff]  }
  0x12   : > { %v2336_v5 = vld [vmem:[%s2977_s1 + $0x1f8] sm:$0xff]   ;;  %2135 = vmatprep.subr.bf16.mxu0 %v2335_v4  ;;  %v2340_v9 = vld [vmem:[%s2977_s1 + $0x1f0] sm:$0xff]   ;;  %v2343_v12 = vld [vmem:[%s2977_s1 + $0x168] sm:$0xff]  }
  0x13   : > { %v2337_v6 = vld [vmem:[%s2977_s1 + $0x138] sm:$0xff]   ;;  %2157 = vmatprep.subr.bf16.mxu1 %v2336_v5  ;;  %v2341_v10 = vld [vmem:[%s2977_s1 + $0x130] sm:$0xff]   ;;  %v2344_v13 = vld [vmem:[%s2977_s1 + $0x1e8] sm:$0xff]  }
  0x14   : > { %v2338_v7 = vld [vmem:[%s2977_s1 + $0x1b8] sm:$0xff]   ;;  %2136 = vmatpush3.bf16.msra.mxu0 %v2337_v6  ;;  %v2342_v11 = vld [vmem:[%s2977_s1 + $0x1b0] sm:$0xff]   ;;  %v2345_v14 = vld [vmem:[%s2977_s1 + $0x128] sm:$0xff]  }
  0x15   : > { %2158 = vmatpush3.bf16.msra.mxu1 %v2338_v7  ;;  %2137 = vmatprep.subr.bf16.mxu0 %v2339_v8  ;;  %v2346_v15 = vld [vmem:[%s2977_s1 + $0x1a8] sm:$0xff]   ;;  %v2347_v16 = vld [vmem:[%s2977_s1 + $0x160] sm:$0xff]   ;;  %v2351_v20 = vld [vmem:[%s2977_s1 + $0x158] sm:$0xff]  }
  0x16   : > { %2159 = vmatprep.subr.bf16.mxu1 %v2340_v9  ;;  %v2348_v17 = vld [vmem:[%s2977_s1 + $0x1e0] sm:$0xff]   ;;  %v2352_v21 = vld [vmem:[%s2977_s1 + $0x1d8] sm:$0xff]   ;;  %v2355_v24 = vld [vmem:[%s2977_s1 + $0x150] sm:$0xff]  }
  0x17   : > { %v2349_v18 = vld [vmem:[%s2977_s1 + $0x120] sm:$0xff]   ;;  %v2353_v22 = vld [vmem:[%s2977_s1 + $0x118] sm:$0xff]   ;;  %v2356_v25 = vld [vmem:[%s2977_s1 + $0x1d0] sm:$0xff]  }
  0x18   : > { %2138 = vmatpush3.bf16.msra.mxu0 %v2341_v10  ;;  %v2350_v19 = vld [vmem:[%s2977_s1 + $0x1a0] sm:$0xff]   ;;  %v2354_v23 = vld [vmem:[%s2977_s1 + $0x198] sm:$0xff]   ;;  %v2357_v26 = vld [vmem:[%s2977_s1 + $0x110] sm:$0xff]  }
  0x19   : > { %2160 = vmatpush3.bf16.msra.mxu1 %v2342_v11  ;;  %2139 = vmatprep.subr.bf16.mxu0 %v2343_v12  ;;  %v2358_v27 = vld [vmem:[%s2977_s1 + $0x190] sm:$0xff]   ;;  %v2359_v28 = vld [vmem:[%s2977_s1 + $0x148] sm:$0xff]   ;;  %v2363_v32 = vld [vmem:[%s2977_s1 + $0x140] sm:$0xff]  }
  0x1a   : > { %2161 = vmatprep.subr.bf16.mxu1 %v2344_v13  ;;  %v2360_v29 = vld [vmem:[%s2977_s1 + $0x1c8] sm:$0xff]   ;;  %v2364_v33 = vld [vmem:[%s2977_s1 + $0x1c0] sm:$0xff]   ;;  %v2647_v36 = vld [vmem:[#allocation2 + $0x10] sm:$0xff] }
  0x1b   : > { %v2361_v30 = vld [vmem:[%s2977_s1 + $0x108] sm:$0xff]   ;;  %v2365_v34 = vld [vmem:[%s2977_s1 + $0x100] sm:$0xff]   ;;  %v273_v37 = vld [vmem:[#allocation2 + $0x18] sm:$0x11]  ;;  %v1895_v3 = vcombine.high %v2647_v36, %v2647_v36 }
  0x1c   : > { %2140 = vmatpush3.bf16.msra.mxu0 %v2345_v14  ;;  %v2362_v31 = vld [vmem:[%s2977_s1 + $0x188] sm:$0xff]   ;;  %v2366_v35 = vld [vmem:[%s2977_s1 + $0x180] sm:$0xff]   ;;  %v1858_v39 = vcombine.low %v2647_v36, %v273_v37  ;;  %v1859_v40 = vcombine.high %v2647_v36, %v273_v37  ;;  %v2371_v44 = vld [vmem:[%s2977_s1 + $0x78] sm:$0xff]  }
  0x1d   : > { %2162 = vmatpush3.bf16.msra.mxu1 %v2346_v15  ;;  %2141 = vmatprep.subr.bf16.mxu0 %v2347_v16  ;;  %v2649_v38 = vld [vmem:[#allocation2] sm:$0xff]  ;;  %v274_v41 = vld [vmem:[#allocation2 + $0x8] sm:$0x11]  ;;  %v2372_v49 = vld [vmem:[%s2977_s1 + $0xf8] sm:$0xff]  }
  0x1e   : > { %2163 = vmatprep.subr.bf16.mxu1 %v2348_v17  ;;  %v1860_v42 = vcombine.low %v2649_v38, %v274_v41  ;;  %v1861_v43 = vcombine.high %v2649_v38, %v274_v41  ;;  %v364_v45 = vshrl.u32 %v1859_v40, 16  ;;  %v366_v46 = vshll.u32 %v1859_v40, 16  ;;  %v2373_v56 = vld [vmem:[%s2977_s1 + $0x38] sm:$0xff]   ;;  %v2375_v60 = vld [vmem:[%s2977_s1 + $0x70] sm:$0xff]   ;;  %v2379_v6 = vld [vmem:[%s2977_s1 + $0x68] sm:$0xff]  }
  0x1f   : > { %v357_v47 = vshrl.u32 %v1858_v39, 16  ;;  %v359_v48 = vshll.u32 %v1858_v39, 16  ;;  %v2374_v59 = vld [vmem:[%s2977_s1 + $0xb8] sm:$0xff]   ;;  %v2376_v1 = vld [vmem:[%s2977_s1 + $0xf0] sm:$0xff]   ;;  %v1897_v5 = vcombine.high %v2649_v38, %v2649_v38  ;;  %v2380_v7 = vld [vmem:[%s2977_s1 + $0xe8] sm:$0xff]  }
  0x20   : > { %2142 = vmatpush3.bf16.msra.mxu0 %v2349_v18  ;;  %v378_v50 = vshrl.u32 %v1861_v43, 16  ;;  %v380_v51 = vshll.u32 %v1861_v43, 16  ;;  %v371_v52 = vshrl.u32 %v1860_v42, 16  ;;  %v373_v53 = vshll.u32 %v1860_v42, 16  ;;  %v2377_v2 = vld [vmem:[%s2977_s1 + $0x30] sm:$0xff]   ;;  %v2381_v8 = vld [vmem:[%s2977_s1 + $0x28] sm:$0xff]  }
  0x21   : > { %2164 = vmatpush3.bf16.msra.mxu1 %v2350_v19  ;;  %2143 = vmatprep.subr.bf16.mxu0 %v2351_v20  ;;  %v368_v54 = vrot.slane %v366_v46, 1  ;;  %v361_v55 = vrot.slane %v359_v48, 1  ;;  %v2378_v4 = vld [vmem:[%s2977_s1 + $0xb0] sm:$0xff]   ;;  %v2382_v9 = vld [vmem:[%s2977_s1 + $0xa8] sm:$0xff]   ;;  %v2383_v10 = vld [vmem:[%s2977_s1 + $0x60] sm:$0xff]  }
  0x22   : > { %2165 = vmatprep.subr.bf16.mxu1 %v2352_v21  ;;  %v382_v57 = vrot.slane %v380_v51, 1  ;;  %v375_v58 = vrot.slane %v373_v53, 1  ;;  %v2384_v11 = vld [vmem:[%s2977_s1 + $0xe0] sm:$0xff]   ;;  %v2387_v14 = vld [vmem:[%s2977_s1 + $0x58] sm:$0xff]   ;;  %v2391_v18 = vld [vmem:[%s2977_s1 + $0x50] sm:$0xff]  }
  0x23   : > { %v369_v61 = vor.u32 %v368_v54, %v364_v45  ;;  %v362_v62 = vor.u32 %v361_v55, %v357_v47  ;;  %v2385_v12 = vld [vmem:[%s2977_s1 + $0x20] sm:$0xff]   ;;  %v2388_v15 = vld [vmem:[%s2977_s1 + $0xd8] sm:$0xff]   ;;  %v2392_v19 = vld [vmem:[%s2977_s1 + $0xd0] sm:$0xff]  }
  0x24   : > { %2144 = vmatpush3.bf16.msra.mxu0 %v2353_v22  ;;  %v383_v63 = vor.u32 %v382_v57, %v378_v50  ;;  %v376_v0 = vor.u32 %v375_v58, %v371_v52  ;;  %v2386_v13 = vld [vmem:[%s2977_s1 + $0xa0] sm:$0xff]   ;;  %v2389_v16 = vld [vmem:[%s2977_s1 + $0x18] sm:$0xff]   ;;  %v2393_v20 = vld [vmem:[%s2977_s1 + $0x10] sm:$0xff]  }
  0x25   : > { %2166 = vmatpush3.bf16.msra.mxu1 %v2354_v23  ;;  %2145 = vmatprep.subr.bf16.mxu0 %v2355_v24  ;;  %v2390_v17 = vld [vmem:[%s2977_s1 + $0x98] sm:$0xff]   ;;  %v2394_v21 = vld [vmem:[%s2977_s1 + $0x90] sm:$0xff]   ;;  %v2395_v22 = vld [vmem:[%s2977_s1 + $0x48] sm:$0xff]  }
  0x26   : > { %2167 = vmatprep.subr.bf16.mxu1 %v2356_v25  ;;  %612 = vmatprep.mubr.bf16.mxu0 %v369_v61  ;;  %v2396_v23 = vld [vmem:[%s2977_s1 + $0xc8] sm:$0xff]   ;;  %v2411_v37 = vld [vmem:[%s2977_s1 + $0x270] sm:$0xff]   ;;  %v2420_v45 = vld [vmem:[%s2977_s1 + $0x2e0] sm:$0xff]  }
  0x27   : > { %652 = vmatprep.mubr.bf16.mxu1 %v383_v63  ;;  %v2397_v24 = vld [vmem:[%s2977_s1 + $0x8] sm:$0xff]   ;;  %v2412_v39 = vld [vmem:[%s2977_s1 + $0x2f0] sm:$0xff]   ;;  %v2421_v46 = vld [vmem:[%s2977_s1 + $0x220] sm:$0xff]  }
  0x28   : > { %2146 = vmatpush3.bf16.msra.mxu0 %v2357_v26  ;;  %v2398_v25 = vld [vmem:[%s2977_s1 + $0x88] sm:$0xff]   ;;  %v2399_v26 = vld [vmem:[%s2977_s1 + $0x40] sm:$0xff]   ;;  %v2423_v48 = vld [vmem:[%s2977_s1 + $0x258] sm:$0xff]  }
  0x29   : > { %2168 = vmatpush3.bf16.msra.mxu1 %v2358_v27  ;;  %2147 = vmatprep.subr.bf16.mxu0 %v2359_v28  ;;  %v2400_v27 = vld [vmem:[%s2977_s1 + $0xc0] sm:$0xff]   ;;  %v2415_v40 = vld [vmem:[%s2977_s1 + $0x268] sm:$0xff]   ;;  %v2425_v50 = vld [vmem:[%s2977_s1 + $0x218] sm:$0xff]  }
  0x2a   : > { %2169 = vmatprep.subr.bf16.mxu1 %v2360_v29  ;;  %v2401_v28 = vld [vmem:[%s2977_s1] sm:$0xff]   ;;  %v2416_v41 = vld [vmem:[%s2977_s1 + $0x2e8] sm:$0xff]   ;;  %v2426_v51 = vld [vmem:[%s2977_s1 + $0x298] sm:$0xff]  }
  0x2b   : > { %v2402_v29 = vld [vmem:[%s2977_s1 + $0x80] sm:$0xff]   ;;  %v2417_v42 = vld [vmem:[%s2977_s1 + $0x228] sm:$0xff]   ;;  %v2427_v52 = vld [vmem:[%s2977_s1 + $0x250] sm:$0xff]  }
  0x2c   : > { %2148 = vmatpush3.bf16.msra.mxu0 %v2361_v30  ;;  %v2407_v30 = vld [vmem:[%s2977_s1 + $0x278] sm:$0xff]   ;;  %v2418_v43 = vld [vmem:[%s2977_s1 + $0x2a8] sm:$0xff]   ;;  %v2422_v47 = vld [vmem:[%s2977_s1 + $0x2a0] sm:$0xff]  }
  0x2d   : > { %2170 = vmatpush3.bf16.msra.mxu1 %v2362_v31  ;;  %2149 = vmatprep.subr.bf16.mxu0 %v2363_v32  ;;  %v2408_v31 = vld [vmem:[%s2977_s1 + $0x2f8] sm:$0xff]   ;;  %v2428_v53 = vld [vmem:[%s2977_s1 + $0x2d0] sm:$0xff]   ;;  %v2432_v57 = vld [vmem:[%s2977_s1 + $0x2c8] sm:$0xff]  }
  0x2e   : > { %2171 = vmatprep.subr.bf16.mxu1 %v2364_v33  ;;  %v2409_v32 = vld [vmem:[%s2977_s1 + $0x238] sm:$0xff]   ;;  %v1894_v33 = vcombine.low %v2647_v36, %v2647_v36  ;;  %v2413_v36 = vld [vmem:[%s2977_s1 + $0x230] sm:$0xff]   ;;  %v2433_v58 = vld [vmem:[%s2977_s1 + $0x208] sm:$0xff]  }
  0x2f   : > { %v2429_v54 = vld [vmem:[%s2977_s1 + $0x210] sm:$0xff]   ;;  %v2436_v61 = vld [vmem:[%s2977_s1 + $0x2c0] sm:$0xff]  }
  0x30   : > { %2150 = vmatpush3.bf16.msra.mxu0 %v2365_v34  ;;  %v2410_v34 = vld [vmem:[%s2977_s1 + $0x2b8] sm:$0xff]   ;;  %v2430_v55 = vld [vmem:[%s2977_s1 + $0x290] sm:$0xff]   ;;  %v2438_v63 = vld [vmem:[%s2977_s1 + $0x280] sm:$0xff]  }
  0x31   : > { %2172 = vmatpush3.bf16.msra.mxu1 %v2366_v35  ;;  %2179 = vmatprep.subr.bf16.mxu0 %v2371_v44  ;;  %v1896_v35 = vcombine.low %v2649_v38, %v2649_v38  ;;  %v2414_v38 = vld [vmem:[%s2977_s1 + $0x2b0] sm:$0xff]   ;;  %v2419_v44 = vld [vmem:[%s2977_s1 + $0x260] sm:$0xff]  }
  0x32   : > { %2201 = vmatprep.subr.bf16.mxu1 %v2372_v49  ;;  %v2424_v49 = vld [vmem:[%s2977_s1 + $0x2d8] sm:$0xff]  }
  0x33   : > { %613 = vmatmul.mubr.bf16.vlgmr.msra.gmra.mxu0 %v362_v62  ;;  %v2437_v62 = vld [vmem:[%s2977_s1 + $0x200] sm:$0xff]  }
  0x34   : > { %653 = vmatmul.mubr.bf16.vlgmr.msra.gmra.mxu1 %v376_v0  ;;  %2180 = vmatpush3.bf16.msra.mxu0 %v2373_v56  ;;  %v2431_v56 = vld [vmem:[%s2977_s1 + $0x248] sm:$0xff]   ;;  %v946_v0 = vld [vmem:[#allocation2 + $0x10] sm:$0xee] }
  0x35   : > { %2202 = vmatpush3.bf16.msra.mxu1 %v2374_v59  ;;  %2181 = vmatprep.subr.bf16.mxu0 %v2375_v60  ;;  %v2434_v59 = vld [vmem:[%s2977_s1 + $0x288] sm:$0xff]   ;;  %v2435_v60 = vld [vmem:[%s2977_s1 + $0x240] sm:$0xff]  }
  0x36   : > { %2203 = vmatprep.subr.bf16.mxu1 %v2376_v1  ;;  %898 = vmatprep.mubr.bf16.mxu0 %v1895_v3  ;;  %v2855_v1 = vld [vmem:[#allocation2 + $0x18] sm:$0x33]  ;;  %v2857_v3 = vld [vmem:[#allocation2 + $0x8] sm:$0x33] }
  0x37   : > { %938 = vmatprep.mubr.bf16.mxu1 %v1897_v5  ;;  %v1995_v5 = vcombine.high %v946_v0, %v2855_v1 }
  0x38   : > { %2182 = vmatpush3.bf16.msra.mxu0 %v2377_v2  ;;  %v947_v2 = vld [vmem:[#allocation2] sm:$0xee] }
  0x39   : > { %2204 = vmatpush3.bf16.msra.mxu1 %v2378_v4  ;;  %2183 = vmatprep.subr.bf16.mxu0 %v2379_v6  ;;  %v1994_v4 = vcombine.low %v946_v0, %v2855_v1  ;;  %v1996_v6 = vcombine.low %v947_v2, %v2857_v3 }
  0x3a   : > { %2205 = vmatprep.subr.bf16.mxu1 %v2380_v7  ;;  %v2443_v7 = vld [vmem:[%s2977_s1 + $0x378] sm:$0xff]  }
  0x3c   : > { %2184 = vmatpush3.bf16.msra.mxu0 %v2381_v8  ;;  %v1997_v8 = vcombine.high %v947_v2, %v2857_v3 }
  0x3d   : > { %2206 = vmatpush3.bf16.msra.mxu1 %v2382_v9  ;;  %2185 = vmatprep.subr.bf16.mxu0 %v2383_v10  ;;  %v2444_v9 = vld [vmem:[%s2977_s1 + $0x3f8] sm:$0xff]   ;;  %v1040_v10 = vshrl.u32 %v1995_v5, 16 }
  0x3e   : > { %2207 = vmatprep.subr.bf16.mxu1 %v2384_v11  ;;  %v1043_v11 = vshll.u32 %v1995_v5, 16 }
  0x40   : > { %2186 = vmatpush3.bf16.msra.mxu0 %v2385_v12  ;;  %v1032_v12 = vshrl.u32 %v1994_v4, 16 }
  0x41   : > { %2208 = vmatpush3.bf16.msra.mxu1 %v2386_v13  ;;  %2187 = vmatprep.subr.bf16.mxu0 %v2387_v14  ;;  %v1035_v13 = vshll.u32 %v1994_v4, 16  ;;  %v1056_v14 = vshrl.u32 %v1997_v8, 16 }
  0x42   : > { %2209 = vmatprep.subr.bf16.mxu1 %v2388_v15  ;;  %v1059_v15 = vshll.u32 %v1997_v8, 16 }
  0x44   : > { %2188 = vmatpush3.bf16.msra.mxu0 %v2389_v16  ;;  %v1048_v16 = vshrl.u32 %v1996_v6, 16 }
  0x45   : > { %2210 = vmatpush3.bf16.msra.mxu1 %v2390_v17  ;;  %2189 = vmatprep.subr.bf16.mxu0 %v2391_v18  ;;  %v1051_v17 = vshll.u32 %v1996_v6, 16  ;;  %v1042_v18 = vrot.slane %v1040_v10, 1 }
  0x46   : > { %2211 = vmatprep.subr.bf16.mxu1 %v2392_v19  ;;  %v1045_v19 = vrot.slane %v1043_v11, 2 }
  0x48   : > { %2190 = vmatpush3.bf16.msra.mxu0 %v2393_v20  ;;  %v1034_v20 = vrot.slane %v1032_v12, 1 }
  0x49   : > { %2212 = vmatpush3.bf16.msra.mxu1 %v2394_v21  ;;  %2191 = vmatprep.subr.bf16.mxu0 %v2395_v22  ;;  %v1037_v21 = vrot.slane %v1035_v13, 2  ;;  %v2445_v22 = vld [vmem:[%s2977_s1 + $0x338] sm:$0xff]  }
  0x4a   : > { %2213 = vmatprep.subr.bf16.mxu1 %v2396_v23  ;;  %v1058_v23 = vrot.slane %v1056_v14, 1 }
  0x4c   : > { %2192 = vmatpush3.bf16.msra.mxu0 %v2397_v24  ;;  %v1061_v24 = vrot.slane %v1059_v15, 2 }
  0x4d   : > { %2214 = vmatpush3.bf16.msra.mxu1 %v2398_v25  ;;  %2193 = vmatprep.subr.bf16.mxu0 %v2399_v26  ;;  %v1050_v25 = vrot.slane %v1048_v16, 1  ;;  %v1053_v26 = vrot.slane %v1051_v17, 2 }
  0x4e   : > { %2215 = vmatprep.subr.bf16.mxu1 %v2400_v27  ;;  %v2446_v27 = vld [vmem:[%s2977_s1 + $0x3b8] sm:$0xff]  }
  0x50   : > { %2194 = vmatpush3.bf16.msra.mxu0 %v2401_v28  ;;  %v1046_v28 = vor.u32 %v1045_v19, %v1042_v18 }
  0x51   : > { %2216 = vmatpush3.bf16.msra.mxu1 %v2402_v29  ;;  %2223 = vmatprep.subr.bf16.mxu0 %v2407_v30  ;;  %v1038_v29 = vor.u32 %v1037_v21, %v1034_v20  ;;  %v1062_v30 = vor.u32 %v1061_v24, %v1058_v23 }
  0x52   : > { %2245 = vmatprep.subr.bf16.mxu1 %v2408_v31  ;;  %v1054_v31 = vor.u32 %v1053_v26, %v1050_v25 }
  0x53   : > { %899 = vmatmul.mubr.bf16.vlgmr.msra.gmra.mxu0 %v1894_v33  ;;  %v2448_v33 = vld [vmem:[%s2977_s1 + $0x3f0] sm:$0xff]  }
  0x54   : > { %939 = vmatmul.mubr.bf16.vlgmr.msra.gmra.mxu1 %v1896_v35  ;;  %2224 = vmatpush3.bf16.msra.mxu0 %v2409_v32  ;;  %v2447_v32 = vld [vmem:[%s2977_s1 + $0x370] sm:$0xff]  }
  0x55   : > { %2246 = vmatpush3.bf16.msra.mxu1 %v2410_v34  ;;  %2225 = vmatprep.subr.bf16.mxu0 %v2411_v37  ;;  %v2449_v34 = vld [vmem:[%s2977_s1 + $0x330] sm:$0xff]   ;;  %v2451_v37 = vld [vmem:[%s2977_s1 + $0x368] sm:$0xff]  }
  0x56   : > { %2247 = vmatprep.subr.bf16.mxu1 %v2412_v39  ;;  %1291 = vmatprep.mubr.bf16.mxu0 %v1046_v28  ;;  %v2450_v35 = vld [vmem:[%s2977_s1 + $0x3b0] sm:$0xff]   ;;  %v2452_v39 = vld [vmem:[%s2977_s1 + $0x3e8] sm:$0xff]  }
  0x57   : > { %1331 = vmatprep.mubr.bf16.mxu1 %v1062_v30 }
  0x58   : > { %2226 = vmatpush3.bf16.msra.mxu0 %v2413_v36  ;;  %v2453_v36 = vld [vmem:[%s2977_s1 + $0x328] sm:$0xff]  }
  0x59   : > { %2248 = vmatpush3.bf16.msra.mxu1 %v2414_v38  ;;  %2227 = vmatprep.subr.bf16.mxu0 %v2415_v40  ;;  %v2454_v38 = vld [vmem:[%s2977_s1 + $0x3a8] sm:$0xff]   ;;  %v2455_v40 = vld [vmem:[%s2977_s1 + $0x360] sm:$0xff]  }
  0x5a   : > { %2249 = vmatprep.subr.bf16.mxu1 %v2416_v41  ;;  %v2456_v41 = vld [vmem:[%s2977_s1 + $0x3e0] sm:$0xff]  }
  0x5c   : > { %2228 = vmatpush3.bf16.msra.mxu0 %v2417_v42  ;;  %v2457_v42 = vld [vmem:[%s2977_s1 + $0x320] sm:$0xff]  }
  0x5d   : > { %2250 = vmatpush3.bf16.msra.mxu1 %v2418_v43  ;;  %2229 = vmatprep.subr.bf16.mxu0 %v2419_v44  ;;  %v2458_v43 = vld [vmem:[%s2977_s1 + $0x3a0] sm:$0xff]   ;;  %v2459_v44 = vld [vmem:[%s2977_s1 + $0x358] sm:$0xff]  }
  0x5e   : > { %2251 = vmatprep.subr.bf16.mxu1 %v2420_v45  ;;  %v2460_v45 = vld [vmem:[%s2977_s1 + $0x3d8] sm:$0xff]  }
  0x60   : > { %2230 = vmatpush3.bf16.msra.mxu0 %v2421_v46  ;;  %v2461_v46 = vld [vmem:[%s2977_s1 + $0x318] sm:$0xff]  }
  0x61   : > { %2252 = vmatpush3.bf16.msra.mxu1 %v2422_v47  ;;  %2231 = vmatprep.subr.bf16.mxu0 %v2423_v48  ;;  %v2462_v47 = vld [vmem:[%s2977_s1 + $0x398] sm:$0xff]   ;;  %v2463_v48 = vld [vmem:[%s2977_s1 + $0x350] sm:$0xff]  }
  0x62   : > { %2253 = vmatprep.subr.bf16.mxu1 %v2424_v49  ;;  %v2464_v49 = vld [vmem:[%s2977_s1 + $0x3d0] sm:$0xff]  }
  0x64   : > { %2232 = vmatpush3.bf16.msra.mxu0 %v2425_v50  ;;  %v2465_v50 = vld [vmem:[%s2977_s1 + $0x310] sm:$0xff]  }
  0x65   : > { %2254 = vmatpush3.bf16.msra.mxu1 %v2426_v51  ;;  %2233 = vmatprep.subr.bf16.mxu0 %v2427_v52  ;;  %v2466_v51 = vld [vmem:[%s2977_s1 + $0x390] sm:$0xff]   ;;  %v2467_v52 = vld [vmem:[%s2977_s1 + $0x348] sm:$0xff]  }
  0x66   : > { %2255 = vmatprep.subr.bf16.mxu1 %v2428_v53  ;;  %v2468_v53 = vld [vmem:[%s2977_s1 + $0x3c8] sm:$0xff]  }
  0x68   : > { %2234 = vmatpush3.bf16.msra.mxu0 %v2429_v54  ;;  %v2469_v54 = vld [vmem:[%s2977_s1 + $0x308] sm:$0xff]  }
  0x69   : > { %2256 = vmatpush3.bf16.msra.mxu1 %v2430_v55  ;;  %2235 = vmatprep.subr.bf16.mxu0 %v2431_v56  ;;  %v2470_v55 = vld [vmem:[%s2977_s1 + $0x388] sm:$0xff]   ;;  %v2471_v56 = vld [vmem:[%s2977_s1 + $0x340] sm:$0xff]  }
  0x6a   : > { %2257 = vmatprep.subr.bf16.mxu1 %v2432_v57  ;;  %v2472_v57 = vld [vmem:[%s2977_s1 + $0x3c0] sm:$0xff]  }
  0x6c   : > { %2236 = vmatpush3.bf16.msra.mxu0 %v2433_v58  ;;  %v2473_v58 = vld [vmem:[%s2977_s1 + $0x300] sm:$0xff]  }
  0x6d   : > { %2258 = vmatpush3.bf16.msra.mxu1 %v2434_v59  ;;  %2237 = vmatprep.subr.bf16.mxu0 %v2435_v60  ;;  %v1340_v59 = vld [vmem:[#allocation2 + $0x10] sm:$0xcc]  ;;  %v1341_v60 = vld [vmem:[#allocation2] sm:$0xcc] }
  0x6e   : > { %2259 = vmatprep.subr.bf16.mxu1 %v2436_v61  ;;  %v2474_v61 = vld [vmem:[%s2977_s1 + $0x380] sm:$0xff]   ;;  %v2096_v0 = vcombine.low %v1341_v60, %v2857_v3  ;;  %v2097_v2 = vcombine.high %v1341_v60, %v2857_v3 }
  0x70   : > { %2238 = vmatpush3.bf16.msra.mxu0 %v2437_v62  ;;  %v2094_v62 = vcombine.low %v1340_v59, %v2855_v1  ;;  %v1419_v6 = vrot.slane %v2096_v0, 2 }
  0x71   : > { %2260 = vmatpush3.bf16.msra.mxu1 %v2438_v63  ;;  %2267 = vmatprep.subr.bf16.mxu0 %v2443_v7  ;;  %v2095_v63 = vcombine.high %v1340_v59, %v2855_v1  ;;  %v1420_v7 = vrot.slane %v2097_v2, 2 }
  0x72   : > { %2289 = vmatprep.subr.bf16.mxu1 %v2444_v9  ;;  %v1417_v4 = vrot.slane %v2094_v62, 2 }
  0x73   : > { %1292 = vmatmul.mubr.bf16.vlgmr.msra.gmra.mxu0 %v1038_v29  ;;  %v1418_v5 = vrot.slane %v2095_v63, 2 }
  0x74   : > { %1332 = vmatmul.mubr.bf16.vlgmr.msra.gmra.mxu1 %v1054_v31  ;;  %2268 = vmatpush3.bf16.msra.mxu0 %v2445_v22 }
  0x75   : > { %2290 = vmatpush3.bf16.msra.mxu1 %v2446_v27  ;;  %2269 = vmatprep.subr.bf16.mxu0 %v2447_v32 }
  0x76   : > { %2291 = vmatprep.subr.bf16.mxu1 %v2448_v33  ;;  %1649 = vmatprep.mubr.bf16.mxu0 %v1418_v5 }
  0x77   : > { %1689 = vmatprep.mubr.bf16.mxu1 %v1420_v7 }
  0x78   : > { %2270 = vmatpush3.bf16.msra.mxu0 %v2449_v34 }
  0x79   : > { %2292 = vmatpush3.bf16.msra.mxu1 %v2450_v35  ;;  %2271 = vmatprep.subr.bf16.mxu0 %v2451_v37 }
  0x7a   : > { %2293 = vmatprep.subr.bf16.mxu1 %v2452_v39 }
  0x7c   : > { %2272 = vmatpush3.bf16.msra.mxu0 %v2453_v36 }
  0x7d   : > { %2294 = vmatpush3.bf16.msra.mxu1 %v2454_v38  ;;  %2273 = vmatprep.subr.bf16.mxu0 %v2455_v40 }
  0x7e   : > { %2295 = vmatprep.subr.bf16.mxu1 %v2456_v41 }
  0x80   : > { %2274 = vmatpush3.bf16.msra.mxu0 %v2457_v42 }
  0x81   : > { %2296 = vmatpush3.bf16.msra.mxu1 %v2458_v43  ;;  %2275 = vmatprep.subr.bf16.mxu0 %v2459_v44 }
  0x82   : > { %2297 = vmatprep.subr.bf16.mxu1 %v2460_v45 }
  0x84   : > { %2276 = vmatpush3.bf16.msra.mxu0 %v2461_v46 }
  0x85   : > { %2298 = vmatpush3.bf16.msra.mxu1 %v2462_v47  ;;  %2277 = vmatprep.subr.bf16.mxu0 %v2463_v48 }
  0x86   : > { %2299 = vmatprep.subr.bf16.mxu1 %v2464_v49 }
  0x88   : > { %2278 = vmatpush3.bf16.msra.mxu0 %v2465_v50 }
  0x89   : > { %2300 = vmatpush3.bf16.msra.mxu1 %v2466_v51  ;;  %2279 = vmatprep.subr.bf16.mxu0 %v2467_v52  ;;  %v2130_v51 = vld [vmem:[%s2978_s2] ss:$0 sm:$0xff] }
  0x8a   : > { %2301 = vmatprep.subr.bf16.mxu1 %v2468_v53 }
  0x8c   : > { %2280 = vmatpush3.bf16.msra.mxu0 %v2469_v54 }
  0x8d   : > { %2302 = vmatpush3.bf16.msra.mxu1 %v2470_v55  ;;  %2281 = vmatprep.subr.bf16.mxu0 %v2471_v56 }
  0x8e   : > { %2303 = vmatprep.subr.bf16.mxu1 %v2472_v57 }
  0x90   : > { %2282 = vmatpush3.bf16.msra.mxu0 %v2473_v58 }
  0x91   : > { %2304 = vmatpush3.bf16.msra.mxu1 %v2474_v61 }
  0x93   : > { %1650 = vmatmul.mubr.bf16.vlgmr.msra.gmra.mxu0 %v1417_v4 }
  0x94   : > { %1690 = vmatmul.mubr.bf16.vlgmr.msra.gmra.mxu1 %v1419_v6 }
  0xf3   : > { %v2151_v8 = vpop.f32.mrf.mxu0 }
  0xf4   : > { %v2173_v9 = vpop.f32.mrf.mxu1 }
  0xf5   : > { %v2152_v10 = vpop.f32.mrf.mxu0 }
  0xf6   : > { %v2153_v11 = vadd.f32 %v2152_v10, %v2151_v8  ;;  %v2174_v1 = vpop.f32.mrf.mxu1 }
  0xf7   : > { %v2175_v12 = vadd.f32 %v2174_v1, %v2173_v9  ;;  %v2154_v13 = vpop.f32.mrf.mxu0 }
  0xf8   : > { %v2176_v14 = vpop.f32.mrf.mxu1 }
  0xf9   : > { %v655_v15 = vadd.f32 %v2175_v12, %v2153_v11  ;;  %v2155_v3 = vpop.f32.mrf.mxu0 }
  0xfa   : > { %v2177_v16 = vpop.f32.mrf.mxu1 }
 0x113   : > { %v2195_v17 = vpop.f32.mrf.mxu0 }
 0x114   : > { %v2217_v18 = vpop.f32.mrf.mxu1 }
 0x115   : > { %v2196_v19 = vpop.f32.mrf.mxu0 }
 0x116   : > { %v2197_v20 = vadd.f32 %v2196_v19, %v2195_v17  ;;  %v2218_v21 = vpop.f32.mrf.mxu1 }
 0x117   : > { %v2219_v22 = vadd.f32 %v2218_v21, %v2217_v18  ;;  %v2198_v23 = vpop.f32.mrf.mxu0 }
 0x118   : > { %v901_v24 = vadd.f32 %v2197_v20, %v655_v15  ;;  %v2220_v25 = vpop.f32.mrf.mxu1 }
 0x119   : > { %v2199_v26 = vpop.f32.mrf.mxu0 }
 0x11a   : > { %v941_v27 = vadd.f32 %v2219_v22, %v901_v24  ;;  %v2221_v28 = vpop.f32.mrf.mxu1 }
 0x133   : > { %v2239_v29 = vpop.f32.mrf.mxu0 }
 0x134   : > { %v2261_v30 = vpop.f32.mrf.mxu1 }
 0x135   : > { %v2240_v31 = vpop.f32.mrf.mxu0 }
 0x136   : > { %v2262_v32 = vpop.f32.mrf.mxu1  ;;  %v2241_v39 = vadd.f32 %v2240_v31, %v2239_v29 }
 0x137   : > { %v2242_v33 = vpop.f32.mrf.mxu0  ;;  %v2263_v36 = vadd.f32 %v2262_v32, %v2261_v30 }
 0x138   : > { %v2264_v34 = vpop.f32.mrf.mxu1 }
 0x139   : > { %v2243_v35 = vpop.f32.mrf.mxu0  ;;  %v1334_v41 = vadd.f32 %v2263_v36, %v2241_v39 }
 0x13a   : > { %v2265_v37 = vpop.f32.mrf.mxu1 }
 0x13b   : > { %v1339_v48 = vadd.f32 %v1334_v41, %v941_v27 }
 0x153   : > { %v2283_v38 = vpop.f32.mrf.mxu0 }
 0x154   : > { %v2305_v40 = vpop.f32.mrf.mxu1 }
 0x155   : > { %v2284_v42 = vpop.f32.mrf.mxu0 }
 0x156   : > { %v2285_v43 = vadd.f32 %v2284_v42, %v2283_v38  ;;  %v2306_v44 = vpop.f32.mrf.mxu1 }
 0x157   : > { %v2307_v45 = vadd.f32 %v2306_v44, %v2305_v40  ;;  %v2286_v46 = vpop.f32.mrf.mxu0 }
 0x158   : > { %v2308_v47 = vpop.f32.mrf.mxu1 }
 0x159   : > { %v1692_v49 = vadd.f32 %v2307_v45, %v2285_v43  ;;  %v2287_v50 = vpop.f32.mrf.mxu0 }
 0x15a   : > { %v2309_v52 = vpop.f32.mrf.mxu1 }
 0x15b   : > { %v1697_v53 = vadd.f32 %v1692_v49, %v1339_v48 }
 0x15d   : > { %v1705_v54 = vadd.f32 %v2130_v51, %v1697_v53 }
 0x15f   : > { %v1706_v55 = vmax.f32 %v1705_v54, 0.0 }
 0x161   : > { %v1707_v56 = vpack.c.bf16 %v1706_v55, %v1706_v55 }
 0x163   : > { %1708 = vst [vmem:[%s2549_s23] sm:$0xf] %v1707_v56 }
 0x164 PF: > { %s13_s14 = sadd.s32 1, %s2503_s14   ;;  %s2980_s12 = smov %s2499_s13 }
 0x165   : > { %p10_p5 = scmp.ge.s32.totalorder %s13_s14, 4   ;;  %s2981_s13 = smov %s2983_s15 }
 0x167   :  { %12 = sbr.rel (!%p10_p5) target bundleno = 2 (0x2), region = 101 }
 0x16c   :  { %1734 = vsyncmov [#allocation3] }
 0x16f   :  { %s1735_s29 = vpop.sfrf %1734 }
 0x170   :  { %p2133_p6 = scmp.ne.s32.totalorder %s1735_s29, 0 }
 0x172   :  { %1739 = shalt.err (%p2133_p6)  }

// kernel: a_call__.9
= control target key start
LH: loop header
LB: loop body
LE: loop exit
PB: predicated region body
PF: predicated region fallthrough
CT: control target
= control target key end

     0   :  { %s2517_s12 = smov 0   ;;  %s2519_s13 = smov 0   ;;  %s2980_s0 = inlined_call_operand.vmem [shape: bf16[2,16,512], index: 0, kind: input, shape index: {}]   ;;  %s2981_s1 = inlined_call_operand.vmem [shape: bf16[4,512,128], index: 1, kind: input, shape index: {}]   ;;  %s2982_s2 = inlined_call_operand.vmem [shape: f32[1,128], index: 2, kind: input, shape index: {}]   ;;  %s2983_s3 = inlined_call_operand.vmem [shape: bf16[2,8,128], index: 3, kind: output, shape index: {}]  }
   0x1   :  { %s2521_s14 = smov 0  }
   0x2 LB: > { %s25_s15 = sadd.s32 1, %s2491_s13  ;;  %p1782_p0 = scmp.ge.s32.totalorder %s2495_s14, 1  ;;  %s2495_s14 = sphi %s2521_s14, %s13_s14   ;;  %s2491_s13 = sphi %s2519_s13, %s2985_s13   ;;  %s2487_s12 = sphi %s2517_s12, %s2984_s12  }
   0x3   : > { %p27_p1 = scmp.ge.s32.totalorder %s25_s15, 2  ;;  %p117_p2 = scmp.lt.s32.totalorder %s2495_s14, 3 }
   0x5   : > { %s2987_s15 = smov (%p27_p1, %s25_s15), 0  ;;  %p118_p3 = pnand %p1782_p0, %p117_p2 }
   0x6   : > { %p136_p4 = scmp.lt.s32.totalorder (!%p118_p3), %s2487_s12, 1  ;;  %s2126_s16 = sshll.u32 (!%p118_p3), %s2487_s12, 5 }
   0x7   : > { %121 = sbr.rel (%p118_p3) target bundleno = 356 (0x164), region = 28  ;;  %s151_s19 = scalar_lea.vmem (!%p118_p3), %s2980_s0, %s2126_s16 }
   0xc   : > { %s2989_s12 = smov (!%p136_p4, %s2487_s12), 1  ;;  %v185_v0 = vld [vmem:[%s151_s19] sm:$0xff]  ;;  %v187_v1 = vld [vmem:[%s151_s19 + $0x8] sm:$0xff]  ;;  %v189_v2 = vld [vmem:[%s151_s19 + $0x10] sm:$0xff] }
   0xd   : > { %186 = vst [vmem:[#allocation2 + $0x10] sm:$0xff] %v185_v0  ;;  %188 = vst [vmem:[#allocation2] sm:$0xff] %v187_v1  ;;  %v191_v3 = vld [vmem:[%s151_s19 + $0x18] sm:$0xff]  ;;  %s1783_s20 = sshll.u32 %s2989_s12, 2 }
   0xe   : > { %190 = vst [vmem:[#allocation2 + $0x18] sm:$0xff] %v189_v2  ;;  %192 = vst [vmem:[#allocation2 + $0x8] sm:$0xff] %v191_v3  ;;  %s2541_s23 = scalar_lea.vmem %s2983_s3, %s1783_s20 }
   0xf   : > { %200 = vsyncadd [#allocation3], 512 }
  0x10   : > { %2483 = dma.done.wait [#allocation3], 512 }
  0x11   : > { %2484 = vsyncadd [#allocation3], 4294966784  ;;  %v2327_v4 = vld [vmem:[%s2981_s1 + $0x178] sm:$0xff]   ;;  %v2331_v8 = vld [vmem:[%s2981_s1 + $0x170] sm:$0xff]  }
  0x12   : > { %v2328_v5 = vld [vmem:[%s2981_s1 + $0x1f8] sm:$0xff]   ;;  %2127 = vmatprep.subr.bf16.mxu0 %v2327_v4  ;;  %v2332_v9 = vld [vmem:[%s2981_s1 + $0x1f0] sm:$0xff]   ;;  %v2335_v12 = vld [vmem:[%s2981_s1 + $0x168] sm:$0xff]  }
  0x13   : > { %v2329_v6 = vld [vmem:[%s2981_s1 + $0x138] sm:$0xff]   ;;  %2149 = vmatprep.subr.bf16.mxu1 %v2328_v5  ;;  %v2333_v10 = vld [vmem:[%s2981_s1 + $0x130] sm:$0xff]   ;;  %v2336_v13 = vld [vmem:[%s2981_s1 + $0x1e8] sm:$0xff]  }
  0x14   : > { %v2330_v7 = vld [vmem:[%s2981_s1 + $0x1b8] sm:$0xff]   ;;  %2128 = vmatpush3.bf16.msra.mxu0 %v2329_v6  ;;  %v2334_v11 = vld [vmem:[%s2981_s1 + $0x1b0] sm:$0xff]   ;;  %v2337_v14 = vld [vmem:[%s2981_s1 + $0x128] sm:$0xff]  }
  0x15   : > { %2150 = vmatpush3.bf16.msra.mxu1 %v2330_v7  ;;  %2129 = vmatprep.subr.bf16.mxu0 %v2331_v8  ;;  %v2338_v15 = vld [vmem:[%s2981_s1 + $0x1a8] sm:$0xff]   ;;  %v2339_v16 = vld [vmem:[%s2981_s1 + $0x160] sm:$0xff]   ;;  %v2343_v20 = vld [vmem:[%s2981_s1 + $0x158] sm:$0xff]  }
  0x16   : > { %2151 = vmatprep.subr.bf16.mxu1 %v2332_v9  ;;  %v2340_v17 = vld [vmem:[%s2981_s1 + $0x1e0] sm:$0xff]   ;;  %v2344_v21 = vld [vmem:[%s2981_s1 + $0x1d8] sm:$0xff]   ;;  %v2347_v24 = vld [vmem:[%s2981_s1 + $0x150] sm:$0xff]  }
  0x17   : > { %v2341_v18 = vld [vmem:[%s2981_s1 + $0x120] sm:$0xff]   ;;  %v2345_v22 = vld [vmem:[%s2981_s1 + $0x118] sm:$0xff]   ;;  %v2348_v25 = vld [vmem:[%s2981_s1 + $0x1d0] sm:$0xff]  }
  0x18   : > { %2130 = vmatpush3.bf16.msra.mxu0 %v2333_v10  ;;  %v2342_v19 = vld [vmem:[%s2981_s1 + $0x1a0] sm:$0xff]   ;;  %v2346_v23 = vld [vmem:[%s2981_s1 + $0x198] sm:$0xff]   ;;  %v2349_v26 = vld [vmem:[%s2981_s1 + $0x110] sm:$0xff]  }
  0x19   : > { %2152 = vmatpush3.bf16.msra.mxu1 %v2334_v11  ;;  %2131 = vmatprep.subr.bf16.mxu0 %v2335_v12  ;;  %v2350_v27 = vld [vmem:[%s2981_s1 + $0x190] sm:$0xff]   ;;  %v2351_v28 = vld [vmem:[%s2981_s1 + $0x148] sm:$0xff]   ;;  %v2355_v32 = vld [vmem:[%s2981_s1 + $0x140] sm:$0xff]  }
  0x1a   : > { %2153 = vmatprep.subr.bf16.mxu1 %v2336_v13  ;;  %v2352_v29 = vld [vmem:[%s2981_s1 + $0x1c8] sm:$0xff]   ;;  %v2356_v33 = vld [vmem:[%s2981_s1 + $0x1c0] sm:$0xff]   ;;  %v2639_v36 = vld [vmem:[#allocation2 + $0x10] sm:$0xff] }
  0x1b   : > { %v2353_v30 = vld [vmem:[%s2981_s1 + $0x108] sm:$0xff]   ;;  %v2357_v34 = vld [vmem:[%s2981_s1 + $0x100] sm:$0xff]   ;;  %v2641_v37 = vld [vmem:[#allocation2 + $0x18] sm:$0x11]  ;;  %v1887_v2 = vcombine.high %v2639_v36, %v2639_v36 }
  0x1c   : > { %2132 = vmatpush3.bf16.msra.mxu0 %v2337_v14  ;;  %v2354_v31 = vld [vmem:[%s2981_s1 + $0x188] sm:$0xff]   ;;  %v2358_v35 = vld [vmem:[%s2981_s1 + $0x180] sm:$0xff]   ;;  %v1850_v39 = vcombine.low %v2639_v36, %v2641_v37  ;;  %v1851_v40 = vcombine.high %v2639_v36, %v2641_v37  ;;  %v2363_v44 = vld [vmem:[%s2981_s1 + $0x78] sm:$0xff]  }
  0x1d   : > { %2154 = vmatpush3.bf16.msra.mxu1 %v2338_v15  ;;  %2133 = vmatprep.subr.bf16.mxu0 %v2339_v16  ;;  %v2643_v38 = vld [vmem:[#allocation2] sm:$0xff]  ;;  %v2649_v41 = vld [vmem:[#allocation2 + $0x8] sm:$0x11]  ;;  %v2364_v49 = vld [vmem:[%s2981_s1 + $0xf8] sm:$0xff]  }
  0x1e   : > { %2155 = vmatprep.subr.bf16.mxu1 %v2340_v17  ;;  %v1852_v42 = vcombine.low %v2643_v38, %v2649_v41  ;;  %v1853_v43 = vcombine.high %v2643_v38, %v2649_v41  ;;  %v364_v45 = vshrl.u32 %v1851_v40, 16  ;;  %v366_v46 = vshll.u32 %v1851_v40, 16  ;;  %v2365_v58 = vld [vmem:[%s2981_s1 + $0x38] sm:$0xff]   ;;  %v2367_v0 = vld [vmem:[%s2981_s1 + $0x70] sm:$0xff]   ;;  %v2371_v6 = vld [vmem:[%s2981_s1 + $0x68] sm:$0xff]  }
  0x1f   : > { %v357_v47 = vshrl.u32 %v1850_v39, 16  ;;  %v359_v48 = vshll.u32 %v1850_v39, 16  ;;  %v2366_v59 = vld [vmem:[%s2981_s1 + $0xb8] sm:$0xff]   ;;  %v2368_v1 = vld [vmem:[%s2981_s1 + $0xf0] sm:$0xff]   ;;  %v1889_v4 = vcombine.high %v2643_v38, %v2643_v38  ;;  %v2372_v7 = vld [vmem:[%s2981_s1 + $0xe8] sm:$0xff]  }
  0x20   : > { %2134 = vmatpush3.bf16.msra.mxu0 %v2341_v18  ;;  %v378_v50 = vshrl.u32 %v1853_v43, 16  ;;  %v380_v51 = vshll.u32 %v1853_v43, 16  ;;  %v371_v52 = vshrl.u32 %v1852_v42, 16  ;;  %v373_v53 = vshll.u32 %v1852_v42, 16  ;;  %v2369_v3 = vld [vmem:[%s2981_s1 + $0x30] sm:$0xff]   ;;  %v2373_v8 = vld [vmem:[%s2981_s1 + $0x28] sm:$0xff]  }
  0x21   : > { %2156 = vmatpush3.bf16.msra.mxu1 %v2342_v19  ;;  %2135 = vmatprep.subr.bf16.mxu0 %v2343_v20  ;;  %v368_v54 = vrot.slane %v366_v46, 1  ;;  %v361_v55 = vrot.slane %v359_v48, 1  ;;  %v2370_v5 = vld [vmem:[%s2981_s1 + $0xb0] sm:$0xff]   ;;  %v2374_v9 = vld [vmem:[%s2981_s1 + $0xa8] sm:$0xff]   ;;  %v2375_v10 = vld [vmem:[%s2981_s1 + $0x60] sm:$0xff]  }
  0x22   : > { %2157 = vmatprep.subr.bf16.mxu1 %v2344_v21  ;;  %v382_v56 = vrot.slane %v380_v51, 1  ;;  %v375_v57 = vrot.slane %v373_v53, 1  ;;  %v2376_v11 = vld [vmem:[%s2981_s1 + $0xe0] sm:$0xff]   ;;  %v2379_v14 = vld [vmem:[%s2981_s1 + $0x58] sm:$0xff]   ;;  %v2383_v18 = vld [vmem:[%s2981_s1 + $0x50] sm:$0xff]  }
  0x23   : > { %v369_v60 = vor.u32 %v368_v54, %v364_v45  ;;  %v362_v61 = vor.u32 %v361_v55, %v357_v47  ;;  %v2377_v12 = vld [vmem:[%s2981_s1 + $0x20] sm:$0xff]   ;;  %v2380_v15 = vld [vmem:[%s2981_s1 + $0xd8] sm:$0xff]   ;;  %v2384_v19 = vld [vmem:[%s2981_s1 + $0xd0] sm:$0xff]  }
  0x24   : > { %2136 = vmatpush3.bf16.msra.mxu0 %v2345_v22  ;;  %v383_v62 = vor.u32 %v382_v56, %v378_v50  ;;  %v376_v63 = vor.u32 %v375_v57, %v371_v52  ;;  %v2378_v13 = vld [vmem:[%s2981_s1 + $0xa0] sm:$0xff]   ;;  %v2381_v16 = vld [vmem:[%s2981_s1 + $0x18] sm:$0xff]   ;;  %v2385_v20 = vld [vmem:[%s2981_s1 + $0x10] sm:$0xff]  }
  0x25   : > { %2158 = vmatpush3.bf16.msra.mxu1 %v2346_v23  ;;  %2137 = vmatprep.subr.bf16.mxu0 %v2347_v24  ;;  %v2382_v17 = vld [vmem:[%s2981_s1 + $0x98] sm:$0xff]   ;;  %v2386_v21 = vld [vmem:[%s2981_s1 + $0x90] sm:$0xff]   ;;  %v2387_v22 = vld [vmem:[%s2981_s1 + $0x48] sm:$0xff]  }
  0x26   : > { %2159 = vmatprep.subr.bf16.mxu1 %v2348_v25  ;;  %612 = vmatprep.mubr.bf16.mxu0 %v369_v60  ;;  %v2388_v23 = vld [vmem:[%s2981_s1 + $0xc8] sm:$0xff]   ;;  %v2403_v39 = vld [vmem:[%s2981_s1 + $0x270] sm:$0xff]   ;;  %v2411_v46 = vld [vmem:[%s2981_s1 + $0x260] sm:$0xff]  }
  0x27   : > { %652 = vmatprep.mubr.bf16.mxu1 %v383_v62  ;;  %v2389_v24 = vld [vmem:[%s2981_s1 + $0x8] sm:$0xff]   ;;  %v2406_v40 = vld [vmem:[%s2981_s1 + $0x2b0] sm:$0xff]   ;;  %v2412_v47 = vld [vmem:[%s2981_s1 + $0x2e0] sm:$0xff]  }
  0x28   : > { %2138 = vmatpush3.bf16.msra.mxu0 %v2349_v26  ;;  %v2390_v25 = vld [vmem:[%s2981_s1 + $0x88] sm:$0xff]   ;;  %v2391_v26 = vld [vmem:[%s2981_s1 + $0x40] sm:$0xff]   ;;  %v2415_v50 = vld [vmem:[%s2981_s1 + $0x258] sm:$0xff]  }
  0x29   : > { %2160 = vmatpush3.bf16.msra.mxu1 %v2350_v27  ;;  %2139 = vmatprep.subr.bf16.mxu0 %v2351_v28  ;;  %v2392_v27 = vld [vmem:[%s2981_s1 + $0xc0] sm:$0xff]   ;;  %v2407_v42 = vld [vmem:[%s2981_s1 + $0x268] sm:$0xff]   ;;  %v2416_v51 = vld [vmem:[%s2981_s1 + $0x2d8] sm:$0xff]  }
  0x2a   : > { %2161 = vmatprep.subr.bf16.mxu1 %v2352_v29  ;;  %v2393_v28 = vld [vmem:[%s2981_s1] sm:$0xff]   ;;  %v2408_v43 = vld [vmem:[%s2981_s1 + $0x2e8] sm:$0xff]   ;;  %v2417_v52 = vld [vmem:[%s2981_s1 + $0x218] sm:$0xff]  }
  0x2b   : > { %v2394_v29 = vld [vmem:[%s2981_s1 + $0x80] sm:$0xff]   ;;  %v2410_v45 = vld [vmem:[%s2981_s1 + $0x2a8] sm:$0xff]   ;;  %v2418_v53 = vld [vmem:[%s2981_s1 + $0x298] sm:$0xff]  }
  0x2c   : > { %2140 = vmatpush3.bf16.msra.mxu0 %v2353_v30  ;;  %v2399_v30 = vld [vmem:[%s2981_s1 + $0x278] sm:$0xff]   ;;  %v2413_v48 = vld [vmem:[%s2981_s1 + $0x220] sm:$0xff]   ;;  %v2419_v54 = vld [vmem:[%s2981_s1 + $0x250] sm:$0xff]  }
  0x2d   : > { %2162 = vmatpush3.bf16.msra.mxu1 %v2354_v31  ;;  %2141 = vmatprep.subr.bf16.mxu0 %v2355_v32  ;;  %v2400_v31 = vld [vmem:[%s2981_s1 + $0x2f8] sm:$0xff]   ;;  %v1886_v32 = vcombine.low %v2639_v36, %v2639_v36  ;;  %v2404_v36 = vld [vmem:[%s2981_s1 + $0x2f0] sm:$0xff]   ;;  %v2425_v60 = vld [vmem:[%s2981_s1 + $0x208] sm:$0xff]  }
  0x2e   : > { %2163 = vmatprep.subr.bf16.mxu1 %v2356_v33  ;;  %v2401_v33 = vld [vmem:[%s2981_s1 + $0x238] sm:$0xff]   ;;  %v2420_v55 = vld [vmem:[%s2981_s1 + $0x2d0] sm:$0xff]   ;;  %v2427_v62 = vld [vmem:[%s2981_s1 + $0x240] sm:$0xff]  }
  0x2f   : > { %v2421_v56 = vld [vmem:[%s2981_s1 + $0x210] sm:$0xff]  }
  0x30   : > { %2142 = vmatpush3.bf16.msra.mxu0 %v2357_v34  ;;  %v1888_v34 = vcombine.low %v2643_v38, %v2643_v38  ;;  %v2405_v38 = vld [vmem:[%s2981_s1 + $0x230] sm:$0xff]  }
  0x31   : > { %2164 = vmatpush3.bf16.msra.mxu1 %v2358_v35  ;;  %2171 = vmatprep.subr.bf16.mxu0 %v2363_v44  ;;  %v2402_v35 = vld [vmem:[%s2981_s1 + $0x2b8] sm:$0xff]   ;;  %v2409_v44 = vld [vmem:[%s2981_s1 + $0x228] sm:$0xff]   ;;  %v2422_v57 = vld [vmem:[%s2981_s1 + $0x290] sm:$0xff]  }
  0x32   : > { %2193 = vmatprep.subr.bf16.mxu1 %v2364_v49  ;;  %v2414_v49 = vld [vmem:[%s2981_s1 + $0x2a0] sm:$0xff]  }
  0x33   : > { %613 = vmatmul.mubr.bf16.vlgmr.msra.gmra.mxu0 %v362_v61  ;;  %v2426_v61 = vld [vmem:[%s2981_s1 + $0x288] sm:$0xff]  }
  0x34   : > { %653 = vmatmul.mubr.bf16.vlgmr.msra.gmra.mxu1 %v376_v63  ;;  %2172 = vmatpush3.bf16.msra.mxu0 %v2365_v58  ;;  %v2423_v58 = vld [vmem:[%s2981_s1 + $0x248] sm:$0xff]   ;;  %v2428_v63 = vld [vmem:[%s2981_s1 + $0x2c0] sm:$0xff]  }
  0x35   : > { %2194 = vmatpush3.bf16.msra.mxu1 %v2366_v59  ;;  %2173 = vmatprep.subr.bf16.mxu0 %v2367_v0  ;;  %v2424_v59 = vld [vmem:[%s2981_s1 + $0x2c8] sm:$0xff]   ;;  %v2429_v0 = vld [vmem:[%s2981_s1 + $0x200] sm:$0xff]  }
  0x36   : > { %2195 = vmatprep.subr.bf16.mxu1 %v2368_v1  ;;  %898 = vmatprep.mubr.bf16.mxu0 %v1887_v2  ;;  %v2852_v1 = vld [vmem:[#allocation2 + $0x10] sm:$0xee] }
  0x37   : > { %938 = vmatprep.mubr.bf16.mxu1 %v1889_v4  ;;  %v1987_v2 = vcombine.high %v2852_v1, %v2641_v37  ;;  %v1986_v4 = vcombine.low %v2852_v1, %v2641_v37  ;;  %v2436_v37 = vld [vmem:[%s2981_s1 + $0x3f8] sm:$0xff]  }
  0x38   : > { %2174 = vmatpush3.bf16.msra.mxu0 %v2369_v3  ;;  %v2856_v3 = vld [vmem:[#allocation2] sm:$0xee] }
  0x39   : > { %2196 = vmatpush3.bf16.msra.mxu1 %v2370_v5  ;;  %2175 = vmatprep.subr.bf16.mxu0 %v2371_v6  ;;  %v2430_v5 = vld [vmem:[%s2981_s1 + $0x280] sm:$0xff]   ;;  %v1989_v6 = vcombine.high %v2856_v3, %v2649_v41 }
  0x3a   : > { %2197 = vmatprep.subr.bf16.mxu1 %v2372_v7  ;;  %v1988_v7 = vcombine.low %v2856_v3, %v2649_v41  ;;  %v2438_v41 = vld [vmem:[%s2981_s1 + $0x3b8] sm:$0xff]  }
  0x3c   : > { %2176 = vmatpush3.bf16.msra.mxu0 %v2373_v8  ;;  %v1024_v8 = vrot.slane %v1987_v2, 1 }
  0x3d   : > { %2198 = vmatpush3.bf16.msra.mxu1 %v2374_v9  ;;  %2177 = vmatprep.subr.bf16.mxu0 %v2375_v10  ;;  %v1023_v9 = vrot.slane %v1986_v4, 1  ;;  %v2435_v10 = vld [vmem:[%s2981_s1 + $0x378] sm:$0xff]  }
  0x3e   : > { %2199 = vmatprep.subr.bf16.mxu1 %v2376_v11  ;;  %v1026_v11 = vrot.slane %v1989_v6, 1 }
  0x40   : > { %2178 = vmatpush3.bf16.msra.mxu0 %v2377_v12  ;;  %v2437_v12 = vld [vmem:[%s2981_s1 + $0x338] sm:$0xff]  }
  0x41   : > { %2200 = vmatpush3.bf16.msra.mxu1 %v2378_v13  ;;  %2179 = vmatprep.subr.bf16.mxu0 %v2379_v14  ;;  %v1025_v13 = vrot.slane %v1988_v7, 1  ;;  %v2439_v14 = vld [vmem:[%s2981_s1 + $0x370] sm:$0xff]  }
  0x42   : > { %2201 = vmatprep.subr.bf16.mxu1 %v2380_v15  ;;  %v2440_v15 = vld [vmem:[%s2981_s1 + $0x3f0] sm:$0xff]  }
  0x44   : > { %2180 = vmatpush3.bf16.msra.mxu0 %v2381_v16  ;;  %v2441_v16 = vld [vmem:[%s2981_s1 + $0x330] sm:$0xff]  }
  0x45   : > { %2202 = vmatpush3.bf16.msra.mxu1 %v2382_v17  ;;  %2181 = vmatprep.subr.bf16.mxu0 %v2383_v18  ;;  %v2442_v17 = vld [vmem:[%s2981_s1 + $0x3b0] sm:$0xff]   ;;  %v2443_v18 = vld [vmem:[%s2981_s1 + $0x368] sm:$0xff]  }
  0x46   : > { %2203 = vmatprep.subr.bf16.mxu1 %v2384_v19  ;;  %v2444_v19 = vld [vmem:[%s2981_s1 + $0x3e8] sm:$0xff]  }
  0x48   : > { %2182 = vmatpush3.bf16.msra.mxu0 %v2385_v20  ;;  %v2445_v20 = vld [vmem:[%s2981_s1 + $0x328] sm:$0xff]  }
  0x49   : > { %2204 = vmatpush3.bf16.msra.mxu1 %v2386_v21  ;;  %2183 = vmatprep.subr.bf16.mxu0 %v2387_v22  ;;  %v2446_v21 = vld [vmem:[%s2981_s1 + $0x3a8] sm:$0xff]   ;;  %v2447_v22 = vld [vmem:[%s2981_s1 + $0x360] sm:$0xff]  }
  0x4a   : > { %2205 = vmatprep.subr.bf16.mxu1 %v2388_v23  ;;  %v2448_v23 = vld [vmem:[%s2981_s1 + $0x3e0] sm:$0xff]  }
  0x4c   : > { %2184 = vmatpush3.bf16.msra.mxu0 %v2389_v24  ;;  %v2449_v24 = vld [vmem:[%s2981_s1 + $0x320] sm:$0xff]  }
  0x4d   : > { %2206 = vmatpush3.bf16.msra.mxu1 %v2390_v25  ;;  %2185 = vmatprep.subr.bf16.mxu0 %v2391_v26  ;;  %v2450_v25 = vld [vmem:[%s2981_s1 + $0x3a0] sm:$0xff]   ;;  %v2451_v26 = vld [vmem:[%s2981_s1 + $0x358] sm:$0xff]  }
  0x4e   : > { %2207 = vmatprep.subr.bf16.mxu1 %v2392_v27  ;;  %v2452_v27 = vld [vmem:[%s2981_s1 + $0x3d8] sm:$0xff]  }
  0x50   : > { %2186 = vmatpush3.bf16.msra.mxu0 %v2393_v28  ;;  %v2453_v28 = vld [vmem:[%s2981_s1 + $0x318] sm:$0xff]  }
  0x51   : > { %2208 = vmatpush3.bf16.msra.mxu1 %v2394_v29  ;;  %2215 = vmatprep.subr.bf16.mxu0 %v2399_v30  ;;  %v2454_v29 = vld [vmem:[%s2981_s1 + $0x398] sm:$0xff]   ;;  %v2455_v30 = vld [vmem:[%s2981_s1 + $0x350] sm:$0xff]  }
  0x52   : > { %2237 = vmatprep.subr.bf16.mxu1 %v2400_v31  ;;  %v2456_v31 = vld [vmem:[%s2981_s1 + $0x3d0] sm:$0xff]  }
  0x53   : > { %899 = vmatmul.mubr.bf16.vlgmr.msra.gmra.mxu0 %v1886_v32  ;;  %v2457_v32 = vld [vmem:[%s2981_s1 + $0x310] sm:$0xff]  }
  0x54   : > { %939 = vmatmul.mubr.bf16.vlgmr.msra.gmra.mxu1 %v1888_v34  ;;  %2216 = vmatpush3.bf16.msra.mxu0 %v2401_v33  ;;  %v2458_v33 = vld [vmem:[%s2981_s1 + $0x390] sm:$0xff]   ;;  %v2459_v34 = vld [vmem:[%s2981_s1 + $0x348] sm:$0xff]  }
  0x55   : > { %2238 = vmatpush3.bf16.msra.mxu1 %v2402_v35  ;;  %2217 = vmatprep.subr.bf16.mxu0 %v2403_v39  ;;  %v2460_v35 = vld [vmem:[%s2981_s1 + $0x3c8] sm:$0xff]  }
  0x56   : > { %2239 = vmatprep.subr.bf16.mxu1 %v2404_v36  ;;  %1255 = vmatprep.mubr.bf16.mxu0 %v1024_v8  ;;  %v2461_v39 = vld [vmem:[%s2981_s1 + $0x308] sm:$0xff]  }
  0x57   : > { %1295 = vmatprep.mubr.bf16.mxu1 %v1026_v11  ;;  %v2462_v36 = vld [vmem:[%s2981_s1 + $0x388] sm:$0xff]  }
  0x58   : > { %2218 = vmatpush3.bf16.msra.mxu0 %v2405_v38  ;;  %v2463_v38 = vld [vmem:[%s2981_s1 + $0x340] sm:$0xff]  }
  0x59   : > { %2240 = vmatpush3.bf16.msra.mxu1 %v2406_v40  ;;  %2219 = vmatprep.subr.bf16.mxu0 %v2407_v42  ;;  %v2464_v40 = vld [vmem:[%s2981_s1 + $0x3c0] sm:$0xff]  }
  0x5a   : > { %2241 = vmatprep.subr.bf16.mxu1 %v2408_v43  ;;  %v2465_v42 = vld [vmem:[%s2981_s1 + $0x300] sm:$0xff]   ;;  %v1304_v43 = vld [vmem:[#allocation2 + $0x18] sm:$0x33] }
  0x5c   : > { %2220 = vmatpush3.bf16.msra.mxu0 %v2409_v44  ;;  %v2466_v44 = vld [vmem:[%s2981_s1 + $0x380] sm:$0xff]  }
  0x5d   : > { %2242 = vmatpush3.bf16.msra.mxu1 %v2410_v45  ;;  %2221 = vmatprep.subr.bf16.mxu0 %v2411_v46  ;;  %v2086_v45 = vcombine.low %v2852_v1, %v1304_v43  ;;  %v2087_v46 = vcombine.high %v2852_v1, %v1304_v43 }
  0x5e   : > { %2243 = vmatprep.subr.bf16.mxu1 %v2412_v47  ;;  %v1305_v47 = vld [vmem:[#allocation2 + $0x8] sm:$0x33] }
  0x60   : > { %2222 = vmatpush3.bf16.msra.mxu0 %v2413_v48  ;;  %v2088_v48 = vcombine.low %v2856_v3, %v1305_v47 }
  0x61   : > { %2244 = vmatpush3.bf16.msra.mxu1 %v2414_v49  ;;  %2223 = vmatprep.subr.bf16.mxu0 %v2415_v50  ;;  %v2089_v49 = vcombine.high %v2856_v3, %v1305_v47  ;;  %v1390_v50 = vshrl.u32 %v2087_v46, 16 }
  0x62   : > { %2245 = vmatprep.subr.bf16.mxu1 %v2416_v51  ;;  %v1393_v51 = vshll.u32 %v2087_v46, 16 }
  0x64   : > { %2224 = vmatpush3.bf16.msra.mxu0 %v2417_v52  ;;  %v1382_v52 = vshrl.u32 %v2086_v45, 16 }
  0x65   : > { %2246 = vmatpush3.bf16.msra.mxu1 %v2418_v53  ;;  %2225 = vmatprep.subr.bf16.mxu0 %v2419_v54  ;;  %v1385_v53 = vshll.u32 %v2086_v45, 16  ;;  %v1406_v54 = vshrl.u32 %v2089_v49, 16 }
  0x66   : > { %2247 = vmatprep.subr.bf16.mxu1 %v2420_v55  ;;  %v1409_v55 = vshll.u32 %v2089_v49, 16 }
  0x68   : > { %2226 = vmatpush3.bf16.msra.mxu0 %v2421_v56  ;;  %v1398_v56 = vshrl.u32 %v2088_v48, 16 }
  0x69   : > { %2248 = vmatpush3.bf16.msra.mxu1 %v2422_v57  ;;  %2227 = vmatprep.subr.bf16.mxu0 %v2423_v58  ;;  %v1401_v57 = vshll.u32 %v2088_v48, 16  ;;  %v1392_v58 = vrot.slane %v1390_v50, 1 }
  0x6a   : > { %2249 = vmatprep.subr.bf16.mxu1 %v2424_v59  ;;  %v1395_v59 = vrot.slane %v1393_v51, 2  ;;  %v2122_v51 = vld [vmem:[%s2982_s2] ss:$0 sm:$0xff] }
  0x6b   : > { %v1403_v1 = vrot.slane %v1401_v57, 2 }
  0x6c   : > { %2228 = vmatpush3.bf16.msra.mxu0 %v2425_v60  ;;  %v1384_v60 = vrot.slane %v1382_v52, 1  ;;  %v1396_v2 = vor.u32 %v1395_v59, %v1392_v58 }
  0x6d   : > { %2250 = vmatpush3.bf16.msra.mxu1 %v2426_v61  ;;  %2229 = vmatprep.subr.bf16.mxu0 %v2427_v62  ;;  %v1387_v61 = vrot.slane %v1385_v53, 2  ;;  %v1408_v62 = vrot.slane %v1406_v54, 1 }
  0x6e   : > { %2251 = vmatprep.subr.bf16.mxu1 %v2428_v63  ;;  %v1411_v63 = vrot.slane %v1409_v55, 2 }
  0x6f   : > { %v1388_v3 = vor.u32 %v1387_v61, %v1384_v60 }
  0x70   : > { %2230 = vmatpush3.bf16.msra.mxu0 %v2429_v0  ;;  %v1400_v0 = vrot.slane %v1398_v56, 1  ;;  %v1412_v4 = vor.u32 %v1411_v63, %v1408_v62 }
  0x71   : > { %2252 = vmatpush3.bf16.msra.mxu1 %v2430_v5  ;;  %2259 = vmatprep.subr.bf16.mxu0 %v2435_v10 }
  0x72   : > { %2281 = vmatprep.subr.bf16.mxu1 %v2436_v37  ;;  %v1404_v5 = vor.u32 %v1403_v1, %v1400_v0 }
  0x73   : > { %1256 = vmatmul.mubr.bf16.vlgmr.msra.gmra.mxu0 %v1023_v9 }
  0x74   : > { %1296 = vmatmul.mubr.bf16.vlgmr.msra.gmra.mxu1 %v1025_v13  ;;  %2260 = vmatpush3.bf16.msra.mxu0 %v2437_v12 }
  0x75   : > { %2282 = vmatpush3.bf16.msra.mxu1 %v2438_v41  ;;  %2261 = vmatprep.subr.bf16.mxu0 %v2439_v14 }
  0x76   : > { %2283 = vmatprep.subr.bf16.mxu1 %v2440_v15  ;;  %1641 = vmatprep.mubr.bf16.mxu0 %v1396_v2 }
  0x77   : > { %1681 = vmatprep.mubr.bf16.mxu1 %v1412_v4 }
  0x78   : > { %2262 = vmatpush3.bf16.msra.mxu0 %v2441_v16 }
  0x79   : > { %2284 = vmatpush3.bf16.msra.mxu1 %v2442_v17  ;;  %2263 = vmatprep.subr.bf16.mxu0 %v2443_v18 }
  0x7a   : > { %2285 = vmatprep.subr.bf16.mxu1 %v2444_v19 }
  0x7c   : > { %2264 = vmatpush3.bf16.msra.mxu0 %v2445_v20 }
  0x7d   : > { %2286 = vmatpush3.bf16.msra.mxu1 %v2446_v21  ;;  %2265 = vmatprep.subr.bf16.mxu0 %v2447_v22 }
  0x7e   : > { %2287 = vmatprep.subr.bf16.mxu1 %v2448_v23 }
  0x80   : > { %2266 = vmatpush3.bf16.msra.mxu0 %v2449_v24 }
  0x81   : > { %2288 = vmatpush3.bf16.msra.mxu1 %v2450_v25  ;;  %2267 = vmatprep.subr.bf16.mxu0 %v2451_v26 }
  0x82   : > { %2289 = vmatprep.subr.bf16.mxu1 %v2452_v27 }
  0x84   : > { %2268 = vmatpush3.bf16.msra.mxu0 %v2453_v28 }
  0x85   : > { %2290 = vmatpush3.bf16.msra.mxu1 %v2454_v29  ;;  %2269 = vmatprep.subr.bf16.mxu0 %v2455_v30 }
  0x86   : > { %2291 = vmatprep.subr.bf16.mxu1 %v2456_v31 }
  0x88   : > { %2270 = vmatpush3.bf16.msra.mxu0 %v2457_v32 }
  0x89   : > { %2292 = vmatpush3.bf16.msra.mxu1 %v2458_v33  ;;  %2271 = vmatprep.subr.bf16.mxu0 %v2459_v34 }
  0x8a   : > { %2293 = vmatprep.subr.bf16.mxu1 %v2460_v35 }
  0x8c   : > { %2272 = vmatpush3.bf16.msra.mxu0 %v2461_v39 }
  0x8d   : > { %2294 = vmatpush3.bf16.msra.mxu1 %v2462_v36  ;;  %2273 = vmatprep.subr.bf16.mxu0 %v2463_v38 }
  0x8e   : > { %2295 = vmatprep.subr.bf16.mxu1 %v2464_v40 }
  0x90   : > { %2274 = vmatpush3.bf16.msra.mxu0 %v2465_v42 }
  0x91   : > { %2296 = vmatpush3.bf16.msra.mxu1 %v2466_v44 }
  0x93   : > { %1642 = vmatmul.mubr.bf16.vlgmr.msra.gmra.mxu0 %v1388_v3 }
  0x94   : > { %1682 = vmatmul.mubr.bf16.vlgmr.msra.gmra.mxu1 %v1404_v5 }
  0xf3   : > { %v2143_v6 = vpop.f32.mrf.mxu0 }
  0xf4   : > { %v2165_v7 = vpop.f32.mrf.mxu1 }
  0xf5   : > { %v2144_v8 = vpop.f32.mrf.mxu0 }
  0xf6   : > { %v2145_v9 = vadd.f32 %v2144_v8, %v2143_v6  ;;  %v2166_v10 = vpop.f32.mrf.mxu1 }
  0xf7   : > { %v2167_v37 = vadd.f32 %v2166_v10, %v2165_v7  ;;  %v2146_v11 = vpop.f32.mrf.mxu0 }
  0xf8   : > { %v2168_v12 = vpop.f32.mrf.mxu1 }
  0xf9   : > { %v655_v13 = vadd.f32 %v2167_v37, %v2145_v9  ;;  %v2147_v41 = vpop.f32.mrf.mxu0 }
  0xfa   : > { %v2169_v14 = vpop.f32.mrf.mxu1 }
 0x113   : > { %v2187_v15 = vpop.f32.mrf.mxu0 }
 0x114   : > { %v2209_v16 = vpop.f32.mrf.mxu1 }
 0x115   : > { %v2188_v17 = vpop.f32.mrf.mxu0 }
 0x116   : > { %v2189_v18 = vadd.f32 %v2188_v17, %v2187_v15  ;;  %v2210_v19 = vpop.f32.mrf.mxu1 }
 0x117   : > { %v2211_v20 = vadd.f32 %v2210_v19, %v2209_v16  ;;  %v2190_v21 = vpop.f32.mrf.mxu0 }
 0x118   : > { %v901_v22 = vadd.f32 %v2189_v18, %v655_v13  ;;  %v2212_v23 = vpop.f32.mrf.mxu1 }
 0x119   : > { %v2191_v24 = vpop.f32.mrf.mxu0 }
 0x11a   : > { %v941_v25 = vadd.f32 %v2211_v20, %v901_v22  ;;  %v2213_v26 = vpop.f32.mrf.mxu1 }
 0x133   : > { %v2231_v27 = vpop.f32.mrf.mxu0 }
 0x134   : > { %v2253_v28 = vpop.f32.mrf.mxu1 }
 0x135   : > { %v2232_v29 = vpop.f32.mrf.mxu0 }
 0x136   : > { %v2254_v30 = vpop.f32.mrf.mxu1  ;;  %v2233_v35 = vadd.f32 %v2232_v29, %v2231_v27 }
 0x137   : > { %v2234_v31 = vpop.f32.mrf.mxu0  ;;  %v2255_v39 = vadd.f32 %v2254_v30, %v2253_v28 }
 0x138   : > { %v2256_v32 = vpop.f32.mrf.mxu1 }
 0x139   : > { %v2235_v33 = vpop.f32.mrf.mxu0  ;;  %v1298_v40 = vadd.f32 %v2255_v39, %v2233_v35 }
 0x13a   : > { %v2257_v34 = vpop.f32.mrf.mxu1 }
 0x13b   : > { %v1303_v48 = vadd.f32 %v1298_v40, %v941_v25 }
 0x153   : > { %v2275_v36 = vpop.f32.mrf.mxu0 }
 0x154   : > { %v2297_v38 = vpop.f32.mrf.mxu1 }
 0x155   : > { %v2276_v42 = vpop.f32.mrf.mxu0 }
 0x156   : > { %v2277_v43 = vadd.f32 %v2276_v42, %v2275_v36  ;;  %v2298_v44 = vpop.f32.mrf.mxu1 }
 0x157   : > { %v2299_v45 = vadd.f32 %v2298_v44, %v2297_v38  ;;  %v2278_v46 = vpop.f32.mrf.mxu0 }
 0x158   : > { %v2300_v47 = vpop.f32.mrf.mxu1 }
 0x159   : > { %v1684_v49 = vadd.f32 %v2299_v45, %v2277_v43  ;;  %v2279_v50 = vpop.f32.mrf.mxu0 }
 0x15a   : > { %v2301_v52 = vpop.f32.mrf.mxu1 }
 0x15b   : > { %v1689_v53 = vadd.f32 %v1684_v49, %v1303_v48 }
 0x15d   : > { %v1697_v54 = vadd.f32 %v2122_v51, %v1689_v53 }
 0x15f   : > { %v1698_v55 = vmax.f32 %v1697_v54, 0.0 }
 0x161   : > { %v1699_v56 = vpack.c.bf16 %v1698_v55, %v1698_v55 }
 0x163   : > { %1700 = vst [vmem:[%s2541_s23] sm:$0xf] %v1699_v56 }
 0x164 PF: > { %s13_s14 = sadd.s32 1, %s2495_s14   ;;  %s2984_s12 = smov %s2491_s13 }
 0x165   : > { %p10_p5 = scmp.ge.s32.totalorder %s13_s14, 4   ;;  %s2985_s13 = smov %s2987_s15 }
 0x167   :  { %12 = sbr.rel (!%p10_p5) target bundleno = 2 (0x2), region = 101 }
 0x16c   :  { %1726 = vsyncmov [#allocation3] }
 0x16f   :  { %s1727_s29 = vpop.sfrf %1726 }
 0x170   :  { %p2125_p6 = scmp.ne.s32.totalorder %s1727_s29, 0 }
 0x172   :  { %1731 = shalt.err (%p2125_p6)  }

</bundles_post_ra>
